<compile_context>
chip_gen: v5e
topology: v5e:2x2
jax: 0.10.0
libtpu: 0.0.40
codegen_flags: <defaults>
</compile_context>

<pallas_src>
import functools
import math

import jax
import jax.numpy as jnp
from jax.experimental import pallas as pl
from jax.experimental.pallas import tpu as pltpu

BN_EPS = 1e-5
_MAX_SINGLE_K = 2048          # 1x1-conv K up to this runs as a single MXU slab


# ---------------------------------------------------------------------------
# Tiling helpers
# ---------------------------------------------------------------------------

def _round_up(x, m):
    return (x + m - 1) // m * m


def _itemsize(dt):
    return jnp.dtype(dt).itemsize


def _choose_tm(M):
    """M tile: a divisor of M (no pad/slice), large, and >=2 tiles when possible
    so a 'parallel' grid axis can feed both v7x TensorCores."""
    for t in (512, 256, 128, 64, 32, 16, 8):
        if M % t == 0 and M // t >= 2:
            return t, M
    for t in (512, 256, 128, 64, 32, 16, 8):
        if M % t == 0:
            return t, M
    # Rare fallback (odd M): pad to a multiple of 16 (bf16 packs 16 rows/vreg).
    Mp = _round_up(M, 16)
    for t in (512, 256, 128, 64, 32, 16):
        if Mp % t == 0:
            return t, Mp
    return 16, Mp


def _choose_tn(N):
    """Lane-dense 512/256/128 N tiles when the channel width allows it."""
    for t in (512, 256, 128):
        if N % t == 0:
            return t
    return N            # narrow widths (<128): full extent (exact, lane-sparse)


def _vmem_limit_bytes(block_bytes, scratch_bytes=0):
    """Double-buffered pipeline blocks + scratch, with headroom; <=64MiB (v7x)."""
    need = 2 * sum(block_bytes) + scratch_bytes
    need = int(need * 1.25) + (2 << 20)
    return max(4 << 20, min(need, 64 << 20))


# ---------------------------------------------------------------------------
# Kernel 1: tiled (A @ W) + bias (+ fp32 residual) (+ ReLU)
# ---------------------------------------------------------------------------

def _matmul_kernel(*refs, relu, has_res, multi_k):
    if multi_k:
        acc_ref = refs[-1]
        refs = refs[:-1]
    if has_res:
        a_ref, w_ref, b_ref, r_ref, o_ref = refs
    else:
        a_ref, w_ref, b_ref, o_ref = refs
        r_ref = None

    part = jnp.dot(a_ref[...].astype(jnp.bfloat16), w_ref[...],
                   preferred_element_type=jnp.float32)

    def _epilogue(acc):
        out = acc + b_ref[...]
        if has_res:
            out = out + r_ref[...].astype(jnp.float32)   # residual read in fp32
        if relu:
            out = jnp.maximum(out, 0.0)
        o_ref[...] = out.astype(o_ref.dtype)

    if not multi_k:
        # Single-K fast path: no accumulator scratch, no pl.when gating.
        _epilogue(part)
    else:
        @pl.when(pl.program_id(2) == 0)
        def _():
            acc_ref[...] = jnp.zeros_like(acc_ref)

        acc_ref[...] += part

        @pl.when(pl.program_id(2) == pl.num_programs(2) - 1)
        def _():
            _epilogue(acc_ref[...])


def fused_matmul(a, w, bias, residual=None, relu=False, out_dtype=jnp.bfloat16):
    """out = [relu]((a @ w) + bias [+ residual]); bf16 MXU, fp32 epilogue."""
    M, K = a.shape
    Kw, N = w.shape
    assert K == Kw, (K, Kw)

    tn = _choose_tn(N)
    tm, Mp = _choose_tm(M)
    tk = K if K <= _MAX_SINGLE_K else next(
        (t for t in (512, 256, 128) if K % t == 0), K)
    multi_k = tk < K

    if Mp != M:                 # rare fallback; common B*H*W sizes divide cleanly
        a = jnp.pad(a, ((0, Mp - M), (0, 0)))
        if residual is not None:
            residual = jnp.pad(residual, ((0, Mp - M), (0, 0)))

    w = w.astype(jnp.bfloat16)
    bias2d = bias.reshape(1, N).astype(jnp.float32)
    has_res = residual is not None
    nj, ni = N // tn, Mp // tm

    if not multi_k:
        grid = (nj, ni)
        in_specs = [
            pl.BlockSpec((tm, K), lambda j, i: (i, 0)),
            pl.BlockSpec((K, tn), lambda j, i: (0, j)),   # i-invariant -> resident
            pl.BlockSpec((1, tn), lambda j, i: (0, j)),
        ]
        if has_res:
            in_specs.append(pl.BlockSpec((tm, tn), lambda j, i: (i, j)))
        out_spec = pl.BlockSpec((tm, tn), lambda j, i: (i, j))
        scratch = []
        semantics = ("parallel", "parallel")
        acc_bytes = 0
    else:
        grid = (nj, ni, K // tk)
        in_specs = [
            pl.BlockSpec((tm, tk), lambda j, i, k: (i, k)),
            pl.BlockSpec((tk, tn), lambda j, i, k: (k, j)),
            pl.BlockSpec((1, tn), lambda j, i, k: (0, j)),
        ]
        if has_res:
            in_specs.append(pl.BlockSpec((tm, tn), lambda j, i, k: (i, j)))
        out_spec = pl.BlockSpec((tm, tn), lambda j, i, k: (i, j))
        scratch = [pltpu.VMEM((tm, tn), jnp.float32)]
        semantics = ("parallel", "parallel", "arbitrary")
        acc_bytes = tm * tn * 4

    blocks = [tm * tk * _itemsize(a.dtype), tk * tn * 2, tn * 4,
              tm * tn * _itemsize(out_dtype)]
    if has_res:
        blocks.append(tm * tn * 4)
    vlim = _vmem_limit_bytes(blocks, scratch_bytes=acc_bytes)

    args = [a, w, bias2d]
    if has_res:
        args.append(residual.astype(jnp.float32))

    out = pl.pallas_call(
        functools.partial(_matmul_kernel, relu=relu, has_res=has_res,
                          multi_k=multi_k),
        out_shape=jax.ShapeDtypeStruct((Mp, N), out_dtype),
        grid_spec=pltpu.PrefetchScalarGridSpec(
            num_scalar_prefetch=0,
            grid=grid,
            in_specs=in_specs,
            out_specs=out_spec,
            scratch_shapes=scratch,
        ),
        compiler_params=pltpu.CompilerParams(
            dimension_semantics=semantics,
            vmem_limit_bytes=vlim,
        ),
    )(*args)

    if Mp != M:
        out = out[:M]
    return out


# ---------------------------------------------------------------------------
# Kernel 2: direct kxk conv (taps folded into the kernel; no im2col in HBM)
# ---------------------------------------------------------------------------

def _direct_conv_kernel(x_ref, w_ref, b_ref, o_ref, *, taps, kw, stride, Ho, Wo,
                        relu):
    # x_ref: (Hx, Wx, Cin) padded slab for one image (batch dim squeezed)
    # w_ref: (kh*kw, Cin, tn)   b_ref: (1, tn)   o_ref: (Ho, Wo, tn)
    cin = x_ref.shape[-1]
    tn = o_ref.shape[-1]
    acc = jnp.zeros((Ho * Wo, tn), jnp.float32)
    for (di, dj) in taps:
        if stride == 1:
            patch = x_ref[pl.ds(di, Ho), pl.ds(dj, Wo), :]
        else:
            # Stride folded into the in-kernel load (no host strided slice).
            patch = x_ref[pl.ds(di, Ho, stride=stride),
                          pl.ds(dj, Wo, stride=stride), :]
        a = patch.reshape(Ho * Wo, cin).astype(jnp.bfloat16)
        acc = acc + jnp.dot(a, w_ref[di * kw + dj],
                            preferred_element_type=jnp.float32)
    out = acc + b_ref[...]
    if relu:
        out = jnp.maximum(out, 0.0)
    o_ref[...] = out.reshape(Ho, Wo, tn).astype(o_ref.dtype)


def conv_bn_direct(x, w_hwio, bias, stride=1, padding=0, relu=False,
                   out_dtype=jnp.bfloat16):
    """kxk conv + folded BN (+ ReLU). Grid = (Cout tiles, batch); each step
    computes one full image, so the 3x3 halo needs no overlapping blocks, and
    the weight index_map is independent of the inner batch axis (resident)."""
    B, H, W, Cin = x.shape
    kh, kw, _, Cout = w_hwio.shape
    if padding:
        x = jnp.pad(x, ((0, 0), (padding, padding), (padding, padding), (0, 0)))
    Hx, Wx = H + 2 * padding, W + 2 * padding
    Ho = (Hx - kh) // stride + 1
    Wo = (Wx - kw) // stride + 1

    tn = _choose_tn(Cout)
    taps = tuple((i, j) for i in range(kh) for j in range(kw))
    w3 = w_hwio.reshape(kh * kw, Cin, Cout).astype(jnp.bfloat16)
    bias2d = bias.reshape(1, Cout).astype(jnp.float32)

    blocks = [Hx * Wx * Cin * _itemsize(x.dtype), kh * kw * Cin * tn * 2,
              tn * 4, Ho * Wo * tn * _itemsize(out_dtype)]
    scratch_est = Ho * Wo * tn * 4 + Ho * Wo * Cin * 2   # fp32 acc + bf16 taps
    vlim = _vmem_limit_bytes(blocks, scratch_bytes=scratch_est)

    # TODO(synk): for very large spatial maps, tile H with an Element-offset
    # halo instead of whole-image blocks.
    out = pl.pallas_call(
        functools.partial(_direct_conv_kernel, taps=taps, kw=kw, stride=stride,
                          Ho=Ho, Wo=Wo, relu=relu),
        out_shape=jax.ShapeDtypeStruct((B, Ho, Wo, Cout), out_dtype),
        grid_spec=pltpu.PrefetchScalarGridSpec(
            num_scalar_prefetch=0,
            grid=(Cout // tn, B),
            in_specs=[
                pl.BlockSpec((None, Hx, Wx, Cin), lambda j, b: (b, 0, 0, 0)),
                pl.BlockSpec((kh * kw, Cin, tn), lambda j, b: (0, 0, j)),
                pl.BlockSpec((1, tn), lambda j, b: (0, j)),
            ],
            out_specs=pl.BlockSpec((None, Ho, Wo, tn), lambda j, b: (b, 0, 0, j)),
        ),
        compiler_params=pltpu.CompilerParams(
            dimension_semantics=("parallel", "parallel"),
            vmem_limit_bytes=vlim,
        ),
    )(x, w3, bias2d)
    return out


# ---------------------------------------------------------------------------
# Conv wrappers (NHWC, BN folded into weights)
# ---------------------------------------------------------------------------

def conv1x1_bn(x, w_mat, bias, relu=False, residual=None,
               out_dtype=jnp.bfloat16):
    """1x1 conv (stride 1, bias=False) + folded BN (+ fp32 residual) (+ ReLU)."""
    B, H, W, Cin = x.shape
    N = w_mat.shape[1]
    a = x.reshape(B * H * W, Cin)                       # free contiguous reshape
    res = residual.reshape(B * H * W, N) if residual is not None else None
    out = fused_matmul(a, w_mat, bias, residual=res, relu=relu,
                       out_dtype=out_dtype)
    return out.reshape(B, H, W, N)


# ---------------------------------------------------------------------------
# Bottleneck forward (matches the PyTorch module's forward semantics)
# ---------------------------------------------------------------------------

def bottleneck_forward(x_nchw, params, stride=1):
    """Bottleneck.forward; NCHW fp32 in/out, eval-mode BN folded into weights."""
    if stride != 1 and "wd" not in params:
        raise ValueError("stride > 1 requires a downsample (projection) branch")

    # TODO(synk): when embedded in a full network, carry NHWC/bf16 activations
    # across blocks and drop these per-block transposes / the fp32 output cast.
    x = jnp.transpose(x_nchw, (0, 2, 3, 1))             # NHWC, kept fp32

    out = conv1x1_bn(x, params["w1"], params["b1"], relu=True)           # bf16
    out = conv_bn_direct(out, params["w2"], params["b2"], stride=stride,
                         padding=1, relu=True)                           # bf16

    if "wd" in params:                   # projection shortcut: conv1x1(s) + BN
        if stride == 1:
            identity = conv1x1_bn(x, params["wd"], params["bd"],
                                  out_dtype=jnp.float32)
        else:
            wd4 = params["wd"].reshape(1, 1, *params["wd"].shape)
            identity = conv_bn_direct(x, wd4, params["bd"], stride=stride,
                                      padding=0, out_dtype=jnp.float32)
    else:
        identity = x                     # identity skip, fp32

    # conv3 + bn3 + residual add + final ReLU fused into one pallas_call;
    # the residual is read in fp32 in the epilogue.
    out = conv1x1_bn(out, params["w3"], params["b3"], relu=True,
                     residual=identity, out_dtype=jnp.float32)
    return jnp.transpose(out, (0, 3, 1, 2))             # NCHW


# ---------------------------------------------------------------------------
# Parameter init: generic eval-mode BN fold into conv weights
# ---------------------------------------------------------------------------

def _fold_bn(w_hwio, gamma, beta, mean, var, eps=BN_EPS):
    """Fold eval-mode BatchNorm (running stats) into the preceding conv."""
    scale = gamma / jnp.sqrt(var + eps)                  # per output channel
    w = (w_hwio * scale).astype(jnp.bfloat16)
    b = (beta - mean * scale).astype(jnp.float32)
    return w, b


def init_bottleneck_params(key, inplanes, planes, stride=1, base_width=64,
                           groups=1):
    # TODO(synk): groups != 1 / dilation != 1 conv3x3 variants not implemented.
    assert groups == 1
    expansion = 4
    width = int(planes * (base_width / 64.0)) * groups
    out_planes = planes * expansion
    with_downsample = (stride != 1) or (inplanes != out_planes)

    def conv_w(k, kh, kw, cin, cout):
        std = math.sqrt(2.0 / (kh * kw * cout))          # kaiming_normal_ fan_out
        return jax.random.normal(k, (kh, kw, cin, cout), jnp.float32) * std

    def bn_stats(k, c):
        kg, kb, km, kv = jax.random.split(k, 4)
        gamma = 1.0 + 0.1 * jax.random.normal(kg, (c,), jnp.float32)
        beta = 0.1 * jax.random.normal(kb, (c,), jnp.float32)
        mean = 0.1 * jax.random.normal(km, (c,), jnp.float32)
        var = 1.0 + 0.2 * jax.random.uniform(kv, (c,), jnp.float32)
        return gamma, beta, mean, var

    keys = jax.random.split(key, 8)
    p = {}
    w1, b1 = _fold_bn(conv_w(keys[0], 1, 1, inplanes, width),
                      *bn_stats(keys[1], width))
    p["w1"], p["b1"] = w1.reshape(inplanes, width), b1
    p["w2"], p["b2"] = _fold_bn(conv_w(keys[2], 3, 3, width, width),
                                *bn_stats(keys[3], width))
    w3, b3 = _fold_bn(conv_w(keys[4], 1, 1, width, out_planes),
                      *bn_stats(keys[5], out_planes))
    p["w3"], p["b3"] = w3.reshape(width, out_planes), b3
    if with_downsample:
        wd, bd = _fold_bn(conv_w(keys[6], 1, 1, inplanes, out_planes),
                          *bn_stats(keys[7], out_planes))
        p["wd"], p["bd"] = wd.reshape(inplanes, out_planes), bd
    return p


# ---------------------------------------------------------------------------

if __name__ == "__main__":
    key = jax.random.PRNGKey(0)
    k_in1, k_in2, k_p1, k_p2 = jax.random.split(key, 4)

    fwd = jax.jit(bottleneck_forward, static_argnames=("stride",))

    # Config 1: identity skip (inplanes == planes * expansion), stride=1.
    B, H, W = 2, 16, 16
    inplanes1, planes1 = 256, 64
    x1 = jax.random.normal(k_in1, (B, inplanes1, H, W), jnp.float32)   # NCHW
    params1 = init_bottleneck_params(k_p1, inplanes1, planes1, stride=1)
    out1 = jax.block_until_ready(fwd(x1, params1, stride=1))
    assert out1.shape == (B, planes1 * 4, H, W), out1.shape
    assert out1.dtype == jnp.float32
    assert bool(jnp.all(out1 >= 0.0))                                  # final ReLU
    assert bool(jnp.all(jnp.isfinite(out1)))

    # Config 2: projection shortcut (downsample conv1x1 + BN), stride=1.
    inplanes2, planes2 = 64, 64
    x2 = jax.random.normal(k_in2, (B, inplanes2, H, W), jnp.float32)
    params2 = init_bottleneck_params(k_p2, inplanes2, planes2, stride=1)
    out2 = jax.block_until_ready(fwd(x2, params2, stride=1))
    assert out2.shape == (B, planes2 * 4, H, W), out2.shape
    assert bool(jnp.all(out2 >= 0.0))
    assert bool(jnp.all(jnp.isfinite(out2)))

    print("KERNEL_OK")
</pallas_src>

<mosaic_0001>
module attributes {stable_mosaic.version = 11 : i64} {
  func.func @_direct_conv_kernel(%arg0: i32, %arg1: i32, %arg2: memref<1x18x18x64xbf16, #tpu.memory_space<vmem>>, %arg3: memref<9x64x64xbf16, #tpu.memory_space<vmem>>, %arg4: memref<1x64xf32, #tpu.memory_space<vmem>>, %arg5: memref<1x16x16x64xbf16, #tpu.memory_space<vmem>>) attributes {dimension_semantics = [#tpu.dimension_semantics<parallel>, #tpu.dimension_semantics<parallel>], iteration_bounds = array<i64: 1, 2>, scalar_prefetch = 0 : i64, scratch_operands = 0 : i64, tpu.core_type = #tpu.core_type<tc>, window_params = [{transform_indices = @transform_0, window_bounds = array<i64: 1, 18, 18, 64>}, {transform_indices = @transform_1, window_bounds = array<i64: 9, 64, 64>}, {transform_indices = @transform_2, window_bounds = array<i64: 1, 64>}, {transform_indices = @transform_3, window_bounds = array<i64: 1, 16, 16, 64>}]} {
    %cst = arith.constant 0.000000e+00 : f32
    %0 = vector.broadcast %cst : f32 to vector<256x64xf32>
    %c0 = arith.constant 0 : index
    %c0_0 = arith.constant 0 : index
    %c0_1 = arith.constant 0 : index
    %c0_2 = arith.constant 0 : index
    %1 = vector.load %arg2[%c0, %c0_0, %c0_1, %c0_2] : memref<1x18x18x64xbf16, #tpu.memory_space<vmem>>, vector<1x16x16x64xbf16>
    %2 = vector.shape_cast %1 : vector<1x16x16x64xbf16> to vector<16x16x64xbf16>
    %3 = vector.shape_cast %2 : vector<16x16x64xbf16> to vector<256x64xbf16>
    %c0_3 = arith.constant 0 : index
    %c0_4 = arith.constant 0 : index
    %c0_5 = arith.constant 0 : index
    %4 = vector.load %arg3[%c0_3, %c0_4, %c0_5] : memref<9x64x64xbf16, #tpu.memory_space<vmem>>, vector<1x64x64xbf16>
    %5 = vector.shape_cast %4 : vector<1x64x64xbf16> to vector<64x64xbf16>
    %cst_6 = arith.constant dense<0.000000e+00> : vector<256x64xf32>
    %6 = tpu.matmul %3, %5, %cst_6 {dimension_numbers = #tpu.dot_dimension_numbers<[1], [0], [0], [1], [0, 0, 1, 1], [], []>} : vector<256x64xbf16>, vector<64x64xbf16>, vector<256x64xf32> -> vector<256x64xf32>
    %7 = arith.addf %0, %6 : vector<256x64xf32>
    %c0_7 = arith.constant 0 : index
    %c0_8 = arith.constant 0 : index
    %c1 = arith.constant 1 : index
    %c0_9 = arith.constant 0 : index
    %8 = vector.load %arg2[%c0_7, %c0_8, %c1, %c0_9] : memref<1x18x18x64xbf16, #tpu.memory_space<vmem>>, vector<1x16x16x64xbf16>
    %9 = vector.shape_cast %8 : vector<1x16x16x64xbf16> to vector<16x16x64xbf16>
    %10 = vector.shape_cast %9 : vector<16x16x64xbf16> to vector<256x64xbf16>
    %c1_10 = arith.constant 1 : index
    %c0_11 = arith.constant 0 : index
    %c0_12 = arith.constant 0 : index
    %11 = vector.load %arg3[%c1_10, %c0_11, %c0_12] : memref<9x64x64xbf16, #tpu.memory_space<vmem>>, vector<1x64x64xbf16>
    %12 = vector.shape_cast %11 : vector<1x64x64xbf16> to vector<64x64xbf16>
    %cst_13 = arith.constant dense<0.000000e+00> : vector<256x64xf32>
    %13 = tpu.matmul %10, %12, %cst_13 {dimension_numbers = #tpu.dot_dimension_numbers<[1], [0], [0], [1], [0, 0, 1, 1], [], []>} : vector<256x64xbf16>, vector<64x64xbf16>, vector<256x64xf32> -> vector<256x64xf32>
    %14 = arith.addf %7, %13 : vector<256x64xf32>
    %c0_14 = arith.constant 0 : index
    %c0_15 = arith.constant 0 : index
    %c2 = arith.constant 2 : index
    %c0_16 = arith.constant 0 : index
    %15 = vector.load %arg2[%c0_14, %c0_15, %c2, %c0_16] : memref<1x18x18x64xbf16, #tpu.memory_space<vmem>>, vector<1x16x16x64xbf16>
    %16 = vector.shape_cast %15 : vector<1x16x16x64xbf16> to vector<16x16x64xbf16>
    %17 = vector.shape_cast %16 : vector<16x16x64xbf16> to vector<256x64xbf16>
    %c2_17 = arith.constant 2 : index
    %c0_18 = arith.constant 0 : index
    %c0_19 = arith.constant 0 : index
    %18 = vector.load %arg3[%c2_17, %c0_18, %c0_19] : memref<9x64x64xbf16, #tpu.memory_space<vmem>>, vector<1x64x64xbf16>
    %19 = vector.shape_cast %18 : vector<1x64x64xbf16> to vector<64x64xbf16>
    %cst_20 = arith.constant dense<0.000000e+00> : vector<256x64xf32>
    %20 = tpu.matmul %17, %19, %cst_20 {dimension_numbers = #tpu.dot_dimension_numbers<[1], [0], [0], [1], [0, 0, 1, 1], [], []>} : vector<256x64xbf16>, vector<64x64xbf16>, vector<256x64xf32> -> vector<256x64xf32>
    %21 = arith.addf %14, %20 : vector<256x64xf32>
    %c0_21 = arith.constant 0 : index
    %c1_22 = arith.constant 1 : index
    %c0_23 = arith.constant 0 : index
    %c0_24 = arith.constant 0 : index
    %22 = vector.load %arg2[%c0_21, %c1_22, %c0_23, %c0_24] : memref<1x18x18x64xbf16, #tpu.memory_space<vmem>>, vector<1x16x16x64xbf16>
    %23 = vector.shape_cast %22 : vector<1x16x16x64xbf16> to vector<16x16x64xbf16>
    %24 = vector.shape_cast %23 : vector<16x16x64xbf16> to vector<256x64xbf16>
    %c3 = arith.constant 3 : index
    %c0_25 = arith.constant 0 : index
    %c0_26 = arith.constant 0 : index
    %25 = vector.load %arg3[%c3, %c0_25, %c0_26] : memref<9x64x64xbf16, #tpu.memory_space<vmem>>, vector<1x64x64xbf16>
    %26 = vector.shape_cast %25 : vector<1x64x64xbf16> to vector<64x64xbf16>
    %cst_27 = arith.constant dense<0.000000e+00> : vector<256x64xf32>
    %27 = tpu.matmul %24, %26, %cst_27 {dimension_numbers = #tpu.dot_dimension_numbers<[1], [0], [0], [1], [0, 0, 1, 1], [], []>} : vector<256x64xbf16>, vector<64x64xbf16>, vector<256x64xf32> -> vector<256x64xf32>
    %28 = arith.addf %21, %27 : vector<256x64xf32>
    %c0_28 = arith.constant 0 : index
    %c1_29 = arith.constant 1 : index
    %c1_30 = arith.constant 1 : index
    %c0_31 = arith.constant 0 : index
    %29 = vector.load %arg2[%c0_28, %c1_29, %c1_30, %c0_31] : memref<1x18x18x64xbf16, #tpu.memory_space<vmem>>, vector<1x16x16x64xbf16>
    %30 = vector.shape_cast %29 : vector<1x16x16x64xbf16> to vector<16x16x64xbf16>
    %31 = vector.shape_cast %30 : vector<16x16x64xbf16> to vector<256x64xbf16>
    %c4 = arith.constant 4 : index
    %c0_32 = arith.constant 0 : index
    %c0_33 = arith.constant 0 : index
    %32 = vector.load %arg3[%c4, %c0_32, %c0_33] : memref<9x64x64xbf16, #tpu.memory_space<vmem>>, vector<1x64x64xbf16>
    %33 = vector.shape_cast %32 : vector<1x64x64xbf16> to vector<64x64xbf16>
    %cst_34 = arith.constant dense<0.000000e+00> : vector<256x64xf32>
    %34 = tpu.matmul %31, %33, %cst_34 {dimension_numbers = #tpu.dot_dimension_numbers<[1], [0], [0], [1], [0, 0, 1, 1], [], []>} : vector<256x64xbf16>, vector<64x64xbf16>, vector<256x64xf32> -> vector<256x64xf32>
    %35 = arith.addf %28, %34 : vector<256x64xf32>
    %c0_35 = arith.constant 0 : index
    %c1_36 = arith.constant 1 : index
    %c2_37 = arith.constant 2 : index
    %c0_38 = arith.constant 0 : index
    %36 = vector.load %arg2[%c0_35, %c1_36, %c2_37, %c0_38] : memref<1x18x18x64xbf16, #tpu.memory_space<vmem>>, vector<1x16x16x64xbf16>
    %37 = vector.shape_cast %36 : vector<1x16x16x64xbf16> to vector<16x16x64xbf16>
    %38 = vector.shape_cast %37 : vector<16x16x64xbf16> to vector<256x64xbf16>
    %c5 = arith.constant 5 : index
    %c0_39 = arith.constant 0 : index
    %c0_40 = arith.constant 0 : index
    %39 = vector.load %arg3[%c5, %c0_39, %c0_40] : memref<9x64x64xbf16, #tpu.memory_space<vmem>>, vector<1x64x64xbf16>
    %40 = vector.shape_cast %39 : vector<1x64x64xbf16> to vector<64x64xbf16>
    %cst_41 = arith.constant dense<0.000000e+00> : vector<256x64xf32>
    %41 = tpu.matmul %38, %40, %cst_41 {dimension_numbers = #tpu.dot_dimension_numbers<[1], [0], [0], [1], [0, 0, 1, 1], [], []>} : vector<256x64xbf16>, vector<64x64xbf16>, vector<256x64xf32> -> vector<256x64xf32>
    %42 = arith.addf %35, %41 : vector<256x64xf32>
    %c0_42 = arith.constant 0 : index
    %c2_43 = arith.constant 2 : index
    %c0_44 = arith.constant 0 : index
    %c0_45 = arith.constant 0 : index
    %43 = vector.load %arg2[%c0_42, %c2_43, %c0_44, %c0_45] : memref<1x18x18x64xbf16, #tpu.memory_space<vmem>>, vector<1x16x16x64xbf16>
    %44 = vector.shape_cast %43 : vector<1x16x16x64xbf16> to vector<16x16x64xbf16>
    %45 = vector.shape_cast %44 : vector<16x16x64xbf16> to vector<256x64xbf16>
    %c6 = arith.constant 6 : index
    %c0_46 = arith.constant 0 : index
    %c0_47 = arith.constant 0 : index
    %46 = vector.load %arg3[%c6, %c0_46, %c0_47] : memref<9x64x64xbf16, #tpu.memory_space<vmem>>, vector<1x64x64xbf16>
    %47 = vector.shape_cast %46 : vector<1x64x64xbf16> to vector<64x64xbf16>
    %cst_48 = arith.constant dense<0.000000e+00> : vector<256x64xf32>
    %48 = tpu.matmul %45, %47, %cst_48 {dimension_numbers = #tpu.dot_dimension_numbers<[1], [0], [0], [1], [0, 0, 1, 1], [], []>} : vector<256x64xbf16>, vector<64x64xbf16>, vector<256x64xf32> -> vector<256x64xf32>
    %49 = arith.addf %42, %48 : vector<256x64xf32>
    %c0_49 = arith.constant 0 : index
    %c2_50 = arith.constant 2 : index
    %c1_51 = arith.constant 1 : index
    %c0_52 = arith.constant 0 : index
    %50 = vector.load %arg2[%c0_49, %c2_50, %c1_51, %c0_52] : memref<1x18x18x64xbf16, #tpu.memory_space<vmem>>, vector<1x16x16x64xbf16>
    %51 = vector.shape_cast %50 : vector<1x16x16x64xbf16> to vector<16x16x64xbf16>
    %52 = vector.shape_cast %51 : vector<16x16x64xbf16> to vector<256x64xbf16>
    %c7 = arith.constant 7 : index
    %c0_53 = arith.constant 0 : index
    %c0_54 = arith.constant 0 : index
    %53 = vector.load %arg3[%c7, %c0_53, %c0_54] : memref<9x64x64xbf16, #tpu.memory_space<vmem>>, vector<1x64x64xbf16>
    %54 = vector.shape_cast %53 : vector<1x64x64xbf16> to vector<64x64xbf16>
    %cst_55 = arith.constant dense<0.000000e+00> : vector<256x64xf32>
    %55 = tpu.matmul %52, %54, %cst_55 {dimension_numbers = #tpu.dot_dimension_numbers<[1], [0], [0], [1], [0, 0, 1, 1], [], []>} : vector<256x64xbf16>, vector<64x64xbf16>, vector<256x64xf32> -> vector<256x64xf32>
    %56 = arith.addf %49, %55 : vector<256x64xf32>
    %c0_56 = arith.constant 0 : index
    %c2_57 = arith.constant 2 : index
    %c2_58 = arith.constant 2 : index
    %c0_59 = arith.constant 0 : index
    %57 = vector.load %arg2[%c0_56, %c2_57, %c2_58, %c0_59] : memref<1x18x18x64xbf16, #tpu.memory_space<vmem>>, vector<1x16x16x64xbf16>
    %58 = vector.shape_cast %57 : vector<1x16x16x64xbf16> to vector<16x16x64xbf16>
    %59 = vector.shape_cast %58 : vector<16x16x64xbf16> to vector<256x64xbf16>
    %c8 = arith.constant 8 : index
    %c0_60 = arith.constant 0 : index
    %c0_61 = arith.constant 0 : index
    %60 = vector.load %arg3[%c8, %c0_60, %c0_61] : memref<9x64x64xbf16, #tpu.memory_space<vmem>>, vector<1x64x64xbf16>
    %61 = vector.shape_cast %60 : vector<1x64x64xbf16> to vector<64x64xbf16>
    %cst_62 = arith.constant dense<0.000000e+00> : vector<256x64xf32>
    %62 = tpu.matmul %59, %61, %cst_62 {dimension_numbers = #tpu.dot_dimension_numbers<[1], [0], [0], [1], [0, 0, 1, 1], [], []>} : vector<256x64xbf16>, vector<64x64xbf16>, vector<256x64xf32> -> vector<256x64xf32>
    %63 = arith.addf %56, %62 : vector<256x64xf32>
    %c0_63 = arith.constant 0 : index
    %c0_64 = arith.constant 0 : index
    %64 = vector.load %arg4[%c0_63, %c0_64] : memref<1x64xf32, #tpu.memory_space<vmem>>, vector<1x64xf32>
    %65 = vector.broadcast %64 : vector<1x64xf32> to vector<256x64xf32>
    %66 = arith.addf %63, %65 : vector<256x64xf32>
    %cst_65 = arith.constant 0.000000e+00 : f32
    %67 = vector.broadcast %cst_65 : f32 to vector<256x64xf32>
    %68 = arith.maximumf %66, %67 : vector<256x64xf32>
    %69 = vector.shape_cast %68 : vector<256x64xf32> to vector<16x16x64xf32>
    %70 = arith.truncf %69 : vector<16x16x64xf32> to vector<16x16x64xbf16>
    %c0_66 = arith.constant 0 : index
    %c0_67 = arith.constant 0 : index
    %c0_68 = arith.constant 0 : index
    %c0_69 = arith.constant 0 : index
    %71 = vector.load %arg5[%c0_66, %c0_67, %c0_68, %c0_69] : memref<1x16x16x64xbf16, #tpu.memory_space<vmem>>, vector<1x16x16x64xbf16>
    %72 = vector.shape_cast %71 : vector<1x16x16x64xbf16> to vector<16x16x64xbf16>
    %73 = vector.shape_cast %70 : vector<16x16x64xbf16> to vector<1x16x16x64xbf16>
    tpu.vector_store %arg5[%c0_66, %c0_67, %c0_68, %c0_69], %73 {strides = array<i32>} : memref<1x16x16x64xbf16, #tpu.memory_space<vmem>>, vector<1x16x16x64xbf16>,
    return
  }
  func.func @transform_0(%arg0: i32, %arg1: i32) -> (i32, i32, i32, i32) {
    %c0_i32 = arith.constant 0 : i32
    %c0_i32_0 = arith.constant 0 : i32
    %c0_i32_1 = arith.constant 0 : i32
    %c0_i32_2 = arith.constant 0 : i32
    return %arg1, %c0_i32, %c0_i32_0, %c0_i32_1 : i32, i32, i32, i32
  }
  func.func @transform_1(%arg0: i32, %arg1: i32) -> (i32, i32, i32) {
    %c0_i32 = arith.constant 0 : i32
    %c0_i32_0 = arith.constant 0 : i32
    %c0_i32_1 = arith.constant 0 : i32
    return %c0_i32, %c0_i32_0, %arg0 : i32, i32, i32
  }
  func.func @transform_2(%arg0: i32, %arg1: i32) -> (i32, i32) {
    %c0_i32 = arith.constant 0 : i32
    %c0_i32_0 = arith.constant 0 : i32
    return %c0_i32, %arg0 : i32, i32
  }
  func.func @transform_3(%arg0: i32, %arg1: i32) -> (i32, i32, i32, i32) {
    %c0_i32 = arith.constant 0 : i32
    %c0_i32_0 = arith.constant 0 : i32
    %c0_i32_1 = arith.constant 0 : i32
    return %arg1, %c0_i32, %c0_i32_0, %arg0 : i32, i32, i32, i32
  }
}

module attributes {stable_mosaic.version = 11 : i64} {
  func.func @_matmul_kernel(%arg0: i32, %arg1: i32, %arg2: memref<256x256xf32, #tpu.memory_space<vmem>>, %arg3: memref<256x64xbf16, #tpu.memory_space<vmem>>, %arg4: memref<1x64xf32, #tpu.memory_space<vmem>>, %arg5: memref<256x64xbf16, #tpu.memory_space<vmem>>) attributes {dimension_semantics = [#tpu.dimension_semantics<parallel>, #tpu.dimension_semantics<parallel>], iteration_bounds = array<i64: 1, 2>, scalar_prefetch = 0 : i64, scratch_operands = 0 : i64, tpu.core_type = #tpu.core_type<tc>, window_params = [{transform_indices = @transform_0, window_bounds = array<i64: 256, 256>}, {transform_indices = @transform_1, window_bounds = array<i64: 256, 64>}, {transform_indices = @transform_2, window_bounds = array<i64: 1, 64>}, {transform_indices = @transform_3, window_bounds = array<i64: 256, 64>}]} {
    %c0 = arith.constant 0 : index
    %c0_0 = arith.constant 0 : index
    %0 = vector.load %arg2[%c0, %c0_0] : memref<256x256xf32, #tpu.memory_space<vmem>>, vector<256x256xf32>
    %1 = arith.truncf %0 : vector<256x256xf32> to vector<256x256xbf16>
    %c0_1 = arith.constant 0 : index
    %c0_2 = arith.constant 0 : index
    %2 = vector.load %arg3[%c0_1, %c0_2] : memref<256x64xbf16, #tpu.memory_space<vmem>>, vector<256x64xbf16>
    %cst = arith.constant dense<0.000000e+00> : vector<256x64xf32>
    %3 = tpu.matmul %1, %2, %cst {dimension_numbers = #tpu.dot_dimension_numbers<[1], [0], [0], [1], [0, 0, 1, 1], [], []>} : vector<256x256xbf16>, vector<256x64xbf16>, vector<256x64xf32> -> vector<256x64xf32>
    %c0_3 = arith.constant 0 : index
    %c0_4 = arith.constant 0 : index
    %4 = vector.load %arg4[%c0_3, %c0_4] : memref<1x64xf32, #tpu.memory_space<vmem>>, vector<1x64xf32>
    %5 = vector.broadcast %4 : vector<1x64xf32> to vector<256x64xf32>
    %6 = arith.addf %3, %5 : vector<256x64xf32>
    %cst_5 = arith.constant 0.000000e+00 : f32
    %7 = vector.broadcast %cst_5 : f32 to vector<256x64xf32>
    %8 = arith.maximumf %6, %7 : vector<256x64xf32>
    %9 = arith.truncf %8 : vector<256x64xf32> to vector<256x64xbf16>
    %c0_6 = arith.constant 0 : index
    %c0_7 = arith.constant 0 : index
    %10 = vector.load %arg5[%c0_6, %c0_7] : memref<256x64xbf16, #tpu.memory_space<vmem>>, vector<256x64xbf16>
    tpu.vector_store %arg5[%c0_6, %c0_7], %9 {strides = array<i32>} : memref<256x64xbf16, #tpu.memory_space<vmem>>, vector<256x64xbf16>,
    return
  }
  func.func @transform_0(%arg0: i32, %arg1: i32) -> (i32, i32) {
    %c0_i32 = arith.constant 0 : i32
    %c0_i32_0 = arith.constant 0 : i32
    return %arg1, %c0_i32 : i32, i32
  }
  func.func @transform_1(%arg0: i32, %arg1: i32) -> (i32, i32) {
    %c0_i32 = arith.constant 0 : i32
    %c0_i32_0 = arith.constant 0 : i32
    return %c0_i32, %arg0 : i32, i32
  }
  func.func @transform_2(%arg0: i32, %arg1: i32) -> (i32, i32) {
    %c0_i32 = arith.constant 0 : i32
    %c0_i32_0 = arith.constant 0 : i32
    return %c0_i32, %arg0 : i32, i32
  }
  func.func @transform_3(%arg0: i32, %arg1: i32) -> (i32, i32) {
    %c0_i32 = arith.constant 0 : i32
    return %arg1, %arg0 : i32, i32
  }
}

module attributes {stable_mosaic.version = 11 : i64} {
  func.func @_matmul_kernel(%arg0: i32, %arg1: i32, %arg2: memref<256x64xbf16, #tpu.memory_space<vmem>>, %arg3: memref<64x256xbf16, #tpu.memory_space<vmem>>, %arg4: memref<1x256xf32, #tpu.memory_space<vmem>>, %arg5: memref<256x256xf32, #tpu.memory_space<vmem>>, %arg6: memref<256x256xf32, #tpu.memory_space<vmem>>) attributes {dimension_semantics = [#tpu.dimension_semantics<parallel>, #tpu.dimension_semantics<parallel>], iteration_bounds = array<i64: 1, 2>, scalar_prefetch = 0 : i64, scratch_operands = 0 : i64, tpu.core_type = #tpu.core_type<tc>, window_params = [{transform_indices = @transform_0, window_bounds = array<i64: 256, 64>}, {transform_indices = @transform_1, window_bounds = array<i64: 64, 256>}, {transform_indices = @transform_2, window_bounds = array<i64: 1, 256>}, {transform_indices = @transform_3, window_bounds = array<i64: 256, 256>}, {transform_indices = @transform_4, window_bounds = array<i64: 256, 256>}]} {
    %c0 = arith.constant 0 : index
    %c0_0 = arith.constant 0 : index
    %0 = vector.load %arg2[%c0, %c0_0] : memref<256x64xbf16, #tpu.memory_space<vmem>>, vector<256x64xbf16>
    %c0_1 = arith.constant 0 : index
    %c0_2 = arith.constant 0 : index
    %1 = vector.load %arg3[%c0_1, %c0_2] : memref<64x256xbf16, #tpu.memory_space<vmem>>, vector<64x256xbf16>
    %cst = arith.constant dense<0.000000e+00> : vector<256x256xf32>
    %2 = tpu.matmul %0, %1, %cst {dimension_numbers = #tpu.dot_dimension_numbers<[1], [0], [0], [1], [0, 0, 1, 1], [], []>} : vector<256x64xbf16>, vector<64x256xbf16>, vector<256x256xf32> -> vector<256x256xf32>
    %c0_3 = arith.constant 0 : index
    %c0_4 = arith.constant 0 : index
    %3 = vector.load %arg4[%c0_3, %c0_4] : memref<1x256xf32, #tpu.memory_space<vmem>>, vector<1x256xf32>
    %4 = vector.broadcast %3 : vector<1x256xf32> to vector<256x256xf32>
    %5 = arith.addf %2, %4 : vector<256x256xf32>
    %c0_5 = arith.constant 0 : index
    %c0_6 = arith.constant 0 : index
    %6 = vector.load %arg5[%c0_5, %c0_6] : memref<256x256xf32, #tpu.memory_space<vmem>>, vector<256x256xf32>
    %7 = arith.addf %5, %6 : vector<256x256xf32>
    %cst_7 = arith.constant 0.000000e+00 : f32
    %8 = vector.broadcast %cst_7 : f32 to vector<256x256xf32>
    %9 = arith.maximumf %7, %8 : vector<256x256xf32>
    %c0_8 = arith.constant 0 : index
    %c0_9 = arith.constant 0 : index
    %10 = vector.load %arg6[%c0_8, %c0_9] : memref<256x256xf32, #tpu.memory_space<vmem>>, vector<256x256xf32>
    tpu.vector_store %arg6[%c0_8, %c0_9], %9 {strides = array<i32>} : memref<256x256xf32, #tpu.memory_space<vmem>>, vector<256x256xf32>,
    return
  }
  func.func @transform_0(%arg0: i32, %arg1: i32) -> (i32, i32) {
    %c0_i32 = arith.constant 0 : i32
    %c0_i32_0 = arith.constant 0 : i32
    return %arg1, %c0_i32 : i32, i32
  }
  func.func @transform_1(%arg0: i32, %arg1: i32) -> (i32, i32) {
    %c0_i32 = arith.constant 0 : i32
    %c0_i32_0 = arith.constant 0 : i32
    return %c0_i32, %arg0 : i32, i32
  }
  func.func @transform_2(%arg0: i32, %arg1: i32) -> (i32, i32) {
    %c0_i32 = arith.constant 0 : i32
    %c0_i32_0 = arith.constant 0 : i32
    return %c0_i32, %arg0 : i32, i32
  }
  func.func @transform_3(%arg0: i32, %arg1: i32) -> (i32, i32) {
    %c0_i32 = arith.constant 0 : i32
    return %arg1, %arg0 : i32, i32
  }
  func.func @transform_4(%arg0: i32, %arg1: i32) -> (i32, i32) {
    %c0_i32 = arith.constant 0 : i32
    return %arg1, %arg0 : i32, i32
  }
}

</mosaic_0001>

<bundles_post_ra>
// kernel: bottleneck_forward.3
= control target key start
LH: loop header
LB: loop body
LE: loop exit
PB: predicated region body
PF: predicated region fallthrough
CT: control target
= control target key end

     0   :  { %8 = vsyncpa [#allocation3], 0  ;;  %s1443_s0 = inlined_call_operand.hbm [shape: f32[512,256], index: 0, kind: input, shape index: {}]   ;;  %s1444_s1 = inlined_call_operand.vmem [shape: bf16[256,64], index: 1, kind: input, shape index: {}]   ;;  %s1445_s2 = inlined_call_operand.vmem [shape: f32[1,64], index: 2, kind: input, shape index: {}]   ;;  %s1446_s3 = inlined_call_operand.vmem [shape: bf16[512,64], index: 3, kind: output, shape index: {}]  }
   0x1   :  { %10 = vsyncpa [#allocation3 + $0x1], 0  ;;  %s1139_s12 = smov 0   ;;  %s1141_s13 = smov 0  }
   0x2   :  { %s1143_s14 = smov 0   ;;  %s1145_s15 = smov 0  }
   0x3   :  { %s1147_s16 = smov 0   ;;  %s1149_s17 = smov 0  }
   0x4 LB: > { %s863_s18 = sadd.s32 4294967295, %s1115_s17   ;;  %s25_s19 = sadd.s32 1, %s1111_s16  ;;  %s1115_s17 = sphi %s1149_s17, %s16_s17   ;;  %s1111_s16 = sphi %s1147_s16, %s1453_s16   ;;  %s1107_s15 = sphi %s1145_s15, %s1452_s15   ;;  %s1103_s14 = sphi %s1143_s14, %s1451_s14   ;;  %s1099_s13 = sphi %s1141_s13, %s1450_s13   ;;  %s1095_s12 = sphi %s1139_s12, %s1449_s12  }
   0x5   : > { %p26_p0 = scmp.ge.s32.totalorder %s25_s19, 2  ;;  %s35_s20 = sadd.s32 1, %s1103_s14 }
   0x6   : > { %p42_p1 = scmp.ne.s32.totalorder %s1103_s14, %s1099_s13  ;;  %p43_p2 = scmp.eq.s32.totalorder %s1115_s17, 0 }
   0x7   : > { %s1455_s19 = smov (%p26_p0, %s25_s19), 0  ;;  %p48_p4 = scmp.ne.s32.totalorder %s1099_s13, %s1095_s12 }
   0x8   : > { %p1175_p3 = por %p43_p2, %p42_p1  ;;  %s32_s22 = ssub.s32 %s1111_s16, %s1455_s19 }
   0x9   : > { %p49_p5 = scmp.eq.s32.totalorder %s863_s18, 0  ;;  %p33_p6 = scmp.eq.s32.totalorder %s32_s22, 0 }
   0xa   : > { %p983_p8 = scmp.lt.s32.totalorder %s1115_s17, 2  ;;  %s165_s25 = sand.u32 1, %s1103_s14  }
   0xb   : > { %p1182_p7 = por %p49_p5, %p48_p4  ;;  %s944_s26 = sshll.u32 %s1111_s16, 9 }
   0xc   : > { %s1188_s24 = scalar_select %p33_p6, %s1103_s14, %s35_s20  }
   0xd   : > { %s869_s27 = sshll.u32 %s165_s25, 9  ;;  %s175_s30 = scalar_lea.hbm %s1443_s0, %s944_s26 }
   0xe   : > { %s176_s4 = sshll.u32 %s175_s30, 4  ;;  %s169_s5 = scalar_lea.vmem [#allocation2], %s869_s27  ;;  %s177_s4 = int_to_ptr.hbm [resolvable:$true] %s176_s4 }
   0xf   : > { %s178_s6 = sshll.u32 %s169_s5, 4  ;;  %p980_p9 = pnand %p983_p8, %p1175_p3  ;;  %s179_s6 = int_to_ptr.vmem [resolvable:$true] %s178_s6 }
  0x10   : > { %p873_p10 = scmp.ge.s32.totalorder %s1115_s17, 1  ;;  %p186_p11 = scmp.lt.s32.totalorder %s1115_s17, 3 }
  0x11   : > { %s166_s7 = scalar_lea.sflag [#allocation3], %s165_s25  ;;  %s1117_s8 = smov 256  }
  0x12   : > { %s1118_s9 = smov 16   ;;  %p187_p12 = pnand %p873_p10, %p186_p11 }
  0x13   : > { %982 = dma.hbm_to_vmem [thread:$0]  (!%p980_p9), %s177_s4, 8192, %s179_s6, %s166_s7, %s1117_s8, %s1117_s8, %s1118_s9  }
  0x14   : > { %190 = sbr.rel (%p187_p12) target bundleno = 319 (0x13f), region = 32  ;;  %s192_s10 = sand.u32 (!%p187_p12), 1, %s1099_s13  }
  0x15   : > { %s874_s11 = sshll.u32 (!%p187_p12), %s192_s10, 9  ;;  %s193_s12 = scalar_lea.sflag (!%p187_p12), [#allocation3], %s192_s10 }
  0x16   : > { %s1200_s18 = scalar_lea.vmem (!%p187_p12), [#allocation2], %s874_s11 }
  0x19   : > { %1090 = dma.done.wait (%p1182_p7), %s193_s12, 8192  }
  0x1a   : > { %1092 = vsyncadd (%p1182_p7), %s193_s12, 4294959104  ;;  %v952_v0 = vld [vmem:[%s1444_s1 + $0x38] sm:$0xff]  ;;  %v951_v2 = vld [vmem:[%s1444_s1 + $0x30] sm:$0xff]  ;;  %s875_s7 = sshll.u32 %s1107_s15, 5  ;;  %vm717_vm0 = vcmask 519168  }
  0x1b   : > { %v960_v1 = vld [vmem:[%s1444_s1 + $0x78] sm:$0xff]  ;;  %475 = vmatpush.bf16.msra.mxu0 %v952_v0  ;;  %961 = vmatpush.bf16.msra.mxu2 %v952_v0  ;;  %v959_v3 = vld [vmem:[%s1444_s1 + $0x70] sm:$0xff]  ;;  %v950_v4 = vld [vmem:[%s1444_s1 + $0x28] sm:$0xff]  ;;  %p239_p13 = scmp.lt.s32.totalorder %s875_s7, 63 }
  0x1c   : > { %564 = vmatpush.bf16.msra.mxu1 %v960_v1  ;;  %969 = vmatpush.bf16.msra.mxu3 %v960_v1  ;;  %v958_v5 = vld [vmem:[%s1444_s1 + $0x68] sm:$0xff]  ;;  %v949_v6 = vld [vmem:[%s1444_s1 + $0x20] sm:$0xff]  ;;  %v948_v8 = vld [vmem:[%s1444_s1 + $0x18] sm:$0xff] }
  0x1d   : > { %v957_v7 = vld [vmem:[%s1444_s1 + $0x60] sm:$0xff]  ;;  %v956_v9 = vld [vmem:[%s1444_s1 + $0x58] sm:$0xff]  ;;  %v947_v10 = vld [vmem:[%s1444_s1 + $0x10] sm:$0xff]  ;;  %s1457_s7 = smov (!%p239_p13, %s875_s7), 63 }
  0x1e   : > { %v955_v11 = vld [vmem:[%s1444_s1 + $0x50] sm:$0xff]  ;;  %v946_v12 = vld [vmem:[%s1444_s1 + $0x8] sm:$0xff]  ;;  %v945_v14 = vld [vmem:[%s1444_s1] sm:$0xff] }
  0x1f   : > { %476 = vmatpush.bf16.msra.mxu0 %v951_v2  ;;  %962 = vmatpush.bf16.msra.mxu2 %v951_v2  ;;  %v954_v13 = vld [vmem:[%s1444_s1 + $0x48] sm:$0xff]  ;;  %v953_v15 = vld [vmem:[%s1444_s1 + $0x40] sm:$0xff]  ;;  %v249_v17 = vld [vmem:[%s1200_s18 + $0x10] sm:$0xff] }
  0x20   : > { %565 = vmatpush.bf16.msra.mxu1 %v959_v3  ;;  %970 = vmatpush.bf16.msra.mxu3 %v959_v3  ;;  %v247_v16 = vld [vmem:[%s1200_s18] sm:$0xff]  ;;  %v281_v19 = vld [vmem:[%s1200_s18 + $0x110] sm:$0xff]  ;;  %v248_v20 = vld [vmem:[%s1200_s18 + $0x8] sm:$0xff] }
  0x21   : > { %v279_v18 = vld [vmem:[%s1200_s18 + $0x100] sm:$0xff]  ;;  %v250_v21 = vld [vmem:[%s1200_s18 + $0x18] sm:$0xff]  ;;  %v280_v22 = vld [vmem:[%s1200_s18 + $0x108] sm:$0xff]  ;;  %v311_v24 = vpack.c.bf16 %v249_v17, %v247_v16 }
  0x22   : > { %v282_v23 = vld [vmem:[%s1200_s18 + $0x118] sm:$0xff]  ;;  %v327_v25 = vpack.c.bf16 %v281_v19, %v279_v18  ;;  %v312_v26 = vpack.c.bf16 %v250_v21, %v248_v20  ;;  %v251_v28 = vld [vmem:[%s1200_s18 + $0x20] sm:$0xff]  ;;  %v253_v29 = vld [vmem:[%s1200_s18 + $0x30] sm:$0xff] }
  0x23   : > { %477 = vmatpush.bf16.msra.mxu0 %v950_v4  ;;  %963 = vmatpush.bf16.msra.mxu2 %v950_v4  ;;  %v328_v27 = vpack.c.bf16 %v282_v23, %v280_v22  ;;  %v283_v30 = vld [vmem:[%s1200_s18 + $0x120] sm:$0xff]  ;;  %v285_v31 = vld [vmem:[%s1200_s18 + $0x130] sm:$0xff]  ;;  %v252_v32 = vld [vmem:[%s1200_s18 + $0x28] sm:$0xff]  ;;  %v313_v36 = vpack.c.bf16 %v253_v29, %v251_v28 }
  0x24   : > { %566 = vmatpush.bf16.msra.mxu1 %v958_v5  ;;  %971 = vmatpush.bf16.msra.mxu3 %v958_v5  ;;  %v254_v33 = vld [vmem:[%s1200_s18 + $0x38] sm:$0xff]  ;;  %v284_v34 = vld [vmem:[%s1200_s18 + $0x128] sm:$0xff]  ;;  %v329_v37 = vpack.c.bf16 %v285_v31, %v283_v30  ;;  %v255_v40 = vld [vmem:[%s1200_s18 + $0x40] sm:$0xff] }
  0x25   : > { %v286_v35 = vld [vmem:[%s1200_s18 + $0x138] sm:$0xff]  ;;  %v314_v38 = vpack.c.bf16 %v254_v33, %v252_v32  ;;  %v257_v41 = vld [vmem:[%s1200_s18 + $0x50] sm:$0xff]  ;;  %v287_v42 = vld [vmem:[%s1200_s18 + $0x140] sm:$0xff] }
  0x26   : > { %v330_v39 = vpack.c.bf16 %v286_v35, %v284_v34  ;;  %v289_v43 = vld [vmem:[%s1200_s18 + $0x150] sm:$0xff]  ;;  %v256_v44 = vld [vmem:[%s1200_s18 + $0x48] sm:$0xff]  ;;  %v258_v45 = vld [vmem:[%s1200_s18 + $0x58] sm:$0xff]  ;;  %v315_v48 = vpack.c.bf16 %v257_v41, %v255_v40 }
  0x27   : > { %478 = vmatpush.bf16.msra.mxu0 %v949_v6  ;;  %964 = vmatpush.bf16.msra.mxu2 %v949_v6  ;;  %v288_v46 = vld [vmem:[%s1200_s18 + $0x148] sm:$0xff]  ;;  %v290_v47 = vld [vmem:[%s1200_s18 + $0x158] sm:$0xff]  ;;  %v331_v49 = vpack.c.bf16 %v289_v43, %v287_v42  ;;  %v316_v50 = vpack.c.bf16 %v258_v45, %v256_v44  ;;  %v259_v52 = vld [vmem:[%s1200_s18 + $0x60] sm:$0xff] }
  0x28   : > { %567 = vmatpush.bf16.msra.mxu1 %v957_v7  ;;  %972 = vmatpush.bf16.msra.mxu3 %v957_v7  ;;  %v332_v51 = vpack.c.bf16 %v290_v47, %v288_v46  ;;  %v261_v53 = vld [vmem:[%s1200_s18 + $0x70] sm:$0xff]  ;;  %v291_v54 = vld [vmem:[%s1200_s18 + $0x160] sm:$0xff]  ;;  %v260_v56 = vld [vmem:[%s1200_s18 + $0x68] sm:$0xff] }
  0x29   : > { %v293_v55 = vld [vmem:[%s1200_s18 + $0x170] sm:$0xff]  ;;  %v262_v57 = vld [vmem:[%s1200_s18 + $0x78] sm:$0xff]  ;;  %v292_v58 = vld [vmem:[%s1200_s18 + $0x168] sm:$0xff]  ;;  %v317_v60 = vpack.c.bf16 %v261_v53, %v259_v52 }
  0x2a   : > { %v294_v59 = vld [vmem:[%s1200_s18 + $0x178] sm:$0xff]  ;;  %v333_v61 = vpack.c.bf16 %v293_v55, %v291_v54  ;;  %v318_v62 = vpack.c.bf16 %v262_v57, %v260_v56  ;;  %v263_v0 = vld [vmem:[%s1200_s18 + $0x80] sm:$0xff]  ;;  %v265_v1 = vld [vmem:[%s1200_s18 + $0x90] sm:$0xff] }
  0x2b   : > { %479 = vmatpush.bf16.msra.mxu0 %v948_v8  ;;  %965 = vmatpush.bf16.msra.mxu2 %v948_v8  ;;  %v334_v63 = vpack.c.bf16 %v294_v59, %v292_v58  ;;  %v295_v2 = vld [vmem:[%s1200_s18 + $0x180] sm:$0xff]  ;;  %v297_v3 = vld [vmem:[%s1200_s18 + $0x190] sm:$0xff]  ;;  %v264_v4 = vld [vmem:[%s1200_s18 + $0x88] sm:$0xff]  ;;  %v319_v8 = vpack.c.bf16 %v265_v1, %v263_v0 }
  0x2c   : > { %568 = vmatpush.bf16.msra.mxu1 %v956_v9  ;;  %973 = vmatpush.bf16.msra.mxu3 %v956_v9  ;;  %v266_v5 = vld [vmem:[%s1200_s18 + $0x98] sm:$0xff]  ;;  %v296_v6 = vld [vmem:[%s1200_s18 + $0x188] sm:$0xff]  ;;  %v335_v9 = vpack.c.bf16 %v297_v3, %v295_v2 }
  0x2d   : > { %v298_v7 = vld [vmem:[%s1200_s18 + $0x198] sm:$0xff]  ;;  %v268_v16 = vld [vmem:[%s1200_s18 + $0xa8] sm:$0xff] }
  0x2e   : > { %v270_v17 = vld [vmem:[%s1200_s18 + $0xb8] sm:$0xff]  ;;  %v300_v18 = vld [vmem:[%s1200_s18 + $0x1a8] sm:$0xff] }
  0x2f   : > { %480 = vmatpush.bf16.msra.mxu0 %v947_v10  ;;  %966 = vmatpush.bf16.msra.mxu2 %v947_v10  ;;  %v320_v10 = vpack.c.bf16 %v266_v5, %v264_v4  ;;  %v302_v19 = vld [vmem:[%s1200_s18 + $0x1b8] sm:$0xff]  ;;  %v322_v22 = vpack.c.bf16 %v270_v17, %v268_v16  ;;  %v272_v28 = vld [vmem:[%s1200_s18 + $0xc8] sm:$0xff] }
  0x30   : > { %569 = vmatpush.bf16.msra.mxu1 %v955_v11  ;;  %974 = vmatpush.bf16.msra.mxu3 %v955_v11  ;;  %v336_v11 = vpack.c.bf16 %v298_v7, %v296_v6  ;;  %v338_v23 = vpack.c.bf16 %v302_v19, %v300_v18  ;;  %v274_v29 = vld [vmem:[%s1200_s18 + $0xd8] sm:$0xff]  ;;  %v304_v30 = vld [vmem:[%s1200_s18 + $0x1c8] sm:$0xff] }
  0x31   : > { %v306_v31 = vld [vmem:[%s1200_s18 + $0x1d8] sm:$0xff]  ;;  %v324_v34 = vpack.c.bf16 %v274_v29, %v272_v28  ;;  %v276_v40 = vld [vmem:[%s1200_s18 + $0xe8] sm:$0xff] }
  0x32   : > { %v340_v35 = vpack.c.bf16 %v306_v31, %v304_v30  ;;  %v278_v41 = vld [vmem:[%s1200_s18 + $0xf8] sm:$0xff]  ;;  %v308_v42 = vld [vmem:[%s1200_s18 + $0x1e8] sm:$0xff] }
  0x33   : > { %481 = vmatpush.bf16.msra.mxu0 %v946_v12  ;;  %967 = vmatpush.bf16.msra.mxu2 %v946_v12  ;;  %v267_v12 = vld [vmem:[%s1200_s18 + $0xa0] sm:$0xff]  ;;  %v310_v43 = vld [vmem:[%s1200_s18 + $0x1f8] sm:$0xff]  ;;  %v326_v46 = vpack.c.bf16 %v278_v41, %v276_v40 }
  0x34   : > { %570 = vmatpush.bf16.msra.mxu1 %v954_v13  ;;  %975 = vmatpush.bf16.msra.mxu3 %v954_v13  ;;  %v269_v13 = vld [vmem:[%s1200_s18 + $0xb0] sm:$0xff]  ;;  %v342_v47 = vpack.c.bf16 %v310_v43, %v308_v42 }
  0x35   : > { %v321_v20 = vpack.c.bf16 %v269_v13, %v267_v12 }
  0x37   : > { %482 = vmatpush.bf16.msra.mxu0 %v945_v14  ;;  %968 = vmatpush.bf16.msra.mxu2 %v945_v14  ;;  %v299_v14 = vld [vmem:[%s1200_s18 + $0x1a0] sm:$0xff] }
  0x38   : > { %571 = vmatpush.bf16.msra.mxu1 %v953_v15  ;;  %976 = vmatpush.bf16.msra.mxu3 %v953_v15  ;;  %v301_v15 = vld [vmem:[%s1200_s18 + $0x1b0] sm:$0xff] }
  0x39   : > { %v337_v21 = vpack.c.bf16 %v301_v15, %v299_v14 }
  0x3a   : > { %483 = vmatmul.bf16.vlgmr.msra.gmra.mxu0 %v311_v24  ;;  %523 = vmatmul.bf16.vlgmr.msra.gmra.mxu2 %v327_v25  ;;  %v271_v24 = vld [vmem:[%s1200_s18 + $0xc0] sm:$0xff]  ;;  %v273_v25 = vld [vmem:[%s1200_s18 + $0xd0] sm:$0xff] }
  0x3b   : > { %572 = vmatmul.bf16.vlgmr.msra.gmra.mxu1 %v312_v26  ;;  %612 = vmatmul.bf16.vlgmr.msra.gmra.mxu3 %v328_v27  ;;  %v303_v26 = vld [vmem:[%s1200_s18 + $0x1c0] sm:$0xff]  ;;  %v305_v27 = vld [vmem:[%s1200_s18 + $0x1d0] sm:$0xff]  ;;  %v323_v32 = vpack.c.bf16 %v273_v25, %v271_v24 }
  0x3c   : > { %v339_v33 = vpack.c.bf16 %v305_v27, %v303_v26 }
  0x4a   : > { %488 = vmatmul.bf16.gmra.mxu0 %v313_v36  ;;  %528 = vmatmul.bf16.gmra.mxu2 %v329_v37  ;;  %v275_v36 = vld [vmem:[%s1200_s18 + $0xe0] sm:$0xff]  ;;  %v277_v37 = vld [vmem:[%s1200_s18 + $0xf0] sm:$0xff] }
  0x4b   : > { %577 = vmatmul.bf16.gmra.mxu1 %v314_v38  ;;  %617 = vmatmul.bf16.gmra.mxu3 %v330_v39  ;;  %v307_v38 = vld [vmem:[%s1200_s18 + $0x1e0] sm:$0xff]  ;;  %v309_v39 = vld [vmem:[%s1200_s18 + $0x1f0] sm:$0xff]  ;;  %v325_v44 = vpack.c.bf16 %v277_v37, %v275_v36  ;;  %s876_s18 = sshll.u32 %s1457_s7, 2 }
  0x4c   : > { %v341_v45 = vpack.c.bf16 %v309_v39, %v307_v38  ;;  %s1328_s12 = scalar_lea.vmem %s1446_s3, %s876_s18 }
  0x5a   : > { %493 = vmatmul.bf16.gmra.mxu0 %v315_v48  ;;  %533 = vmatmul.bf16.gmra.mxu2 %v331_v49  ;;  %v1322_v48 = vld [vmem:[%s1445_s2] ss:$0 sm:$0xff] }
  0x5b   : > { %582 = vmatmul.bf16.gmra.mxu1 %v316_v50  ;;  %622 = vmatmul.bf16.gmra.mxu3 %v332_v51 }
  0x6a   : > { %498 = vmatmul.bf16.gmra.mxu0 %v317_v60  ;;  %538 = vmatmul.bf16.gmra.mxu2 %v333_v61 }
  0x6b   : > { %587 = vmatmul.bf16.gmra.mxu1 %v318_v62  ;;  %627 = vmatmul.bf16.gmra.mxu3 %v334_v63 }
  0x7a   : > { %503 = vmatmul.bf16.gmra.mxu0 %v319_v8  ;;  %543 = vmatmul.bf16.gmra.mxu2 %v335_v9 }
  0x7b   : > { %592 = vmatmul.bf16.gmra.mxu1 %v320_v10  ;;  %632 = vmatmul.bf16.gmra.mxu3 %v336_v11 }
  0x8a   : > { %508 = vmatmul.bf16.gmra.mxu0 %v321_v20  ;;  %548 = vmatmul.bf16.gmra.mxu2 %v337_v21 }
  0x8b   : > { %597 = vmatmul.bf16.gmra.mxu1 %v322_v22  ;;  %637 = vmatmul.bf16.gmra.mxu3 %v338_v23 }
  0x9a   : > { %513 = vmatmul.bf16.gmra.mxu0 %v323_v32  ;;  %553 = vmatmul.bf16.gmra.mxu2 %v339_v33 }
  0x9b   : > { %602 = vmatmul.bf16.gmra.mxu1 %v324_v34  ;;  %642 = vmatmul.bf16.gmra.mxu3 %v340_v35 }
  0xaa   : > { %518 = vmatmul.bf16.gmra.mxu0 %v325_v44  ;;  %558 = vmatmul.bf16.gmra.mxu2 %v341_v45 }
  0xab   : > { %607 = vmatmul.bf16.gmra.mxu1 %v326_v46  ;;  %647 = vmatmul.bf16.gmra.mxu3 %v342_v47 }
  0xb7   : > { %v484_v49 = vpop.f32.mrf.mxu0 }
  0xb8   : > { %v485_v50 = vadd.f32 %v1322_v48, %v484_v49  ;;  %v573_v51 = vpop.f32.mrf.mxu1 }
  0xba   : > { %v574_v52 = vadd.f32 %v573_v51, %v485_v50 }
  0xbc   : > { %v653_v53 = vmax.f32 %v574_v52, 0.0 }
  0xbd   : > { %v524_v54 = vpop.f32.mrf.mxu2 }
  0xbe   : > { %v685_v55 = vpack.c.bf16 %v653_v53, %v653_v53  ;;  %v525_v56 = vadd.f32 %v1322_v48, %v524_v54  ;;  %v613_v57 = vpop.f32.mrf.mxu3 }
  0xbf   : > { %v486_v58 = vpop.f32.mrf.mxu0 }
  0xc0   : > { %718 = vst.msk [vmem:[%s1328_s12] sm:$0xf] %vm717_vm0, %v685_v55  ;;  %v614_v59 = vadd.f32 %v613_v57, %v525_v56  ;;  %v487_v60 = vadd.f32 %v1322_v48, %v486_v58  ;;  %v575_v61 = vpop.f32.mrf.mxu1 }
  0xc2   : > { %v669_v62 = vmax.f32 %v614_v59, 0.0  ;;  %v576_v63 = vadd.f32 %v575_v61, %v487_v60 }
  0xc4   : > { %v701_v0 = vpack.c.bf16 %v669_v62, %v669_v62  ;;  %v654_v1 = vmax.f32 %v576_v63, 0.0 }
  0xc5   : > { %v526_v2 = vpop.f32.mrf.mxu2 }
  0xc6   : > { %734 = vst.msk [vmem:[%s1328_s12 + $0x40] sm:$0xf] %vm717_vm0, %v701_v0  ;;  %v686_v3 = vpack.c.bf16 %v654_v1, %v654_v1  ;;  %v527_v4 = vadd.f32 %v1322_v48, %v526_v2  ;;  %v615_v5 = vpop.f32.mrf.mxu3 }
  0xc7   : > { %v489_v6 = vpop.f32.mrf.mxu0 }
  0xc8   : > { %719 = vst.msk [vmem:[%s1328_s12 + $0x4] sm:$0xf] %vm717_vm0, %v686_v3  ;;  %v616_v7 = vadd.f32 %v615_v5, %v527_v4  ;;  %v490_v8 = vadd.f32 %v1322_v48, %v489_v6  ;;  %v578_v9 = vpop.f32.mrf.mxu1 }
  0xca   : > { %v670_v10 = vmax.f32 %v616_v7, 0.0  ;;  %v579_v11 = vadd.f32 %v578_v9, %v490_v8 }
  0xcc   : > { %v702_v12 = vpack.c.bf16 %v670_v10, %v670_v10  ;;  %v655_v13 = vmax.f32 %v579_v11, 0.0 }
  0xcd   : > { %v529_v14 = vpop.f32.mrf.mxu2 }
  0xce   : > { %735 = vst.msk [vmem:[%s1328_s12 + $0x44] sm:$0xf] %vm717_vm0, %v702_v12  ;;  %v687_v15 = vpack.c.bf16 %v655_v13, %v655_v13  ;;  %v530_v16 = vadd.f32 %v1322_v48, %v529_v14  ;;  %v618_v17 = vpop.f32.mrf.mxu3 }
  0xcf   : > { %v491_v18 = vpop.f32.mrf.mxu0 }
  0xd0   : > { %720 = vst.msk [vmem:[%s1328_s12 + $0x8] sm:$0xf] %vm717_vm0, %v687_v15  ;;  %v619_v19 = vadd.f32 %v618_v17, %v530_v16  ;;  %v492_v20 = vadd.f32 %v1322_v48, %v491_v18  ;;  %v580_v21 = vpop.f32.mrf.mxu1 }
  0xd2   : > { %v671_v22 = vmax.f32 %v619_v19, 0.0  ;;  %v581_v23 = vadd.f32 %v580_v21, %v492_v20 }
  0xd4   : > { %v703_v24 = vpack.c.bf16 %v671_v22, %v671_v22  ;;  %v656_v25 = vmax.f32 %v581_v23, 0.0 }
  0xd5   : > { %v531_v26 = vpop.f32.mrf.mxu2 }
  0xd6   : > { %736 = vst.msk [vmem:[%s1328_s12 + $0x48] sm:$0xf] %vm717_vm0, %v703_v24  ;;  %v688_v27 = vpack.c.bf16 %v656_v25, %v656_v25  ;;  %v532_v28 = vadd.f32 %v1322_v48, %v531_v26  ;;  %v620_v29 = vpop.f32.mrf.mxu3 }
  0xd7   : > { %v494_v30 = vpop.f32.mrf.mxu0 }
  0xd8   : > { %721 = vst.msk [vmem:[%s1328_s12 + $0xc] sm:$0xf] %vm717_vm0, %v688_v27  ;;  %v621_v31 = vadd.f32 %v620_v29, %v532_v28  ;;  %v495_v32 = vadd.f32 %v1322_v48, %v494_v30  ;;  %v583_v33 = vpop.f32.mrf.mxu1 }
  0xda   : > { %v672_v34 = vmax.f32 %v621_v31, 0.0  ;;  %v584_v35 = vadd.f32 %v583_v33, %v495_v32 }
  0xdc   : > { %v704_v36 = vpack.c.bf16 %v672_v34, %v672_v34  ;;  %v657_v37 = vmax.f32 %v584_v35, 0.0 }
  0xdd   : > { %v534_v38 = vpop.f32.mrf.mxu2 }
  0xde   : > { %737 = vst.msk [vmem:[%s1328_s12 + $0x4c] sm:$0xf] %vm717_vm0, %v704_v36  ;;  %v689_v39 = vpack.c.bf16 %v657_v37, %v657_v37  ;;  %v535_v40 = vadd.f32 %v1322_v48, %v534_v38  ;;  %v623_v41 = vpop.f32.mrf.mxu3 }
  0xdf   : > { %v496_v42 = vpop.f32.mrf.mxu0 }
  0xe0   : > { %722 = vst.msk [vmem:[%s1328_s12 + $0x10] sm:$0xf] %vm717_vm0, %v689_v39  ;;  %v624_v43 = vadd.f32 %v623_v41, %v535_v40  ;;  %v497_v44 = vadd.f32 %v1322_v48, %v496_v42  ;;  %v585_v45 = vpop.f32.mrf.mxu1 }
  0xe2   : > { %v673_v46 = vmax.f32 %v624_v43, 0.0  ;;  %v586_v47 = vadd.f32 %v585_v45, %v497_v44 }
  0xe4   : > { %v705_v49 = vpack.c.bf16 %v673_v46, %v673_v46  ;;  %v658_v50 = vmax.f32 %v586_v47, 0.0 }
  0xe5   : > { %v536_v51 = vpop.f32.mrf.mxu2 }
  0xe6   : > { %738 = vst.msk [vmem:[%s1328_s12 + $0x50] sm:$0xf] %vm717_vm0, %v705_v49  ;;  %v690_v52 = vpack.c.bf16 %v658_v50, %v658_v50  ;;  %v537_v53 = vadd.f32 %v1322_v48, %v536_v51  ;;  %v625_v54 = vpop.f32.mrf.mxu3 }
  0xe7   : > { %v499_v55 = vpop.f32.mrf.mxu0 }
  0xe8   : > { %723 = vst.msk [vmem:[%s1328_s12 + $0x14] sm:$0xf] %vm717_vm0, %v690_v52  ;;  %v626_v56 = vadd.f32 %v625_v54, %v537_v53  ;;  %v500_v57 = vadd.f32 %v1322_v48, %v499_v55  ;;  %v588_v58 = vpop.f32.mrf.mxu1 }
  0xea   : > { %v674_v59 = vmax.f32 %v626_v56, 0.0  ;;  %v589_v60 = vadd.f32 %v588_v58, %v500_v57 }
  0xec   : > { %v706_v61 = vpack.c.bf16 %v674_v59, %v674_v59  ;;  %v659_v62 = vmax.f32 %v589_v60, 0.0 }
  0xed   : > { %v539_v63 = vpop.f32.mrf.mxu2 }
  0xee   : > { %739 = vst.msk [vmem:[%s1328_s12 + $0x54] sm:$0xf] %vm717_vm0, %v706_v61  ;;  %v691_v0 = vpack.c.bf16 %v659_v62, %v659_v62  ;;  %v540_v1 = vadd.f32 %v1322_v48, %v539_v63  ;;  %v628_v2 = vpop.f32.mrf.mxu3 }
  0xef   : > { %v501_v3 = vpop.f32.mrf.mxu0 }
  0xf0   : > { %724 = vst.msk [vmem:[%s1328_s12 + $0x18] sm:$0xf] %vm717_vm0, %v691_v0  ;;  %v629_v4 = vadd.f32 %v628_v2, %v540_v1  ;;  %v502_v5 = vadd.f32 %v1322_v48, %v501_v3  ;;  %v590_v6 = vpop.f32.mrf.mxu1 }
  0xf2   : > { %v675_v7 = vmax.f32 %v629_v4, 0.0  ;;  %v591_v8 = vadd.f32 %v590_v6, %v502_v5 }
  0xf4   : > { %v707_v9 = vpack.c.bf16 %v675_v7, %v675_v7  ;;  %v660_v10 = vmax.f32 %v591_v8, 0.0 }
  0xf5   : > { %v541_v11 = vpop.f32.mrf.mxu2 }
  0xf6   : > { %740 = vst.msk [vmem:[%s1328_s12 + $0x58] sm:$0xf] %vm717_vm0, %v707_v9  ;;  %v692_v12 = vpack.c.bf16 %v660_v10, %v660_v10  ;;  %v542_v13 = vadd.f32 %v1322_v48, %v541_v11  ;;  %v630_v14 = vpop.f32.mrf.mxu3 }
  0xf7   : > { %v504_v15 = vpop.f32.mrf.mxu0 }
  0xf8   : > { %725 = vst.msk [vmem:[%s1328_s12 + $0x1c] sm:$0xf] %vm717_vm0, %v692_v12  ;;  %v631_v16 = vadd.f32 %v630_v14, %v542_v13  ;;  %v505_v17 = vadd.f32 %v1322_v48, %v504_v15  ;;  %v593_v18 = vpop.f32.mrf.mxu1 }
  0xfa   : > { %v676_v19 = vmax.f32 %v631_v16, 0.0  ;;  %v594_v20 = vadd.f32 %v593_v18, %v505_v17 }
  0xfc   : > { %v708_v21 = vpack.c.bf16 %v676_v19, %v676_v19  ;;  %v661_v22 = vmax.f32 %v594_v20, 0.0 }
  0xfd   : > { %v544_v23 = vpop.f32.mrf.mxu2 }
  0xfe   : > { %741 = vst.msk [vmem:[%s1328_s12 + $0x5c] sm:$0xf] %vm717_vm0, %v708_v21  ;;  %v693_v24 = vpack.c.bf16 %v661_v22, %v661_v22  ;;  %v545_v25 = vadd.f32 %v1322_v48, %v544_v23  ;;  %v633_v26 = vpop.f32.mrf.mxu3 }
  0xff   : > { %v506_v27 = vpop.f32.mrf.mxu0 }
 0x100   : > { %726 = vst.msk [vmem:[%s1328_s12 + $0x20] sm:$0xf] %vm717_vm0, %v693_v24  ;;  %v634_v28 = vadd.f32 %v633_v26, %v545_v25  ;;  %v507_v29 = vadd.f32 %v1322_v48, %v506_v27  ;;  %v595_v30 = vpop.f32.mrf.mxu1 }
 0x102   : > { %v677_v31 = vmax.f32 %v634_v28, 0.0  ;;  %v596_v32 = vadd.f32 %v595_v30, %v507_v29 }
 0x104   : > { %v709_v33 = vpack.c.bf16 %v677_v31, %v677_v31  ;;  %v662_v34 = vmax.f32 %v596_v32, 0.0 }
 0x105   : > { %v546_v35 = vpop.f32.mrf.mxu2 }
 0x106   : > { %742 = vst.msk [vmem:[%s1328_s12 + $0x60] sm:$0xf] %vm717_vm0, %v709_v33  ;;  %v694_v36 = vpack.c.bf16 %v662_v34, %v662_v34  ;;  %v547_v37 = vadd.f32 %v1322_v48, %v546_v35  ;;  %v635_v38 = vpop.f32.mrf.mxu3 }
 0x107   : > { %v509_v39 = vpop.f32.mrf.mxu0 }
 0x108   : > { %727 = vst.msk [vmem:[%s1328_s12 + $0x24] sm:$0xf] %vm717_vm0, %v694_v36  ;;  %v636_v40 = vadd.f32 %v635_v38, %v547_v37  ;;  %v510_v41 = vadd.f32 %v1322_v48, %v509_v39  ;;  %v598_v42 = vpop.f32.mrf.mxu1 }
 0x10a   : > { %v678_v43 = vmax.f32 %v636_v40, 0.0  ;;  %v599_v44 = vadd.f32 %v598_v42, %v510_v41 }
 0x10c   : > { %v710_v45 = vpack.c.bf16 %v678_v43, %v678_v43  ;;  %v663_v46 = vmax.f32 %v599_v44, 0.0 }
 0x10d   : > { %v549_v47 = vpop.f32.mrf.mxu2 }
 0x10e   : > { %743 = vst.msk [vmem:[%s1328_s12 + $0x64] sm:$0xf] %vm717_vm0, %v710_v45  ;;  %v695_v49 = vpack.c.bf16 %v663_v46, %v663_v46  ;;  %v550_v50 = vadd.f32 %v1322_v48, %v549_v47  ;;  %v638_v51 = vpop.f32.mrf.mxu3 }
 0x10f   : > { %v511_v52 = vpop.f32.mrf.mxu0 }
 0x110   : > { %728 = vst.msk [vmem:[%s1328_s12 + $0x28] sm:$0xf] %vm717_vm0, %v695_v49  ;;  %v639_v53 = vadd.f32 %v638_v51, %v550_v50  ;;  %v512_v54 = vadd.f32 %v1322_v48, %v511_v52  ;;  %v600_v55 = vpop.f32.mrf.mxu1 }
 0x112   : > { %v679_v56 = vmax.f32 %v639_v53, 0.0  ;;  %v601_v57 = vadd.f32 %v600_v55, %v512_v54 }
 0x114   : > { %v711_v58 = vpack.c.bf16 %v679_v56, %v679_v56  ;;  %v664_v59 = vmax.f32 %v601_v57, 0.0 }
 0x115   : > { %v551_v60 = vpop.f32.mrf.mxu2 }
 0x116   : > { %744 = vst.msk [vmem:[%s1328_s12 + $0x68] sm:$0xf] %vm717_vm0, %v711_v58  ;;  %v696_v61 = vpack.c.bf16 %v664_v59, %v664_v59  ;;  %v552_v62 = vadd.f32 %v1322_v48, %v551_v60  ;;  %v640_v63 = vpop.f32.mrf.mxu3 }
 0x117   : > { %v514_v0 = vpop.f32.mrf.mxu0 }
 0x118   : > { %729 = vst.msk [vmem:[%s1328_s12 + $0x2c] sm:$0xf] %vm717_vm0, %v696_v61  ;;  %v641_v1 = vadd.f32 %v640_v63, %v552_v62  ;;  %v515_v2 = vadd.f32 %v1322_v48, %v514_v0  ;;  %v603_v3 = vpop.f32.mrf.mxu1 }
 0x11a   : > { %v680_v4 = vmax.f32 %v641_v1, 0.0  ;;  %v604_v5 = vadd.f32 %v603_v3, %v515_v2 }
 0x11c   : > { %v712_v6 = vpack.c.bf16 %v680_v4, %v680_v4  ;;  %v665_v7 = vmax.f32 %v604_v5, 0.0 }
 0x11d   : > { %v554_v8 = vpop.f32.mrf.mxu2 }
 0x11e   : > { %745 = vst.msk [vmem:[%s1328_s12 + $0x6c] sm:$0xf] %vm717_vm0, %v712_v6  ;;  %v697_v9 = vpack.c.bf16 %v665_v7, %v665_v7  ;;  %v555_v10 = vadd.f32 %v1322_v48, %v554_v8  ;;  %v643_v11 = vpop.f32.mrf.mxu3 }
 0x11f   : > { %v516_v12 = vpop.f32.mrf.mxu0 }
 0x120   : > { %730 = vst.msk [vmem:[%s1328_s12 + $0x30] sm:$0xf] %vm717_vm0, %v697_v9  ;;  %v644_v13 = vadd.f32 %v643_v11, %v555_v10  ;;  %v517_v14 = vadd.f32 %v1322_v48, %v516_v12  ;;  %v605_v15 = vpop.f32.mrf.mxu1 }
 0x122   : > { %v681_v16 = vmax.f32 %v644_v13, 0.0  ;;  %v606_v17 = vadd.f32 %v605_v15, %v517_v14 }
 0x124   : > { %v713_v18 = vpack.c.bf16 %v681_v16, %v681_v16  ;;  %v666_v19 = vmax.f32 %v606_v17, 0.0 }
 0x125   : > { %v556_v20 = vpop.f32.mrf.mxu2 }
 0x126   : > { %746 = vst.msk [vmem:[%s1328_s12 + $0x70] sm:$0xf] %vm717_vm0, %v713_v18  ;;  %v698_v21 = vpack.c.bf16 %v666_v19, %v666_v19  ;;  %v557_v22 = vadd.f32 %v1322_v48, %v556_v20  ;;  %v645_v23 = vpop.f32.mrf.mxu3 }
 0x127   : > { %v519_v24 = vpop.f32.mrf.mxu0 }
 0x128   : > { %731 = vst.msk [vmem:[%s1328_s12 + $0x34] sm:$0xf] %vm717_vm0, %v698_v21  ;;  %v646_v25 = vadd.f32 %v645_v23, %v557_v22  ;;  %v520_v26 = vadd.f32 %v1322_v48, %v519_v24  ;;  %v608_v27 = vpop.f32.mrf.mxu1 }
 0x12a   : > { %v682_v28 = vmax.f32 %v646_v25, 0.0  ;;  %v609_v29 = vadd.f32 %v608_v27, %v520_v26 }
 0x12c   : > { %v714_v30 = vpack.c.bf16 %v682_v28, %v682_v28  ;;  %v667_v31 = vmax.f32 %v609_v29, 0.0 }
 0x12d   : > { %v559_v32 = vpop.f32.mrf.mxu2 }
 0x12e   : > { %747 = vst.msk [vmem:[%s1328_s12 + $0x74] sm:$0xf] %vm717_vm0, %v714_v30  ;;  %v699_v33 = vpack.c.bf16 %v667_v31, %v667_v31  ;;  %v560_v34 = vadd.f32 %v1322_v48, %v559_v32  ;;  %v648_v35 = vpop.f32.mrf.mxu3 }
 0x12f   : > { %v521_v36 = vpop.f32.mrf.mxu0 }
 0x130   : > { %732 = vst.msk [vmem:[%s1328_s12 + $0x38] sm:$0xf] %vm717_vm0, %v699_v33  ;;  %v649_v37 = vadd.f32 %v648_v35, %v560_v34  ;;  %v522_v38 = vadd.f32 %v1322_v48, %v521_v36  ;;  %v610_v39 = vpop.f32.mrf.mxu1 }
 0x132   : > { %v683_v40 = vmax.f32 %v649_v37, 0.0  ;;  %v611_v41 = vadd.f32 %v610_v39, %v522_v38 }
 0x134   : > { %v715_v42 = vpack.c.bf16 %v683_v40, %v683_v40  ;;  %v668_v43 = vmax.f32 %v611_v41, 0.0 }
 0x135   : > { %v561_v44 = vpop.f32.mrf.mxu2 }
 0x136   : > { %748 = vst.msk [vmem:[%s1328_s12 + $0x78] sm:$0xf] %vm717_vm0, %v715_v42  ;;  %v700_v45 = vpack.c.bf16 %v668_v43, %v668_v43  ;;  %v562_v46 = vadd.f32 %v1322_v48, %v561_v44  ;;  %v650_v47 = vpop.f32.mrf.mxu3 }
 0x138   : > { %733 = vst.msk [vmem:[%s1328_s12 + $0x3c] sm:$0xf] %vm717_vm0, %v700_v45  ;;  %v651_v49 = vadd.f32 %v650_v47, %v562_v46 }
 0x13a   : > { %v684_v50 = vmax.f32 %v651_v49, 0.0 }
 0x13c   : > { %v716_v51 = vpack.c.bf16 %v684_v50, %v684_v50 }
 0x13e   : > { %749 = vst.msk [vmem:[%s1328_s12 + $0x7c] sm:$0xf] %vm717_vm0, %v716_v51 }
 0x13f PF: > { %s16_s17 = sadd.s32 1, %s1115_s17   ;;  %s1449_s12 = smov %s1099_s13 }
 0x140   : > { %p13_p0 = scmp.ge.s32.totalorder %s16_s17, 4   ;;  %s1450_s13 = smov %s1103_s14 }
 0x141   : > { %s1451_s14 = smov %s1188_s24  ;;  %s1452_s15 = smov %s1111_s16 }
 0x142   : > { %s1453_s16 = smov %s1455_s19  ;;  %15 = sbr.rel (!%p13_p0) target bundleno = 4 (0x4), region = 78 }
 0x147   :  { %778 = vsyncpa [#allocation3], 1 }
 0x148   :  { %780 = vsyncpa [#allocation3 + $0x1], 1 }

// kernel: bottleneck_forward.5
= control target key start
LH: loop header
LB: loop body
LE: loop exit
PB: predicated region body
PF: predicated region fallthrough
CT: control target
= control target key end

     0   :  { %9 = vsyncpa [#allocation3], 0  ;;  %s1929_s0 = inlined_call_operand.vmem [shape: bf16[512,64], index: 0, kind: input, shape index: {}]   ;;  %s1930_s1 = inlined_call_operand.vmem [shape: bf16[64,256], index: 1, kind: input, shape index: {}]   ;;  %s1931_s2 = inlined_call_operand.vmem [shape: f32[1,256], index: 2, kind: input, shape index: {}]   ;;  %s1932_s3 = inlined_call_operand.hbm [shape: f32[512,256], index: 3, kind: input, shape index: {}]   ;;  %s1933_s4 = inlined_call_operand.hbm [shape: f32[512,256], index: 4, kind: output, shape index: {}]  }
   0x1   :  { %11 = vsyncpa [#allocation3 + $0x1], 0 }
   0x2   :  { %12 = vsyncpa [#allocation4], 0 }
   0x3   :  { %14 = vsyncpa [#allocation4 + $0x1], 0  ;;  %s1493_s15 = smov 0   ;;  %s1495_s16 = smov 0  }
   0x4   :  { %s1497_s17 = smov 0   ;;  %s1499_s18 = smov 0  }
   0x5   :  { %s1501_s19 = smov 0   ;;  %s1503_s20 = smov 0  }
   0x6 LB: > { %s1099_s21 = sadd.s32 4294967295, %s1462_s20   ;;  %s1100_s22 = sadd.s32 4294967294, %s1462_s20   ;;  %s1462_s20 = sphi %s1503_s20, %s20_s20   ;;  %s1458_s19 = sphi %s1501_s19, %s1943_s19   ;;  %s1454_s18 = sphi %s1499_s18, %s1942_s18   ;;  %s1450_s17 = sphi %s1497_s17, %s1941_s17   ;;  %s1446_s16 = sphi %s1495_s16, %s1940_s16   ;;  %s1442_s15 = sphi %s1493_s15, %s1939_s15  }
   0x7   : > { %s29_s23 = sadd.s32 1, %s1458_s19  ;;  %s119_s24 = sadd.s32 1, %s1450_s17 }
   0x8   : > { %p30_p0 = scmp.ge.s32.totalorder %s29_s23, 2  ;;  %p126_p1 = scmp.ne.s32.totalorder %s1450_s17, %s1446_s16 }
   0x9   : > { %p127_p2 = scmp.eq.s32.totalorder %s1462_s20, 0  ;;  %p132_p3 = scmp.ne.s32.totalorder %s1446_s16, %s1442_s15 }
   0xa   : > { %s1945_s23 = smov (%p30_p0, %s29_s23), 0  ;;  %p133_p5 = scmp.eq.s32.totalorder %s1099_s21, 0 }
   0xb   : > { %p1534_p4 = por %p127_p2, %p126_p1  ;;  %s114_s26 = ssub.s32 %s1458_s19, %s1945_s23 }
   0xc   : > { %p158_p6 = scmp.eq.s32.totalorder %s1099_s21, 1  ;;  %p117_p7 = scmp.eq.s32.totalorder %s114_s26, 0 }
   0xd   : > { %p1540_p8 = por %p133_p5, %p132_p3  ;;  %p164_p10 = scmp.eq.s32.totalorder %s1100_s22, 1 }
   0xe   : > { %p1544_p9 = por %p158_p6, %p126_p1  ;;  %p1104_p12 = scmp.ge.s32.totalorder %s1462_s20, 2 }
   0xf   : > { %s1549_s29 = scalar_select %p117_p7, %s1450_s17, %s119_s24  }
  0x10   : > { %p1551_p11 = por %p164_p10, %p132_p3  ;;  %p1296_p13 = scmp.lt.s32.totalorder %s1462_s20, 2 }
  0x11   : > { %s210_s5 = sand.u32 1, %s1450_s17   ;;  %s1249_s7 = sshll.u32 %s1458_s19, 9 }
  0x12   : > { %s1105_s6 = sshll.u32 %s210_s5, 9  ;;  %s222_s10 = scalar_lea.hbm %s1932_s3, %s1249_s7 }
  0x13   : > { %s214_s11 = scalar_lea.vmem [#allocation2], %s1105_s6  ;;  %s223_s13 = sshll.u32 %s222_s10, 4  ;;  %s224_s13 = int_to_ptr.hbm [resolvable:$true] %s223_s13 }
  0x14   : > { %s225_s12 = sshll.u32 %s214_s11, 4  ;;  %p1289_p0 = pnand %p1296_p13, %p1534_p4  ;;  %s226_s12 = int_to_ptr.vmem [resolvable:$true] %s225_s12 }
  0x15   : > { %p1109_p1 = scmp.ge.s32.totalorder %s1462_s20, 1  ;;  %s211_s14 = scalar_lea.sflag [#allocation3], %s210_s5 }
  0x16   : > { %s1464_s21 = smov 256   ;;  %s1465_s22 = smov 16  }
  0x17   : > { %1291 = dma.hbm_to_vmem [thread:$0]  (!%p1289_p0), %s224_s13, 8192, %s226_s12, %s211_s14, %s1464_s21, %s1464_s21, %s1465_s22  }
  0x18   : > { %p233_p2 = scmp.lt.s32.totalorder %s1462_s20, 3 }
  0x1a   : > { %p234_p3 = pnand %p1109_p1, %p233_p2 }
  0x1b   : > { %s1567_s24 = sand.u32 (!%p234_p3), 1, %s1446_s16  }
  0x1c   : > { %237 = sbr.rel (%p234_p3) target bundleno = 315 (0x13b), region = 36  ;;  %s1110_s26 = sshll.u32 (!%p234_p3), %s1567_s24, 9 }
  0x1d   : > { %s240_s6 = scalar_lea.sflag (!%p234_p3), [#allocation3], %s1567_s24  ;;  %s1573_s25 = scalar_lea.vmem (!%p234_p3), [#allocation2], %s1110_s26 }
  0x21   : > { %1433 = dma.done.wait (%p1540_p8), %s240_s6, 8192  }
  0x22   : > { %1435 = vsyncadd (%p1540_p8), %s240_s6, 4294959104  ;;  %s1112_s5 = sshll.u32 %s1454_s18, 5  ;;  %v1204_v0 = vld [vmem:[%s1930_s1 + $0x30] sm:$0xf]  ;;  %v1273_v1 = vld [vmem:[%s1930_s1 + $0x34] sm:$0xf0] }
  0x23   : > { %p1580_p4 = scmp.lt.s32.totalorder %s1112_s5, 63  ;;  %v1272_v2 = vld [vmem:[%s1930_s1 + $0x34] sm:$0xf]  ;;  %v1205_v3 = vor.u32 %v1273_v1, %v1204_v0  ;;  %v1206_v4 = vld [vmem:[%s1930_s1 + $0x38] sm:$0xf0]  ;;  %vm471_vm0 = vcmask 523264  }
  0x24   : > { %v1196_v5 = vld [vmem:[%s1930_s1 + $0x20] sm:$0xf]  ;;  %v1271_v6 = vld [vmem:[%s1930_s1 + $0x24] sm:$0xf0]  ;;  %v1209_v7 = vor.u32 %v1272_v2, %v1206_v4  ;;  %v1270_v8 = vld [vmem:[%s1930_s1 + $0x24] sm:$0xf] }
  0x25   : > { %v1198_v9 = vld [vmem:[%s1930_s1 + $0x28] sm:$0xf0]  ;;  %524 = vmatpush.bf16.msra.mxu0 %v1205_v3  ;;  %1276 = vmatpush.bf16.msra.mxu2 %v1205_v3  ;;  %v1197_v10 = vor.u32 %v1271_v6, %v1196_v5  ;;  %v1188_v12 = vld [vmem:[%s1930_s1 + $0x10] sm:$0xf]  ;;  %v1269_v13 = vld [vmem:[%s1930_s1 + $0x14] sm:$0xf0] }
  0x26   : > { %613 = vmatpush.bf16.msra.mxu1 %v1209_v7  ;;  %1280 = vmatpush.bf16.msra.mxu3 %v1209_v7  ;;  %v1201_v11 = vor.u32 %v1270_v8, %v1198_v9  ;;  %s1947_s5 = smov (!%p1580_p4, %s1112_s5), 63  ;;  %v1268_v14 = vld [vmem:[%s1930_s1 + $0x14] sm:$0xf]  ;;  %v1190_v15 = vld [vmem:[%s1930_s1 + $0x18] sm:$0xf0]  ;;  %v1189_v16 = vor.u32 %v1269_v13, %v1188_v12  ;;  %v698_v44 = vld [vmem:[%s1573_s25] sm:$0xff] }
  0x27   : > { %v1193_v17 = vor.u32 %v1268_v14, %v1190_v15  ;;  %v1180_v18 = vld [vmem:[%s1930_s1] sm:$0xf]  ;;  %v1267_v19 = vld [vmem:[%s1930_s1 + $0x4] sm:$0xf0]  ;;  %s1113_s13 = sshll.u32 %s1947_s5, 2  ;;  %s1701_s11 = scalar_lea.vmem [#allocation5], %s1110_s26 }
  0x28   : > { %v1266_v20 = vld [vmem:[%s1930_s1 + $0x4] sm:$0xf]  ;;  %v1182_v21 = vld [vmem:[%s1930_s1 + $0x8] sm:$0xf0]  ;;  %v1181_v22 = vor.u32 %v1267_v19, %v1180_v18  ;;  %s1637_s9 = scalar_lea.vmem %s1929_s0, %s1113_s13  ;;  %v345_v40 = vld [vmem:[%s1931_s2] sm:$0x3] }
  0x29   : > { %525 = vmatpush.bf16.msra.mxu0 %v1197_v10  ;;  %1277 = vmatpush.bf16.msra.mxu2 %v1197_v10  ;;  %v1185_v23 = vor.u32 %v1266_v20, %v1182_v21  ;;  %v1250_v24 = vld [vmem:[%s1637_s9] sm:$0xff]  ;;  %v1251_v26 = vld [vmem:[%s1637_s9 + $0x8] sm:$0xff]  ;;  %v1252_v28 = vld [vmem:[%s1637_s9 + $0x10] sm:$0xff]  ;;  %v1690_v41 = vperm.slane %v345_v40, 0  ;;  %v1692_v42 = vperm.slane %v345_v40, 1  ;;  %s1275_s26 = sshll.u32 %s1454_s18, 9 }
  0x2a   : > { %614 = vmatpush.bf16.msra.mxu1 %v1201_v11  ;;  %1281 = vmatpush.bf16.msra.mxu3 %v1201_v11  ;;  %v1258_v25 = vld [vmem:[%s1637_s9 + $0x40] sm:$0xff]  ;;  %v1259_v27 = vld [vmem:[%s1637_s9 + $0x48] sm:$0xff]  ;;  %v1260_v29 = vld [vmem:[%s1637_s9 + $0x50] sm:$0xff]  ;;  %s969_s13 = scalar_lea.hbm %s1933_s4, %s1275_s26  ;;  %s970_s18 = sshll.u32 %s1701_s11, 4  ;;  %s971_s18 = int_to_ptr.vmem [resolvable:$true] %s970_s18 }
  0x2b   : > { %v1253_v30 = vld [vmem:[%s1637_s9 + $0x18] sm:$0xff]  ;;  %v1254_v32 = vld [vmem:[%s1637_s9 + $0x20] sm:$0xff]  ;;  %v1255_v34 = vld [vmem:[%s1637_s9 + $0x28] sm:$0xff]  ;;  %s972_s27 = sshll.u32 %s969_s13, 4  ;;  %s955_s14 = scalar_lea.sflag [#allocation4], %s1567_s24  ;;  %s973_s27 = int_to_ptr.hbm [resolvable:$true] %s972_s27 }
  0x2c   : > { %v1261_v31 = vld [vmem:[%s1637_s9 + $0x58] sm:$0xff]  ;;  %v1262_v33 = vld [vmem:[%s1637_s9 + $0x60] sm:$0xff]  ;;  %v1263_v35 = vld [vmem:[%s1637_s9 + $0x68] sm:$0xff]  ;;  %s1394_s21 = sshra.s32 %s973_s27, 4  ;;  %s1400_s8 = scalar_lea.hbm %s1933_s4, 1024  ;;  %s1395_s21 = int_to_ptr.hbm [resolvable:$true] %s1394_s21 }
  0x2d   : > { %526 = vmatpush.bf16.msra.mxu0 %v1189_v16  ;;  %1278 = vmatpush.bf16.msra.mxu2 %v1189_v16  ;;  %v1256_v36 = vld [vmem:[%s1637_s9 + $0x30] sm:$0xff]  ;;  %v1257_v38 = vld [vmem:[%s1637_s9 + $0x38] sm:$0xff]  ;;  %v699_v47 = vld [vmem:[%s1573_s25 + $0x8] sm:$0xff]  ;;  %s1396_s22 = scalar_lea.hbm %s1395_s21, 512  ;;  %p1401_p8 = scmp.lt.s32.totalorder %s1395_s21, %s1933_s4 }
  0x2e   : > { %615 = vmatpush.bf16.msra.mxu1 %v1193_v17  ;;  %1282 = vmatpush.bf16.msra.mxu3 %v1193_v17  ;;  %v1264_v37 = vld [vmem:[%s1637_s9 + $0x70] sm:$0xff]  ;;  %v1265_v39 = vld [vmem:[%s1637_s9 + $0x78] sm:$0xff]  ;;  %v730_v54 = vld [vmem:[%s1573_s25 + $0x100] sm:$0xff]  ;;  %p1397_p5 = scmp.ne.s32.totalorder %s1395_s21, %s1396_s22  ;;  %p1402_p10 = scmp.lt.s32.totalorder %s1400_s8, %s1396_s22 }
  0x2f   : > { %v731_v57 = vld [vmem:[%s1573_s25 + $0x108] sm:$0xff]  ;;  %v700_v60 = vld [vmem:[%s1573_s25 + $0x10] sm:$0xff]  ;;  %v701_v0 = vld [vmem:[%s1573_s25 + $0x18] sm:$0xff] }
  0x30   : > { %v732_v10 = vld [vmem:[%s1573_s25 + $0x110] sm:$0xff]  ;;  %v733_v13 = vld [vmem:[%s1573_s25 + $0x118] sm:$0xff]  ;;  %v702_v16 = vld [vmem:[%s1573_s25 + $0x20] sm:$0xff]  ;;  %p1398_p6 = pnand %p1397_p5, %p1544_p9  ;;  %p1403_p13 = por %p1402_p10, %p1401_p8 }
  0x31   : > { %527 = vmatpush.bf16.msra.mxu0 %v1181_v22  ;;  %1279 = vmatpush.bf16.msra.mxu2 %v1181_v22  ;;  %v703_v20 = vld [vmem:[%s1573_s25 + $0x28] sm:$0xff]  ;;  %v705_v40 = vld [vmem:[%s1573_s25 + $0x38] sm:$0xff] }
  0x32   : > { %616 = vmatpush.bf16.msra.mxu1 %v1185_v23  ;;  %1283 = vmatpush.bf16.msra.mxu3 %v1185_v23  ;;  %p1399_p7 = pneg %p1398_p6 }
  0x34   : > { %1210 = vmatmul.msk.bf16.vlgmr.msra.gmra.mxu0 %vm471_vm0, %v1250_v24  ;;  %1218 = vmatmul.msk.bf16.vlgmr.msra.gmra.mxu2 %vm471_vm0, %v1258_v25  ;;  %p1404_p0 = pnand %p1403_p13, %p1399_p7 }
  0x35   : > { %1226 = vmatmul.msk.bf16.vlgmr.msra.gmra.mxu1 %vm471_vm0, %v1250_v24  ;;  %1234 = vmatmul.msk.bf16.vlgmr.msra.gmra.mxu3 %vm471_vm0, %v1258_v25 }
  0x44   : > { %1211 = vmatmul.msk.bf16.gmra.mxu0 %vm471_vm0, %v1251_v26  ;;  %1219 = vmatmul.msk.bf16.gmra.mxu2 %vm471_vm0, %v1259_v27 }
  0x45   : > { %1227 = vmatmul.msk.bf16.gmra.mxu1 %vm471_vm0, %v1251_v26  ;;  %1235 = vmatmul.msk.bf16.gmra.mxu3 %vm471_vm0, %v1259_v27 }
  0x54   : > { %1212 = vmatmul.msk.bf16.gmra.mxu0 %vm471_vm0, %v1252_v28  ;;  %1220 = vmatmul.msk.bf16.gmra.mxu2 %vm471_vm0, %v1260_v29 }
  0x55   : > { %1228 = vmatmul.msk.bf16.gmra.mxu1 %vm471_vm0, %v1252_v28  ;;  %1236 = vmatmul.msk.bf16.gmra.mxu3 %vm471_vm0, %v1260_v29 }
  0x64   : > { %1213 = vmatmul.msk.bf16.gmra.mxu0 %vm471_vm0, %v1253_v30  ;;  %1221 = vmatmul.msk.bf16.gmra.mxu2 %vm471_vm0, %v1261_v31 }
  0x65   : > { %1229 = vmatmul.msk.bf16.gmra.mxu1 %vm471_vm0, %v1253_v30  ;;  %1237 = vmatmul.msk.bf16.gmra.mxu3 %vm471_vm0, %v1261_v31  ;;  %v734_v30 = vld [vmem:[%s1573_s25 + $0x120] sm:$0xff] }
  0x74   : > { %1214 = vmatmul.msk.bf16.gmra.mxu0 %vm471_vm0, %v1254_v32  ;;  %1222 = vmatmul.msk.bf16.gmra.mxu2 %vm471_vm0, %v1262_v33 }
  0x75   : > { %1230 = vmatmul.msk.bf16.gmra.mxu1 %vm471_vm0, %v1254_v32  ;;  %1238 = vmatmul.msk.bf16.gmra.mxu3 %vm471_vm0, %v1262_v33  ;;  %v735_v33 = vld [vmem:[%s1573_s25 + $0x128] sm:$0xff] }
  0x84   : > { %1215 = vmatmul.msk.bf16.gmra.mxu0 %vm471_vm0, %v1255_v34  ;;  %1223 = vmatmul.msk.bf16.gmra.mxu2 %vm471_vm0, %v1263_v35 }
  0x85   : > { %1231 = vmatmul.msk.bf16.gmra.mxu1 %vm471_vm0, %v1255_v34  ;;  %1239 = vmatmul.msk.bf16.gmra.mxu3 %vm471_vm0, %v1263_v35 }
  0x94   : > { %1216 = vmatmul.msk.bf16.gmra.mxu0 %vm471_vm0, %v1256_v36  ;;  %1224 = vmatmul.msk.bf16.gmra.mxu2 %vm471_vm0, %v1264_v37 }
  0x95   : > { %1232 = vmatmul.msk.bf16.gmra.mxu1 %vm471_vm0, %v1256_v36  ;;  %1240 = vmatmul.msk.bf16.gmra.mxu3 %vm471_vm0, %v1264_v37  ;;  %v704_v36 = vld [vmem:[%s1573_s25 + $0x30] sm:$0xff] }
  0xa4   : > { %1217 = vmatmul.msk.bf16.gmra.mxu0 %vm471_vm0, %v1257_v38  ;;  %1225 = vmatmul.msk.bf16.gmra.mxu2 %vm471_vm0, %v1265_v39 }
  0xa5   : > { %1233 = vmatmul.msk.bf16.gmra.mxu1 %vm471_vm0, %v1257_v38  ;;  %1241 = vmatmul.msk.bf16.gmra.mxu3 %vm471_vm0, %v1265_v39 }
  0xb1   : > { %v529_v43 = vpop.f32.mrf.mxu0 }
  0xb2   : > { %v530_v45 = vadd.f32 %v529_v43, %v1690_v41  ;;  %v618_v46 = vpop.f32.mrf.mxu1 }
  0xb3   : > { %v619_v48 = vadd.f32 %v618_v46, %v1692_v42 }
  0xb4   : > { %v762_v49 = vadd.f32 %v698_v44, %v530_v45 }
  0xb5   : > { %v763_v50 = vadd.f32 %v699_v47, %v619_v48 }
  0xb6   : > { %v826_v51 = vmax.f32 %v762_v49, 0.0 }
  0xb7   : > { %v827_v52 = vmax.f32 %v763_v50, 0.0  ;;  %v569_v53 = vpop.f32.mrf.mxu2 }
  0xb8   : > { %890 = vst [vmem:[%s1701_s11] sm:$0xff] %v826_v51  ;;  %v570_v55 = vadd.f32 %v569_v53, %v1690_v41  ;;  %v658_v56 = vpop.f32.mrf.mxu3 }
  0xb9   : > { %891 = vst [vmem:[%s1701_s11 + $0x8] sm:$0xff] %v827_v52  ;;  %v659_v58 = vadd.f32 %v658_v56, %v1692_v42  ;;  %v531_v59 = vpop.f32.mrf.mxu0  ;;  %v736_v52 = vld [vmem:[%s1573_s25 + $0x130] sm:$0xff] }
  0xba   : > { %v794_v61 = vadd.f32 %v730_v54, %v570_v55  ;;  %v532_v62 = vadd.f32 %v531_v59, %v1690_v41  ;;  %v620_v63 = vpop.f32.mrf.mxu1  ;;  %v737_v55 = vld [vmem:[%s1573_s25 + $0x138] sm:$0xff] }
  0xbb   : > { %v795_v1 = vadd.f32 %v731_v57, %v659_v58  ;;  %v621_v2 = vadd.f32 %v620_v63, %v1692_v42  ;;  %v706_v58 = vld [vmem:[%s1573_s25 + $0x40] sm:$0xff] }
  0xbc   : > { %v858_v3 = vmax.f32 %v794_v61, 0.0  ;;  %v764_v4 = vadd.f32 %v700_v60, %v532_v62  ;;  %v707_v62 = vld [vmem:[%s1573_s25 + $0x48] sm:$0xff] }
  0xbd   : > { %v859_v5 = vmax.f32 %v795_v1, 0.0  ;;  %v765_v6 = vadd.f32 %v701_v0, %v621_v2 }
  0xbe   : > { %922 = vst [vmem:[%s1701_s11 + $0x100] sm:$0xff] %v858_v3  ;;  %v828_v7 = vmax.f32 %v764_v4, 0.0 }
  0xbf   : > { %923 = vst [vmem:[%s1701_s11 + $0x108] sm:$0xff] %v859_v5  ;;  %v829_v8 = vmax.f32 %v765_v6, 0.0  ;;  %v571_v9 = vpop.f32.mrf.mxu2 }
  0xc0   : > { %892 = vst [vmem:[%s1701_s11 + $0x10] sm:$0xff] %v828_v7  ;;  %v572_v11 = vadd.f32 %v571_v9, %v1690_v41  ;;  %v660_v12 = vpop.f32.mrf.mxu3 }
  0xc1   : > { %893 = vst [vmem:[%s1701_s11 + $0x18] sm:$0xff] %v829_v8  ;;  %v661_v14 = vadd.f32 %v660_v12, %v1692_v42  ;;  %v534_v15 = vpop.f32.mrf.mxu0  ;;  %v738_v8 = vld [vmem:[%s1573_s25 + $0x140] sm:$0xff] }
  0xc2   : > { %v796_v17 = vadd.f32 %v732_v10, %v572_v11  ;;  %v535_v18 = vadd.f32 %v534_v15, %v1690_v41  ;;  %v623_v19 = vpop.f32.mrf.mxu1  ;;  %v739_v11 = vld [vmem:[%s1573_s25 + $0x148] sm:$0xff] }
  0xc3   : > { %v797_v21 = vadd.f32 %v733_v13, %v661_v14  ;;  %v624_v22 = vadd.f32 %v623_v19, %v1692_v42  ;;  %v708_v14 = vld [vmem:[%s1573_s25 + $0x50] sm:$0xff] }
  0xc4   : > { %v860_v23 = vmax.f32 %v796_v17, 0.0  ;;  %v766_v24 = vadd.f32 %v702_v16, %v535_v18  ;;  %v709_v18 = vld [vmem:[%s1573_s25 + $0x58] sm:$0xff] }
  0xc5   : > { %v861_v25 = vmax.f32 %v797_v21, 0.0  ;;  %v767_v26 = vadd.f32 %v703_v20, %v624_v22 }
  0xc6   : > { %924 = vst [vmem:[%s1701_s11 + $0x110] sm:$0xff] %v860_v23  ;;  %v830_v27 = vmax.f32 %v766_v24, 0.0 }
  0xc7   : > { %925 = vst [vmem:[%s1701_s11 + $0x118] sm:$0xff] %v861_v25  ;;  %v831_v28 = vmax.f32 %v767_v26, 0.0  ;;  %v574_v29 = vpop.f32.mrf.mxu2 }
  0xc8   : > { %894 = vst [vmem:[%s1701_s11 + $0x20] sm:$0xff] %v830_v27  ;;  %v575_v31 = vadd.f32 %v574_v29, %v1690_v41  ;;  %v663_v32 = vpop.f32.mrf.mxu3 }
  0xc9   : > { %895 = vst [vmem:[%s1701_s11 + $0x28] sm:$0xff] %v831_v28  ;;  %v664_v34 = vadd.f32 %v663_v32, %v1692_v42  ;;  %v536_v35 = vpop.f32.mrf.mxu0  ;;  %v740_v28 = vld [vmem:[%s1573_s25 + $0x150] sm:$0xff] }
  0xca   : > { %v798_v37 = vadd.f32 %v734_v30, %v575_v31  ;;  %v537_v38 = vadd.f32 %v536_v35, %v1690_v41  ;;  %v625_v39 = vpop.f32.mrf.mxu1  ;;  %v741_v31 = vld [vmem:[%s1573_s25 + $0x158] sm:$0xff] }
  0xcb   : > { %v799_v43 = vadd.f32 %v735_v33, %v664_v34  ;;  %v626_v44 = vadd.f32 %v625_v39, %v1692_v42  ;;  %v710_v34 = vld [vmem:[%s1573_s25 + $0x60] sm:$0xff] }
  0xcc   : > { %v862_v45 = vmax.f32 %v798_v37, 0.0  ;;  %v768_v46 = vadd.f32 %v704_v36, %v537_v38  ;;  %v711_v38 = vld [vmem:[%s1573_s25 + $0x68] sm:$0xff] }
  0xcd   : > { %v863_v47 = vmax.f32 %v799_v43, 0.0  ;;  %v769_v48 = vadd.f32 %v705_v40, %v626_v44 }
  0xce   : > { %926 = vst [vmem:[%s1701_s11 + $0x120] sm:$0xff] %v862_v45  ;;  %v832_v49 = vmax.f32 %v768_v46, 0.0 }
  0xcf   : > { %927 = vst [vmem:[%s1701_s11 + $0x128] sm:$0xff] %v863_v47  ;;  %v833_v50 = vmax.f32 %v769_v48, 0.0  ;;  %v576_v51 = vpop.f32.mrf.mxu2 }
  0xd0   : > { %896 = vst [vmem:[%s1701_s11 + $0x30] sm:$0xff] %v832_v49  ;;  %v577_v53 = vadd.f32 %v576_v51, %v1690_v41  ;;  %v665_v54 = vpop.f32.mrf.mxu3 }
  0xd1   : > { %897 = vst [vmem:[%s1701_s11 + $0x38] sm:$0xff] %v833_v50  ;;  %v666_v56 = vadd.f32 %v665_v54, %v1692_v42  ;;  %v539_v57 = vpop.f32.mrf.mxu0  ;;  %v742_v50 = vld [vmem:[%s1573_s25 + $0x160] sm:$0xff] }
  0xd2   : > { %v800_v59 = vadd.f32 %v736_v52, %v577_v53  ;;  %v540_v60 = vadd.f32 %v539_v57, %v1690_v41  ;;  %v628_v61 = vpop.f32.mrf.mxu1  ;;  %v743_v53 = vld [vmem:[%s1573_s25 + $0x168] sm:$0xff] }
  0xd3   : > { %v801_v63 = vadd.f32 %v737_v55, %v666_v56  ;;  %v629_v0 = vadd.f32 %v628_v61, %v1692_v42  ;;  %v712_v56 = vld [vmem:[%s1573_s25 + $0x70] sm:$0xff] }
  0xd4   : > { %v864_v1 = vmax.f32 %v800_v59, 0.0  ;;  %v770_v2 = vadd.f32 %v706_v58, %v540_v60  ;;  %v713_v60 = vld [vmem:[%s1573_s25 + $0x78] sm:$0xff] }
  0xd5   : > { %v865_v3 = vmax.f32 %v801_v63, 0.0  ;;  %v771_v4 = vadd.f32 %v707_v62, %v629_v0 }
  0xd6   : > { %928 = vst [vmem:[%s1701_s11 + $0x130] sm:$0xff] %v864_v1  ;;  %v834_v5 = vmax.f32 %v770_v2, 0.0 }
  0xd7   : > { %929 = vst [vmem:[%s1701_s11 + $0x138] sm:$0xff] %v865_v3  ;;  %v835_v6 = vmax.f32 %v771_v4, 0.0  ;;  %v579_v7 = vpop.f32.mrf.mxu2 }
  0xd8   : > { %898 = vst [vmem:[%s1701_s11 + $0x40] sm:$0xff] %v834_v5  ;;  %v580_v9 = vadd.f32 %v579_v7, %v1690_v41  ;;  %v668_v10 = vpop.f32.mrf.mxu3 }
  0xd9   : > { %899 = vst [vmem:[%s1701_s11 + $0x48] sm:$0xff] %v835_v6  ;;  %v669_v12 = vadd.f32 %v668_v10, %v1692_v42  ;;  %v541_v13 = vpop.f32.mrf.mxu0  ;;  %v744_v6 = vld [vmem:[%s1573_s25 + $0x170] sm:$0xff] }
  0xda   : > { %v802_v15 = vadd.f32 %v738_v8, %v580_v9  ;;  %v542_v16 = vadd.f32 %v541_v13, %v1690_v41  ;;  %v630_v17 = vpop.f32.mrf.mxu1  ;;  %v745_v9 = vld [vmem:[%s1573_s25 + $0x178] sm:$0xff] }
  0xdb   : > { %v803_v19 = vadd.f32 %v739_v11, %v669_v12  ;;  %v631_v20 = vadd.f32 %v630_v17, %v1692_v42  ;;  %v714_v12 = vld [vmem:[%s1573_s25 + $0x80] sm:$0xff] }
  0xdc   : > { %v866_v21 = vmax.f32 %v802_v15, 0.0  ;;  %v772_v22 = vadd.f32 %v708_v14, %v542_v16  ;;  %v715_v16 = vld [vmem:[%s1573_s25 + $0x88] sm:$0xff] }
  0xdd   : > { %v867_v23 = vmax.f32 %v803_v19, 0.0  ;;  %v773_v24 = vadd.f32 %v709_v18, %v631_v20 }
  0xde   : > { %930 = vst [vmem:[%s1701_s11 + $0x140] sm:$0xff] %v866_v21  ;;  %v836_v25 = vmax.f32 %v772_v22, 0.0 }
  0xdf   : > { %931 = vst [vmem:[%s1701_s11 + $0x148] sm:$0xff] %v867_v23  ;;  %v837_v26 = vmax.f32 %v773_v24, 0.0  ;;  %v581_v27 = vpop.f32.mrf.mxu2 }
  0xe0   : > { %900 = vst [vmem:[%s1701_s11 + $0x50] sm:$0xff] %v836_v25  ;;  %v582_v29 = vadd.f32 %v581_v27, %v1690_v41  ;;  %v670_v30 = vpop.f32.mrf.mxu3 }
  0xe1   : > { %901 = vst [vmem:[%s1701_s11 + $0x58] sm:$0xff] %v837_v26  ;;  %v671_v32 = vadd.f32 %v670_v30, %v1692_v42  ;;  %v544_v33 = vpop.f32.mrf.mxu0  ;;  %v746_v26 = vld [vmem:[%s1573_s25 + $0x180] sm:$0xff] }
  0xe2   : > { %v804_v35 = vadd.f32 %v740_v28, %v582_v29  ;;  %v545_v36 = vadd.f32 %v544_v33, %v1690_v41  ;;  %v633_v37 = vpop.f32.mrf.mxu1  ;;  %v747_v29 = vld [vmem:[%s1573_s25 + $0x188] sm:$0xff] }
  0xe3   : > { %v805_v39 = vadd.f32 %v741_v31, %v671_v32  ;;  %v634_v40 = vadd.f32 %v633_v37, %v1692_v42  ;;  %v716_v32 = vld [vmem:[%s1573_s25 + $0x90] sm:$0xff] }
  0xe4   : > { %v868_v43 = vmax.f32 %v804_v35, 0.0  ;;  %v774_v44 = vadd.f32 %v710_v34, %v545_v36  ;;  %v717_v36 = vld [vmem:[%s1573_s25 + $0x98] sm:$0xff] }
  0xe5   : > { %v869_v45 = vmax.f32 %v805_v39, 0.0  ;;  %v775_v46 = vadd.f32 %v711_v38, %v634_v40 }
  0xe6   : > { %932 = vst [vmem:[%s1701_s11 + $0x150] sm:$0xff] %v868_v43  ;;  %v838_v47 = vmax.f32 %v774_v44, 0.0 }
  0xe7   : > { %933 = vst [vmem:[%s1701_s11 + $0x158] sm:$0xff] %v869_v45  ;;  %v839_v48 = vmax.f32 %v775_v46, 0.0  ;;  %v584_v49 = vpop.f32.mrf.mxu2 }
  0xe8   : > { %902 = vst [vmem:[%s1701_s11 + $0x60] sm:$0xff] %v838_v47  ;;  %v585_v51 = vadd.f32 %v584_v49, %v1690_v41  ;;  %v673_v52 = vpop.f32.mrf.mxu3 }
  0xe9   : > { %903 = vst [vmem:[%s1701_s11 + $0x68] sm:$0xff] %v839_v48  ;;  %v674_v54 = vadd.f32 %v673_v52, %v1692_v42  ;;  %v546_v55 = vpop.f32.mrf.mxu0  ;;  %v748_v48 = vld [vmem:[%s1573_s25 + $0x190] sm:$0xff] }
  0xea   : > { %v806_v57 = vadd.f32 %v742_v50, %v585_v51  ;;  %v547_v58 = vadd.f32 %v546_v55, %v1690_v41  ;;  %v635_v59 = vpop.f32.mrf.mxu1  ;;  %v749_v51 = vld [vmem:[%s1573_s25 + $0x198] sm:$0xff] }
  0xeb   : > { %v807_v61 = vadd.f32 %v743_v53, %v674_v54  ;;  %v636_v62 = vadd.f32 %v635_v59, %v1692_v42  ;;  %v718_v54 = vld [vmem:[%s1573_s25 + $0xa0] sm:$0xff] }
  0xec   : > { %v870_v63 = vmax.f32 %v806_v57, 0.0  ;;  %v776_v0 = vadd.f32 %v712_v56, %v547_v58  ;;  %v719_v58 = vld [vmem:[%s1573_s25 + $0xa8] sm:$0xff] }
  0xed   : > { %v871_v1 = vmax.f32 %v807_v61, 0.0  ;;  %v777_v2 = vadd.f32 %v713_v60, %v636_v62 }
  0xee   : > { %934 = vst [vmem:[%s1701_s11 + $0x160] sm:$0xff] %v870_v63  ;;  %v840_v3 = vmax.f32 %v776_v0, 0.0 }
  0xef   : > { %935 = vst [vmem:[%s1701_s11 + $0x168] sm:$0xff] %v871_v1  ;;  %v841_v4 = vmax.f32 %v777_v2, 0.0  ;;  %v586_v5 = vpop.f32.mrf.mxu2 }
  0xf0   : > { %904 = vst [vmem:[%s1701_s11 + $0x70] sm:$0xff] %v840_v3  ;;  %v587_v7 = vadd.f32 %v586_v5, %v1690_v41  ;;  %v675_v8 = vpop.f32.mrf.mxu3 }
  0xf1   : > { %905 = vst [vmem:[%s1701_s11 + $0x78] sm:$0xff] %v841_v4  ;;  %v676_v10 = vadd.f32 %v675_v8, %v1692_v42  ;;  %v549_v11 = vpop.f32.mrf.mxu0  ;;  %v750_v4 = vld [vmem:[%s1573_s25 + $0x1a0] sm:$0xff] }
  0xf2   : > { %v808_v13 = vadd.f32 %v744_v6, %v587_v7  ;;  %v550_v14 = vadd.f32 %v549_v11, %v1690_v41  ;;  %v638_v15 = vpop.f32.mrf.mxu1  ;;  %v751_v7 = vld [vmem:[%s1573_s25 + $0x1a8] sm:$0xff] }
  0xf3   : > { %v809_v17 = vadd.f32 %v745_v9, %v676_v10  ;;  %v639_v18 = vadd.f32 %v638_v15, %v1692_v42  ;;  %v720_v10 = vld [vmem:[%s1573_s25 + $0xb0] sm:$0xff] }
  0xf4   : > { %v872_v19 = vmax.f32 %v808_v13, 0.0  ;;  %v778_v20 = vadd.f32 %v714_v12, %v550_v14  ;;  %v721_v14 = vld [vmem:[%s1573_s25 + $0xb8] sm:$0xff] }
  0xf5   : > { %v873_v21 = vmax.f32 %v809_v17, 0.0  ;;  %v779_v22 = vadd.f32 %v715_v16, %v639_v18 }
  0xf6   : > { %936 = vst [vmem:[%s1701_s11 + $0x170] sm:$0xff] %v872_v19  ;;  %v842_v23 = vmax.f32 %v778_v20, 0.0 }
  0xf7   : > { %937 = vst [vmem:[%s1701_s11 + $0x178] sm:$0xff] %v873_v21  ;;  %v843_v24 = vmax.f32 %v779_v22, 0.0  ;;  %v589_v25 = vpop.f32.mrf.mxu2 }
  0xf8   : > { %906 = vst [vmem:[%s1701_s11 + $0x80] sm:$0xff] %v842_v23  ;;  %v590_v27 = vadd.f32 %v589_v25, %v1690_v41  ;;  %v678_v28 = vpop.f32.mrf.mxu3 }
  0xf9   : > { %907 = vst [vmem:[%s1701_s11 + $0x88] sm:$0xff] %v843_v24  ;;  %v679_v30 = vadd.f32 %v678_v28, %v1692_v42  ;;  %v551_v31 = vpop.f32.mrf.mxu0  ;;  %v752_v24 = vld [vmem:[%s1573_s25 + $0x1b0] sm:$0xff] }
  0xfa   : > { %v810_v33 = vadd.f32 %v746_v26, %v590_v27  ;;  %v552_v34 = vadd.f32 %v551_v31, %v1690_v41  ;;  %v640_v35 = vpop.f32.mrf.mxu1  ;;  %v753_v27 = vld [vmem:[%s1573_s25 + $0x1b8] sm:$0xff] }
  0xfb   : > { %v811_v37 = vadd.f32 %v747_v29, %v679_v30  ;;  %v641_v38 = vadd.f32 %v640_v35, %v1692_v42  ;;  %v722_v30 = vld [vmem:[%s1573_s25 + $0xc0] sm:$0xff] }
  0xfc   : > { %v874_v39 = vmax.f32 %v810_v33, 0.0  ;;  %v780_v40 = vadd.f32 %v716_v32, %v552_v34  ;;  %v723_v34 = vld [vmem:[%s1573_s25 + $0xc8] sm:$0xff] }
  0xfd   : > { %v875_v43 = vmax.f32 %v811_v37, 0.0  ;;  %v781_v44 = vadd.f32 %v717_v36, %v641_v38 }
  0xfe   : > { %938 = vst [vmem:[%s1701_s11 + $0x180] sm:$0xff] %v874_v39  ;;  %v844_v45 = vmax.f32 %v780_v40, 0.0 }
  0xff   : > { %939 = vst [vmem:[%s1701_s11 + $0x188] sm:$0xff] %v875_v43  ;;  %v845_v46 = vmax.f32 %v781_v44, 0.0  ;;  %v591_v47 = vpop.f32.mrf.mxu2 }
 0x100   : > { %908 = vst [vmem:[%s1701_s11 + $0x90] sm:$0xff] %v844_v45  ;;  %v592_v49 = vadd.f32 %v591_v47, %v1690_v41  ;;  %v680_v50 = vpop.f32.mrf.mxu3 }
 0x101   : > { %909 = vst [vmem:[%s1701_s11 + $0x98] sm:$0xff] %v845_v46  ;;  %v681_v52 = vadd.f32 %v680_v50, %v1692_v42  ;;  %v554_v53 = vpop.f32.mrf.mxu0  ;;  %v754_v46 = vld [vmem:[%s1573_s25 + $0x1c0] sm:$0xff] }
 0x102   : > { %v812_v55 = vadd.f32 %v748_v48, %v592_v49  ;;  %v555_v56 = vadd.f32 %v554_v53, %v1690_v41  ;;  %v643_v57 = vpop.f32.mrf.mxu1  ;;  %v755_v49 = vld [vmem:[%s1573_s25 + $0x1c8] sm:$0xff] }
 0x103   : > { %v813_v59 = vadd.f32 %v749_v51, %v681_v52  ;;  %v644_v60 = vadd.f32 %v643_v57, %v1692_v42  ;;  %v724_v52 = vld [vmem:[%s1573_s25 + $0xd0] sm:$0xff] }
 0x104   : > { %v876_v61 = vmax.f32 %v812_v55, 0.0  ;;  %v782_v62 = vadd.f32 %v718_v54, %v555_v56  ;;  %v725_v56 = vld [vmem:[%s1573_s25 + $0xd8] sm:$0xff] }
 0x105   : > { %v877_v63 = vmax.f32 %v813_v59, 0.0  ;;  %v783_v0 = vadd.f32 %v719_v58, %v644_v60 }
 0x106   : > { %940 = vst [vmem:[%s1701_s11 + $0x190] sm:$0xff] %v876_v61  ;;  %v846_v1 = vmax.f32 %v782_v62, 0.0 }
 0x107   : > { %941 = vst [vmem:[%s1701_s11 + $0x198] sm:$0xff] %v877_v63  ;;  %v847_v2 = vmax.f32 %v783_v0, 0.0  ;;  %v594_v3 = vpop.f32.mrf.mxu2 }
 0x108   : > { %910 = vst [vmem:[%s1701_s11 + $0xa0] sm:$0xff] %v846_v1  ;;  %v595_v5 = vadd.f32 %v594_v3, %v1690_v41  ;;  %v683_v6 = vpop.f32.mrf.mxu3 }
 0x109   : > { %911 = vst [vmem:[%s1701_s11 + $0xa8] sm:$0xff] %v847_v2  ;;  %v684_v8 = vadd.f32 %v683_v6, %v1692_v42  ;;  %v556_v9 = vpop.f32.mrf.mxu0  ;;  %v756_v2 = vld [vmem:[%s1573_s25 + $0x1d0] sm:$0xff] }
 0x10a   : > { %v814_v11 = vadd.f32 %v750_v4, %v595_v5  ;;  %v557_v12 = vadd.f32 %v556_v9, %v1690_v41  ;;  %v645_v13 = vpop.f32.mrf.mxu1  ;;  %v757_v5 = vld [vmem:[%s1573_s25 + $0x1d8] sm:$0xff] }
 0x10b   : > { %v815_v15 = vadd.f32 %v751_v7, %v684_v8  ;;  %v646_v16 = vadd.f32 %v645_v13, %v1692_v42  ;;  %v726_v8 = vld [vmem:[%s1573_s25 + $0xe0] sm:$0xff] }
 0x10c   : > { %v878_v17 = vmax.f32 %v814_v11, 0.0  ;;  %v784_v18 = vadd.f32 %v720_v10, %v557_v12  ;;  %v727_v12 = vld [vmem:[%s1573_s25 + $0xe8] sm:$0xff] }
 0x10d   : > { %v879_v19 = vmax.f32 %v815_v15, 0.0  ;;  %v785_v20 = vadd.f32 %v721_v14, %v646_v16 }
 0x10e   : > { %942 = vst [vmem:[%s1701_s11 + $0x1a0] sm:$0xff] %v878_v17  ;;  %v848_v21 = vmax.f32 %v784_v18, 0.0 }
 0x10f   : > { %943 = vst [vmem:[%s1701_s11 + $0x1a8] sm:$0xff] %v879_v19  ;;  %v849_v22 = vmax.f32 %v785_v20, 0.0  ;;  %v596_v23 = vpop.f32.mrf.mxu2 }
 0x110   : > { %912 = vst [vmem:[%s1701_s11 + $0xb0] sm:$0xff] %v848_v21  ;;  %v597_v25 = vadd.f32 %v596_v23, %v1690_v41  ;;  %v685_v26 = vpop.f32.mrf.mxu3 }
 0x111   : > { %913 = vst [vmem:[%s1701_s11 + $0xb8] sm:$0xff] %v849_v22  ;;  %v686_v28 = vadd.f32 %v685_v26, %v1692_v42  ;;  %v559_v29 = vpop.f32.mrf.mxu0  ;;  %v758_v22 = vld [vmem:[%s1573_s25 + $0x1e0] sm:$0xff] }
 0x112   : > { %v816_v31 = vadd.f32 %v752_v24, %v597_v25  ;;  %v560_v32 = vadd.f32 %v559_v29, %v1690_v41  ;;  %v648_v33 = vpop.f32.mrf.mxu1  ;;  %v759_v25 = vld [vmem:[%s1573_s25 + $0x1e8] sm:$0xff] }
 0x113   : > { %v817_v35 = vadd.f32 %v753_v27, %v686_v28  ;;  %v649_v36 = vadd.f32 %v648_v33, %v1692_v42  ;;  %v728_v28 = vld [vmem:[%s1573_s25 + $0xf0] sm:$0xff] }
 0x114   : > { %v880_v37 = vmax.f32 %v816_v31, 0.0  ;;  %v786_v38 = vadd.f32 %v722_v30, %v560_v32  ;;  %v729_v32 = vld [vmem:[%s1573_s25 + $0xf8] sm:$0xff] }
 0x115   : > { %v881_v39 = vmax.f32 %v817_v35, 0.0  ;;  %v787_v40 = vadd.f32 %v723_v34, %v649_v36 }
 0x116   : > { %944 = vst [vmem:[%s1701_s11 + $0x1b0] sm:$0xff] %v880_v37  ;;  %v850_v43 = vmax.f32 %v786_v38, 0.0 }
 0x117   : > { %945 = vst [vmem:[%s1701_s11 + $0x1b8] sm:$0xff] %v881_v39  ;;  %v851_v44 = vmax.f32 %v787_v40, 0.0  ;;  %v599_v45 = vpop.f32.mrf.mxu2 }
 0x118   : > { %914 = vst [vmem:[%s1701_s11 + $0xc0] sm:$0xff] %v850_v43  ;;  %v600_v47 = vadd.f32 %v599_v45, %v1690_v41  ;;  %v688_v48 = vpop.f32.mrf.mxu3 }
 0x119   : > { %915 = vst [vmem:[%s1701_s11 + $0xc8] sm:$0xff] %v851_v44  ;;  %v689_v50 = vadd.f32 %v688_v48, %v1692_v42  ;;  %v561_v51 = vpop.f32.mrf.mxu0  ;;  %v760_v44 = vld [vmem:[%s1573_s25 + $0x1f0] sm:$0xff] }
 0x11a   : > { %v818_v53 = vadd.f32 %v754_v46, %v600_v47  ;;  %v562_v54 = vadd.f32 %v561_v51, %v1690_v41  ;;  %v650_v55 = vpop.f32.mrf.mxu1  ;;  %v761_v47 = vld [vmem:[%s1573_s25 + $0x1f8] sm:$0xff] }
 0x11b   : > { %v819_v57 = vadd.f32 %v755_v49, %v689_v50  ;;  %v651_v58 = vadd.f32 %v650_v55, %v1692_v42 }
 0x11c   : > { %v882_v59 = vmax.f32 %v818_v53, 0.0  ;;  %v788_v60 = vadd.f32 %v724_v52, %v562_v54 }
 0x11d   : > { %v883_v61 = vmax.f32 %v819_v57, 0.0  ;;  %v789_v62 = vadd.f32 %v725_v56, %v651_v58 }
 0x11e   : > { %946 = vst [vmem:[%s1701_s11 + $0x1c0] sm:$0xff] %v882_v59  ;;  %v852_v63 = vmax.f32 %v788_v60, 0.0 }
 0x11f   : > { %947 = vst [vmem:[%s1701_s11 + $0x1c8] sm:$0xff] %v883_v61  ;;  %v853_v0 = vmax.f32 %v789_v62, 0.0  ;;  %v601_v1 = vpop.f32.mrf.mxu2 }
 0x120   : > { %916 = vst [vmem:[%s1701_s11 + $0xd0] sm:$0xff] %v852_v63  ;;  %v602_v3 = vadd.f32 %v601_v1, %v1690_v41  ;;  %v690_v4 = vpop.f32.mrf.mxu3 }
 0x121   : > { %917 = vst [vmem:[%s1701_s11 + $0xd8] sm:$0xff] %v853_v0  ;;  %v691_v6 = vadd.f32 %v690_v4, %v1692_v42  ;;  %v564_v7 = vpop.f32.mrf.mxu0 }
 0x122   : > { %v820_v9 = vadd.f32 %v756_v2, %v602_v3  ;;  %v565_v10 = vadd.f32 %v564_v7, %v1690_v41  ;;  %v653_v11 = vpop.f32.mrf.mxu1 }
 0x123   : > { %v821_v13 = vadd.f32 %v757_v5, %v691_v6  ;;  %v654_v14 = vadd.f32 %v653_v11, %v1692_v42 }
 0x124   : > { %v884_v15 = vmax.f32 %v820_v9, 0.0  ;;  %v790_v16 = vadd.f32 %v726_v8, %v565_v10 }
 0x125   : > { %v885_v17 = vmax.f32 %v821_v13, 0.0  ;;  %v791_v18 = vadd.f32 %v727_v12, %v654_v14 }
 0x126   : > { %948 = vst [vmem:[%s1701_s11 + $0x1d0] sm:$0xff] %v884_v15  ;;  %v854_v19 = vmax.f32 %v790_v16, 0.0 }
 0x127   : > { %949 = vst [vmem:[%s1701_s11 + $0x1d8] sm:$0xff] %v885_v17  ;;  %v855_v20 = vmax.f32 %v791_v18, 0.0  ;;  %v604_v21 = vpop.f32.mrf.mxu2 }
 0x128   : > { %918 = vst [vmem:[%s1701_s11 + $0xe0] sm:$0xff] %v854_v19  ;;  %v605_v23 = vadd.f32 %v604_v21, %v1690_v41  ;;  %v693_v24 = vpop.f32.mrf.mxu3 }
 0x129   : > { %919 = vst [vmem:[%s1701_s11 + $0xe8] sm:$0xff] %v855_v20  ;;  %v694_v26 = vadd.f32 %v693_v24, %v1692_v42  ;;  %v566_v27 = vpop.f32.mrf.mxu0 }
 0x12a   : > { %v822_v29 = vadd.f32 %v758_v22, %v605_v23  ;;  %v567_v30 = vadd.f32 %v566_v27, %v1690_v41  ;;  %v655_v31 = vpop.f32.mrf.mxu1 }
 0x12b   : > { %v823_v33 = vadd.f32 %v759_v25, %v694_v26  ;;  %v656_v34 = vadd.f32 %v655_v31, %v1692_v42 }
 0x12c   : > { %v886_v35 = vmax.f32 %v822_v29, 0.0  ;;  %v792_v36 = vadd.f32 %v728_v28, %v567_v30 }
 0x12d   : > { %v887_v37 = vmax.f32 %v823_v33, 0.0  ;;  %v793_v38 = vadd.f32 %v729_v32, %v656_v34 }
 0x12e   : > { %950 = vst [vmem:[%s1701_s11 + $0x1e0] sm:$0xff] %v886_v35  ;;  %v856_v39 = vmax.f32 %v792_v36, 0.0 }
 0x12f   : > { %951 = vst [vmem:[%s1701_s11 + $0x1e8] sm:$0xff] %v887_v37  ;;  %v857_v40 = vmax.f32 %v793_v38, 0.0  ;;  %v606_v43 = vpop.f32.mrf.mxu2 }
 0x130   : > { %920 = vst [vmem:[%s1701_s11 + $0xf0] sm:$0xff] %v856_v39  ;;  %v607_v45 = vadd.f32 %v606_v43, %v1690_v41  ;;  %v695_v46 = vpop.f32.mrf.mxu3 }
 0x131   : > { %921 = vst [vmem:[%s1701_s11 + $0xf8] sm:$0xff] %v857_v40  ;;  %v696_v48 = vadd.f32 %v695_v46, %v1692_v42 }
 0x132   : > { %v824_v49 = vadd.f32 %v760_v44, %v607_v45 }
 0x133   : > { %v825_v50 = vadd.f32 %v761_v47, %v696_v48 }
 0x134   : > { %v888_v51 = vmax.f32 %v824_v49, 0.0 }
 0x135   : > { %v889_v52 = vmax.f32 %v825_v50, 0.0 }
 0x136   : > { %952 = vst [vmem:[%s1701_s11 + $0x1f0] sm:$0xff] %v888_v51 }
 0x137   : > { %953 = vst [vmem:[%s1701_s11 + $0x1f8] sm:$0xff] %v889_v52 }
 0x138   : > { %1407 = shalt.err (!%p1404_p0)
}
 0x139   : > { %s1466_s24 = smov 256   ;;  %s1467_s10 = smov 16  }
 0x13a   : > { %1286 = dma.vmem_to_hbm [thread:$0]  (%p1544_p9), %s971_s18, 8192, %s973_s27, %s955_s14, %s1466_s24, %s1466_s24, %s1467_s10  }
 0x13b PF: > { %s987_s11 = sand.u32 1, %s1442_s15   ;;  %p1293_p1 = pnand %p1104_p12, %p1551_p11 }
 0x13c   : > { %s988_s26 = scalar_lea.sflag [#allocation4], %s987_s11 }
 0x13d   : > { %p1294_p2 = pneg %p1293_p1 }
 0x13f   : > { %1437 = dma.done.wait (%p1294_p2), %s988_s26, 8192  }
 0x140   : > { %1439 = vsyncadd (%p1294_p2), %s988_s26, 4294959104  ;;  %s20_s20 = sadd.s32 1, %s1462_s20   ;;  %s1939_s15 = smov %s1446_s16 }
 0x141   : > { %p17_p3 = scmp.ge.s32.totalorder %s20_s20, 4   ;;  %s1940_s16 = smov %s1450_s17 }
 0x142   : > { %s1941_s17 = smov %s1549_s29  ;;  %s1942_s18 = smov %s1458_s19 }
 0x143   : > { %s1943_s19 = smov %s1945_s23  ;;  %19 = sbr.rel (!%p17_p3) target bundleno = 6 (0x6), region = 90 }
 0x148   :  { %994 = vsyncpa [#allocation3], 1 }
 0x149   :  { %996 = vsyncpa [#allocation3 + $0x1], 1 }
 0x14a   :  { %997 = vsyncpa [#allocation4], 1 }
 0x14b   :  { %999 = vsyncpa [#allocation4 + $0x1], 1 }

// kernel: bottleneck_forward.4
= control target key start
LH: loop header
LB: loop body
LE: loop exit
PB: predicated region body
PF: predicated region fallthrough
CT: control target
= control target key end

     0   :  { %s5639_s12 = smov 0   ;;  %s5641_s13 = smov 0   ;;  %s7139_s0 = inlined_call_operand.vmem [shape: bf16[2,18,18,64], index: 0, kind: input, shape index: {}]   ;;  %s7140_s1 = inlined_call_operand.vmem [shape: bf16[9,64,64], index: 1, kind: input, shape index: {}]   ;;  %s7141_s2 = inlined_call_operand.vmem [shape: f32[1,64], index: 2, kind: input, shape index: {}]   ;;  %s7142_s3 = inlined_call_operand.vmem [shape: bf16[2,16,16,64], index: 3, kind: output, shape index: {}]  }
   0x1   :  { %s5643_s14 = smov 0  }
   0x2 LB: > { %s22_s15 = sadd.s32 1, %s5613_s13  ;;  %p4629_p0 = scmp.ge.s32.totalorder %s5617_s14, 1  ;;  %s5617_s14 = sphi %s5643_s14, %s13_s14   ;;  %s5613_s13 = sphi %s5641_s13, %s7154_s13   ;;  %s5609_s12 = sphi %s5639_s12, %s7153_s12  }
   0x3   : > { %p23_p1 = scmp.ge.s32.totalorder %s22_s15, 2  ;;  %p168_p2 = scmp.lt.s32.totalorder %s5617_s14, 3 }
   0x5   : > { %s7156_s15 = smov (%p23_p1, %s22_s15), 0  ;;  %p169_p3 = pnand %p4629_p0, %p168_p2 }
   0x7   : > { %172 = sbr.rel (%p169_p3) target bundleno = 761 (0x2f9), region = 32 }
   0xc   : > { %v5443_v0 = vld [vmem:[%s7140_s1 + $0x38] sm:$0xff]  ;;  %p202_p4 = scmp.lt.s32.totalorder %s5609_s12, 1  ;;  %v5442_v1 = vld [vmem:[%s7140_s1 + $0x30] sm:$0xff]  ;;  %v5441_v2 = vld [vmem:[%s7140_s1 + $0x28] sm:$0xff]  ;;  %vm279_vm0 = vsmask.f32 3328 }
   0xd   : > { %5504 = vmatpush.bf16.msra.mxu1 %v5443_v0  ;;  %5505 = vmatpush.bf16.msra.mxu2 %v5443_v0  ;;  %vm280_vm1 = vsmask.f32 7440  ;;  %v5440_v6 = vld [vmem:[%s7140_s1 + $0x20] sm:$0xff]  ;;  %v5447_v30 = vld [vmem:[%s7140_s1 + $0x58] sm:$0xff]  ;;  %vm747_vm3 = vcmask 523264   ;;  %vm1174_vm4 = vcmask 1042432  }
   0xe   : > { %s7158_s12 = smov (!%p202_p4, %s5609_s12), 1  ;;  %5506 = vmatpush.bf16.msra.mxu3 %v5443_v0  ;;  %800 = vmatpush.bf16.msra.mxu0 %v5443_v0  ;;  %v5467_v31 = vld [vmem:[%s7140_s1 + $0x78] sm:$0xff]  ;;  %vm5693_vm2 = vmor %vm279_vm0, %vm280_vm1  ;;  %vm1175_vm5 = vcmask 1046532   ;;  %vm4485_vm7 = vcmask 519168  }
   0xf   : > { %s5516_s20 = smul.u32 216, %s7158_s12  ;;  %v5439_v36 = vld [vmem:[%s7140_s1 + $0x18] sm:$0xff]  ;;  %vm5911_vm6 = vmor %vm1174_vm4, %vm1175_vm5  ;;  %s5419_s28 = sshll.u32 %s7158_s12, 7 }
  0x10   : > { %v5471_v37 = vld [vmem:[%s7140_s1 + $0x98] sm:$0xff]  ;;  %s6795_s4 = scalar_lea.vmem %s7142_s3, %s5419_s28 }
  0x11   : > { %5507 = vmatpush.bf16.msra.mxu1 %v5442_v1  ;;  %5508 = vmatpush.bf16.msra.mxu2 %v5442_v1  ;;  %s5672_s25 = scalar_lea.vmem %s7139_s0, %s5516_s20 }
  0x12   : > { %5509 = vmatpush.bf16.msra.mxu3 %v5442_v1  ;;  %801 = vmatpush.bf16.msra.mxu0 %v5442_v1  ;;  %v231_v3 = vld [vmem:[%s5672_s25 + $0x30] sm:$0xf]  ;;  %v232_v4 = vld [vmem:[%s5672_s25 + $0x34] sm:$0xf]  ;;  %v267_v5 = vld [vmem:[%s5672_s25 + $0x38] sm:$0x1] }
  0x13   : > { %v379_v7 = vshrl.u32 %v231_v3, 16  ;;  %v382_v8 = vshll.u32 %v231_v3, 16  ;;  %v388_v9 = vshll.u32 %v232_v4, 16  ;;  %v392_v10 = vshrl.u32 %v232_v4, 16  ;;  %v239_v11 = vld [vmem:[%s5672_s25 + $0x60] sm:$0xf] }
  0x14   : > { %v398_v12 = vshll.u32 %v267_v5, 16  ;;  %v240_v13 = vld [vmem:[%s5672_s25 + $0x64] sm:$0xf]  ;;  %v271_v14 = vld [vmem:[%s5672_s25 + $0x68] sm:$0x1]  ;;  %v475_v15 = vshrl.u32 %v239_v11, 16 }
  0x15   : > { %5510 = vmatpush.bf16.msra.mxu1 %v5441_v2  ;;  %5511 = vmatpush.bf16.msra.mxu2 %v5441_v2  ;;  %v381_v16 = vrot.slane %v379_v7, 4  ;;  %v384_v17 = vrot.slane %v382_v8, 5  ;;  %v390_v18 = vrot.slane %v388_v9, 5  ;;  %v394_v19 = vrot.slane %v392_v10, 4  ;;  %v247_v20 = vld [vmem:[%s5672_s25 + $0x90] sm:$0xf] }
  0x16   : > { %5512 = vmatpush.bf16.msra.mxu3 %v5441_v2  ;;  %802 = vmatpush.bf16.msra.mxu0 %v5441_v2  ;;  %v400_v21 = vrot.slane %v398_v12, 5  ;;  %v477_v22 = vrot.slane %v475_v15, 4  ;;  %v478_v23 = vshll.u32 %v239_v11, 16  ;;  %v484_v24 = vshll.u32 %v240_v13, 16  ;;  %v248_v29 = vld [vmem:[%s5672_s25 + $0x94] sm:$0xf] }
  0x17   : > { %v385_v25 = vor.u32 %v384_v17, %v381_v16  ;;  %v395_v26 = vor.u32 %v394_v19, %v390_v18  ;;  %v488_v27 = vshrl.u32 %v240_v13, 16  ;;  %v494_v28 = vshll.u32 %v271_v14, 16  ;;  %v275_v43 = vld [vmem:[%s5672_s25 + $0x98] sm:$0x1]  ;;  %v223_v59 = vld [vmem:[%s5672_s25] sm:$0xf] }
  0x18   : > { %v480_v33 = vrot.slane %v478_v23, 5  ;;  %v486_v34 = vrot.slane %v484_v24, 5  ;;  %v571_v35 = vshrl.u32 %v247_v20, 16  ;;  %v574_v45 = vshll.u32 %v247_v20, 16  ;;  %v5712_v63 = vld [vmem:[%s5672_s25 + $0x4] sm:$0xf] }
  0x19   : > { %5513 = vmatpush.bf16.msra.mxu1 %v5440_v6  ;;  %5514 = vmatpush.bf16.msra.mxu2 %v5440_v6  ;;  %v386_v38 = vrot.slane %v385_v25, 4  ;;  %v396_v39 = vrot.slane %v395_v26, 4  ;;  %v490_v40 = vrot.slane %v488_v27, 4  ;;  %v496_v41 = vrot.slane %v494_v28, 5  ;;  %v5715_v0 = vld [vmem:[%s5672_s25 + $0x8] sm:$0x1] }
  0x1a   : > { %5515 = vmatpush.bf16.msra.mxu3 %v5440_v6  ;;  %803 = vmatpush.bf16.msra.mxu0 %v5440_v6  ;;  %v481_v42 = vor.u32 %v480_v33, %v477_v22  ;;  %v573_v44 = vrot.slane %v571_v35, 4  ;;  %v580_v46 = vshll.u32 %v248_v29, 16  ;;  %v584_v50 = vshrl.u32 %v248_v29, 16  ;;  %v5446_v1 = vld [vmem:[%s7140_s1 + $0x50] sm:$0xff]  ;;  %v233_v10 = vld [vmem:[%s5672_s25 + $0x3c] sm:$0xf] }
  0x1b   : > { %v391_v47 = vsel %vm5693_vm2, %v386_v38, %v390_v18  ;;  %v401_v48 = vsel %vm5693_vm2, %v396_v39, %v400_v21  ;;  %v491_v49 = vor.u32 %v490_v40, %v486_v34  ;;  %v576_v54 = vrot.slane %v574_v45, 5  ;;  %v234_v15 = vld [vmem:[%s5672_s25 + $0x40] sm:$0xf]  ;;  %v5466_v20 = vld [vmem:[%s7140_s1 + $0x70] sm:$0xff]  ;;  %v268_v27 = vld [vmem:[%s5672_s25 + $0x44] sm:$0x1] }
  0x1c   : > { %v683_v51 = vunpack.c.l.b16 %v391_v47  ;;  %v684_v52 = vunpack.c.l.b16 %v401_v48  ;;  %v482_v53 = vrot.slane %v481_v42, 4  ;;  %v582_v56 = vrot.slane %v580_v46, 5  ;;  %v5438_v21 = vld [vmem:[%s7140_s1 + $0x10] sm:$0xff] }
  0x1d   : > { %1422 = vmatpush.bf16.msrb.mxu2 %v5447_v30  ;;  %1041 = vmatpush.bf16.msrb.mxu1 %v5439_v36  ;;  %v492_v55 = vrot.slane %v491_v49, 4  ;;  %v586_v57 = vrot.slane %v584_v50, 4  ;;  %v590_v58 = vshll.u32 %v275_v43, 16  ;;  %v577_v62 = vor.u32 %v576_v54, %v573_v44  ;;  %v5470_v22 = vld [vmem:[%s7140_s1 + $0x90] sm:$0xff]  ;;  %v241_v36 = vld [vmem:[%s5672_s25 + $0x6c] sm:$0xf] }
  0x1e   : > { %1737 = vmatpush.bf16.msrb.mxu3 %v5467_v31  ;;  %2419 = vmatpush.bf16.msrb.mxu0 %v5471_v37  ;;  %v711_v60 = vpack.c.b16 %v684_v52, %v683_v51  ;;  %v487_v61 = vsel %vm5693_vm2, %v482_v53, %v486_v34  ;;  %v283_v8 = vshrl.u32 %v223_v59, 16  ;;  %v286_v9 = vshll.u32 %v223_v59, 16  ;;  %v242_v45 = vld [vmem:[%s5672_s25 + $0x70] sm:$0xf]  ;;  %v272_v49 = vld [vmem:[%s5672_s25 + $0x74] sm:$0x1] }
  0x1f   : > { %v497_v2 = vsel %vm5693_vm2, %v492_v55, %v496_v41  ;;  %v691_v3 = vunpack.c.l.b16 %v487_v61  ;;  %v587_v4 = vor.u32 %v586_v57, %v582_v56  ;;  %v592_v5 = vrot.slane %v590_v58, 5 }
  0x20   : > { %4661 = vmatmul.msk.bf16.vlgmr.msra.gmra.mxu1 %vm747_vm3, %v711_v60  ;;  %v692_v6 = vunpack.c.l.b16 %v497_v2  ;;  %v578_v7 = vrot.slane %v577_v62, 4  ;;  %v292_v12 = vshll.u32 %v5712_v63, 16  ;;  %v296_v13 = vshrl.u32 %v5712_v63, 16 }
  0x21   : > { %1423 = vmatpush.bf16.msrb.mxu2 %v5446_v1  ;;  %v588_v11 = vrot.slane %v587_v4, 4  ;;  %v302_v14 = vshll.u32 %v5715_v0, 16  ;;  %v285_v18 = vrot.slane %v283_v8, 4  ;;  %v288_v19 = vrot.slane %v286_v9, 5  ;;  %1042 = vmatpush.bf16.msrb.mxu1 %v5438_v21  ;;  %v249_v1 = vld [vmem:[%s5672_s25 + $0x9c] sm:$0xf] }
  0x22   : > { %v715_v16 = vpack.c.b16 %v692_v6, %v691_v3  ;;  %v583_v17 = vsel %vm5693_vm2, %v578_v7, %v582_v56  ;;  %v294_v25 = vrot.slane %v292_v12, 5  ;;  %v298_v26 = vrot.slane %v296_v13, 4  ;;  %1738 = vmatpush.bf16.msrb.mxu3 %v5466_v20  ;;  %2420 = vmatpush.bf16.msrb.mxu0 %v5470_v22 }
  0x23   : > { %v593_v23 = vsel %vm5693_vm2, %v588_v11, %v592_v5  ;;  %v699_v24 = vunpack.c.l.b16 %v583_v17  ;;  %v289_v29 = vor.u32 %v288_v19, %v285_v18  ;;  %v304_v30 = vrot.slane %v302_v14, 5  ;;  %v250_v5 = vld [vmem:[%s5672_s25 + $0xa0] sm:$0xf]  ;;  %v225_v19 = vld [vmem:[%s5672_s25 + $0xc] sm:$0xf] }
  0x24   : > { %4665 = vmatmul.msk.bf16.vlgmr.msra.gmra.mxu2 %vm747_vm3, %v715_v16  ;;  %v700_v28 = vunpack.c.l.b16 %v593_v23  ;;  %v299_v31 = vor.u32 %v298_v26, %v294_v25  ;;  %v403_v33 = vshrl.u32 %v233_v10, 16  ;;  %v406_v34 = vshll.u32 %v233_v10, 16  ;;  %v276_v10 = vld [vmem:[%s5672_s25 + $0xa4] sm:$0x1] }
  0x25   : > { %v412_v35 = vshll.u32 %v234_v15, 16  ;;  %v290_v38 = vrot.slane %v289_v29, 4  ;;  %v416_v39 = vshrl.u32 %v234_v15, 16  ;;  %v422_v40 = vshll.u32 %v268_v27, 16  ;;  %v5766_v29 = vld [vmem:[%s5672_s25 + $0x10] sm:$0xf] }
  0x26   : > { %v719_v37 = vpack.c.b16 %v700_v28, %v699_v24  ;;  %v300_v41 = vrot.slane %v299_v31, 4  ;;  %v405_v42 = vrot.slane %v403_v33, 4  ;;  %v408_v43 = vrot.slane %v406_v34, 5  ;;  %v5445_v24 = vld [vmem:[%s7140_s1 + $0x48] sm:$0xff]  ;;  %v5769_v34 = vld [vmem:[%s5672_s25 + $0x14] sm:$0x1] }
  0x27   : > { %v414_v44 = vrot.slane %v412_v35, 5  ;;  %v295_v46 = vsel %vm5693_vm2, %v290_v38, %v294_v25  ;;  %v418_v47 = vrot.slane %v416_v39, 4  ;;  %v424_v48 = vrot.slane %v422_v40, 5  ;;  %1424 = vmatpush.bf16.msrb.mxu2 %v5445_v24 }
  0x28   : > { %4669 = vmatmul.msk.bf16.vlgmr.msra.gmra.mxu3 %vm747_vm3, %v719_v37  ;;  %v499_v50 = vshrl.u32 %v241_v36, 16  ;;  %v305_v51 = vsel %vm5693_vm2, %v300_v41, %v304_v30  ;;  %v675_v52 = vunpack.c.l.b16 %v295_v46  ;;  %v409_v53 = vor.u32 %v408_v43, %v405_v42  ;;  %v235_v43 = vld [vmem:[%s5672_s25 + $0x48] sm:$0xf] }
  0x29   : > { %v502_v54 = vshll.u32 %v241_v36, 16  ;;  %v676_v55 = vunpack.c.l.b16 %v305_v51  ;;  %v419_v56 = vor.u32 %v418_v47, %v414_v44  ;;  %v508_v58 = vshll.u32 %v242_v45, 16 }
  0x2a   : > { %v501_v57 = vrot.slane %v499_v50, 4  ;;  %v410_v59 = vrot.slane %v409_v53, 4  ;;  %v512_v61 = vshrl.u32 %v242_v45, 16  ;;  %v518_v62 = vshll.u32 %v272_v49, 16  ;;  %v5465_v49 = vld [vmem:[%s7140_s1 + $0x68] sm:$0xff] }
  0x2b   : > { %v504_v60 = vrot.slane %v502_v54, 5  ;;  %v707_v2 = vpack.c.b16 %v676_v55, %v675_v52  ;;  %v420_v3 = vrot.slane %v419_v56, 4  ;;  %v510_v4 = vrot.slane %v508_v58, 5  ;;  %v5437_v50 = vld [vmem:[%s7140_s1 + $0x8] sm:$0xff]  ;;  %1739 = vmatpush.bf16.msrb.mxu3 %v5465_v49 }
  0x2c   : > { %v415_v6 = vsel %vm5693_vm2, %v410_v59, %v414_v44  ;;  %v514_v8 = vrot.slane %v512_v61, 4  ;;  %v520_v9 = vrot.slane %v518_v62, 5  ;;  %v595_v13 = vshrl.u32 %v249_v1, 16  ;;  %v5777_v44 = vld [vmem:[%s5672_s25 + $0x4c] sm:$0xf]  ;;  %1043 = vmatpush.bf16.msrb.mxu1 %v5437_v50 }
  0x2d   : > { %v505_v7 = vor.u32 %v504_v60, %v501_v57  ;;  %4657 = vmatmul.msk.bf16.vlgmr.msra.gmra.mxu0 %vm747_vm3, %v707_v2  ;;  %v425_v11 = vsel %vm5693_vm2, %v420_v3, %v424_v48  ;;  %v685_v12 = vunpack.c.l.b16 %v415_v6  ;;  %v598_v14 = vshll.u32 %v249_v1, 16  ;;  %v5469_v55 = vld [vmem:[%s7140_s1 + $0x88] sm:$0xff]  ;;  %v5793_v60 = vld [vmem:[%s5672_s25 + $0x50] sm:$0x1] }
  0x2e   : > { %v686_v15 = vunpack.c.l.b16 %v425_v11  ;;  %v515_v17 = vor.u32 %v514_v8, %v510_v4  ;;  %v604_v18 = vshll.u32 %v250_v5, 16  ;;  %v597_v20 = vrot.slane %v595_v13, 4  ;;  %2421 = vmatpush.bf16.msrb.mxu0 %v5469_v55 }
  0x2f   : > { %v506_v16 = vrot.slane %v505_v7, 4  ;;  %v600_v21 = vrot.slane %v598_v14, 5  ;;  %v608_v22 = vshrl.u32 %v250_v5, 16  ;;  %v614_v23 = vshll.u32 %v276_v10, 16  ;;  %v243_v7 = vld [vmem:[%s5672_s25 + $0x78] sm:$0xf] }
  0x30   : > { %v712_v25 = vpack.c.b16 %v686_v15, %v685_v12  ;;  %v516_v27 = vrot.slane %v515_v17, 4  ;;  %v606_v28 = vrot.slane %v604_v18, 5  ;;  %v307_v37 = vshrl.u32 %v225_v19, 16  ;;  %v244_v12 = vld [vmem:[%s5672_s25 + $0x7c] sm:$0xf] }
  0x31   : > { %v511_v26 = vsel %vm5693_vm2, %v506_v16, %v510_v4  ;;  %v601_v31 = vor.u32 %v600_v21, %v597_v20  ;;  %v610_v33 = vrot.slane %v608_v22, 4  ;;  %v616_v36 = vrot.slane %v614_v23, 5  ;;  %v273_v20 = vld [vmem:[%s5672_s25 + $0x80] sm:$0x1] }
  0x32   : > { %v693_v30 = vunpack.c.l.b16 %v511_v26  ;;  %4662 = vmatmul.msk.bf16.gmra.mxu1 %vm747_vm3, %v712_v25  ;;  %v521_v35 = vsel %vm5693_vm2, %v516_v27, %v520_v9  ;;  %v310_v38 = vshll.u32 %v225_v19, 16  ;;  %v316_v42 = vshll.u32 %v5766_v29, 16 }
  0x33   : > { %v694_v39 = vunpack.c.l.b16 %v521_v35  ;;  %v602_v40 = vrot.slane %v601_v31, 4  ;;  %v611_v41 = vor.u32 %v610_v33, %v606_v28  ;;  %v309_v45 = vrot.slane %v307_v37, 4  ;;  %v251_v37 = vld [vmem:[%s5672_s25 + $0xa8] sm:$0xf] }
  0x34   : > { %v312_v46 = vrot.slane %v310_v38, 5  ;;  %v320_v47 = vshrl.u32 %v5766_v29, 16  ;;  %v326_v48 = vshll.u32 %v5769_v34, 16  ;;  %v318_v54 = vrot.slane %v316_v42, 5  ;;  %v277_v42 = vld [vmem:[%s5672_s25 + $0xb0] sm:$0x1] }
  0x35   : > { %v716_v51 = vpack.c.b16 %v694_v39, %v693_v30  ;;  %v607_v52 = vsel %vm5693_vm2, %v602_v40, %v606_v28  ;;  %v612_v53 = vrot.slane %v611_v41, 4  ;;  %v427_v62 = vshrl.u32 %v235_v43, 16  ;;  %v252_v41 = vld [vmem:[%s5672_s25 + $0xac] sm:$0xf] }
  0x36   : > { %v701_v56 = vunpack.c.l.b16 %v607_v52  ;;  %v313_v57 = vor.u32 %v312_v46, %v309_v45  ;;  %v322_v58 = vrot.slane %v320_v47, 4  ;;  %v328_v59 = vrot.slane %v326_v48, 5 }
  0x37   : > { %4666 = vmatmul.msk.bf16.gmra.mxu2 %vm747_vm3, %v716_v51  ;;  %v617_v61 = vsel %vm5693_vm2, %v612_v53, %v616_v36  ;;  %v430_v1 = vshll.u32 %v235_v43, 16  ;;  %v436_v2 = vshll.u32 %v5777_v44, 16  ;;  %v440_v6 = vshrl.u32 %v5777_v44, 16 }
  0x38   : > { %v702_v3 = vunpack.c.l.b16 %v617_v61  ;;  %v314_v4 = vrot.slane %v313_v57, 4  ;;  %v323_v5 = vor.u32 %v322_v58, %v318_v54  ;;  %v429_v8 = vrot.slane %v427_v62, 4  ;;  %v227_v61 = vld [vmem:[%s5672_s25 + $0x18] sm:$0xf]  ;;  %v5444_v62 = vld [vmem:[%s7140_s1 + $0x40] sm:$0xff] }
  0x39   : > { %v432_v9 = vrot.slane %v430_v1, 5  ;;  %v438_v10 = vrot.slane %v436_v2, 5  ;;  %v446_v11 = vshll.u32 %v5793_v60, 16  ;;  %v442_v16 = vrot.slane %v440_v6, 4  ;;  %1425 = vmatpush.bf16.msrb.mxu2 %v5444_v62 }
  0x3a   : > { %v720_v13 = vpack.c.b16 %v702_v3, %v701_v56  ;;  %v319_v14 = vsel %vm5693_vm2, %v314_v4, %v318_v54  ;;  %v324_v15 = vrot.slane %v323_v5, 4  ;;  %v523_v21 = vshrl.u32 %v243_v7, 16  ;;  %v5824_v4 = vld [vmem:[%s5672_s25 + $0x1c] sm:$0xf]  ;;  %v5827_v5 = vld [vmem:[%s5672_s25 + $0x20] sm:$0x1] }
  0x3b   : > { %v677_v17 = vunpack.c.l.b16 %v319_v14  ;;  %v433_v18 = vor.u32 %v432_v9, %v429_v8  ;;  %v448_v19 = vrot.slane %v446_v11, 5  ;;  %v443_v23 = vor.u32 %v442_v16, %v438_v10  ;;  %v237_v14 = vld [vmem:[%s5672_s25 + $0x54] sm:$0xf] }
  0x3c   : > { %4670 = vmatmul.msk.bf16.gmra.mxu3 %vm747_vm3, %v720_v13  ;;  %v329_v22 = vsel %vm5693_vm2, %v324_v15, %v328_v59  ;;  %v526_v24 = vshll.u32 %v243_v7, 16  ;;  %v532_v25 = vshll.u32 %v244_v12, 16  ;;  %v525_v28 = vrot.slane %v523_v21, 4 }
  0x3d   : > { %v678_v26 = vunpack.c.l.b16 %v329_v22  ;;  %v434_v27 = vrot.slane %v433_v18, 4  ;;  %v536_v30 = vshrl.u32 %v244_v12, 16  ;;  %v444_v31 = vrot.slane %v443_v23, 4 }
  0x3e   : > { %v528_v33 = vrot.slane %v526_v24, 5  ;;  %v534_v35 = vrot.slane %v532_v25, 5  ;;  %v542_v36 = vshll.u32 %v273_v20, 16  ;;  %v619_v50 = vshrl.u32 %v251_v37, 16  ;;  %v5464_v24 = vld [vmem:[%s7140_s1 + $0x60] sm:$0xff] }
  0x3f   : > { %v708_v38 = vpack.c.b16 %v678_v26, %v677_v17  ;;  %v439_v39 = vsel %vm5693_vm2, %v434_v27, %v438_v10  ;;  %v538_v40 = vrot.slane %v536_v30, 4  ;;  %v449_v43 = vsel %vm5693_vm2, %v444_v31, %v448_v19  ;;  %v5837_v19 = vld [vmem:[%s5672_s25 + $0x58] sm:$0xf]  ;;  %v5436_v25 = vld [vmem:[%s7140_s1] sm:$0xff]  ;;  %1740 = vmatpush.bf16.msrb.mxu3 %v5464_v24 }
  0x40   : > { %v687_v45 = vunpack.c.l.b16 %v439_v39  ;;  %v529_v46 = vor.u32 %v528_v33, %v525_v28  ;;  %v544_v47 = vrot.slane %v542_v36, 5  ;;  %v688_v48 = vunpack.c.l.b16 %v449_v43  ;;  %v5468_v26 = vld [vmem:[%s7140_s1 + $0x80] sm:$0xff]  ;;  %v5851_v33 = vld [vmem:[%s5672_s25 + $0x5c] sm:$0x1]  ;;  %1044 = vmatpush.bf16.msrb.mxu1 %v5436_v25 }
  0x41   : > { %4658 = vmatmul.msk.bf16.gmra.mxu0 %vm747_vm3, %v708_v38  ;;  %v539_v49 = vor.u32 %v538_v40, %v534_v35  ;;  %v622_v51 = vshll.u32 %v251_v37, 16  ;;  %v628_v53 = vshll.u32 %v252_v41, 16  ;;  %v632_v54 = vshrl.u32 %v252_v41, 16  ;;  %v245_v43 = vld [vmem:[%s5672_s25 + $0x84] sm:$0xf] }
  0x42   : > { %v530_v52 = vrot.slane %v529_v46, 4  ;;  %v638_v55 = vshll.u32 %v277_v42, 16  ;;  %v713_v56 = vpack.c.b16 %v688_v48, %v687_v45  ;;  %v621_v58 = vrot.slane %v619_v50, 4  ;;  %2422 = vmatpush.bf16.msrb.mxu0 %v5468_v26 }
  0x43   : > { %v540_v57 = vrot.slane %v539_v49, 4  ;;  %v624_v59 = vrot.slane %v622_v51, 5  ;;  %v630_v2 = vrot.slane %v628_v53, 5  ;;  %v634_v3 = vrot.slane %v632_v54, 4  ;;  %v246_v53 = vld [vmem:[%s5672_s25 + $0x88] sm:$0xf] }
  0x44   : > { %v535_v1 = vsel %vm5693_vm2, %v530_v52, %v534_v35  ;;  %4663 = vmatmul.msk.bf16.gmra.mxu1 %vm747_vm3, %v713_v56  ;;  %v640_v9 = vrot.slane %v638_v55, 5  ;;  %v331_v12 = vshrl.u32 %v227_v61, 16  ;;  %v334_v13 = vshll.u32 %v227_v61, 16 }
  0x45   : > { %v545_v6 = vsel %vm5693_vm2, %v540_v57, %v544_v47  ;;  %v695_v7 = vunpack.c.l.b16 %v535_v1  ;;  %v625_v8 = vor.u32 %v624_v59, %v621_v58  ;;  %v635_v11 = vor.u32 %v634_v3, %v630_v2  ;;  %v274_v57 = vld [vmem:[%s5672_s25 + $0x8c] sm:$0x1] }
  0x46   : > { %v696_v10 = vunpack.c.l.b16 %v545_v6  ;;  %v340_v16 = vshll.u32 %v5824_v4, 16  ;;  %v344_v17 = vshrl.u32 %v5824_v4, 16  ;;  %v350_v18 = vshll.u32 %v5827_v5, 16 }
  0x47   : > { %v626_v15 = vrot.slane %v625_v8, 4  ;;  %v636_v21 = vrot.slane %v635_v11, 4  ;;  %v333_v22 = vrot.slane %v331_v12, 4  ;;  %v336_v23 = vrot.slane %v334_v13, 5  ;;  %v253_v12 = vld [vmem:[%s5672_s25 + $0xb4] sm:$0xf] }
  0x48   : > { %v717_v20 = vpack.c.b16 %v696_v10, %v695_v7  ;;  %v342_v28 = vrot.slane %v340_v16, 5  ;;  %v346_v30 = vrot.slane %v344_v17, 4  ;;  %v352_v31 = vrot.slane %v350_v18, 5  ;;  %v254_v16 = vld [vmem:[%s5672_s25 + $0xb8] sm:$0xf] }
  0x49   : > { %v631_v27 = vsel %vm5693_vm2, %v626_v15, %v630_v2  ;;  %v641_v35 = vsel %vm5693_vm2, %v636_v21, %v640_v9  ;;  %v337_v37 = vor.u32 %v336_v23, %v333_v22  ;;  %v451_v38 = vshrl.u32 %v237_v14, 16  ;;  %v278_v22 = vld [vmem:[%s5672_s25 + $0xbc] sm:$0x1] }
  0x4a   : > { %4667 = vmatmul.msk.bf16.gmra.mxu2 %vm747_vm3, %v717_v20  ;;  %v703_v36 = vunpack.c.l.b16 %v631_v27  ;;  %v704_v39 = vunpack.c.l.b16 %v641_v35  ;;  %v347_v40 = vor.u32 %v346_v30, %v342_v28  ;;  %v454_v41 = vshll.u32 %v237_v14, 16  ;;  %v5495_v23 = vld [vmem:[%s7140_s1 + $0xd8] sm:$0xff] }
  0x4b   : > { %v460_v42 = vshll.u32 %v5837_v19, 16  ;;  %v338_v45 = vrot.slane %v337_v37, 4  ;;  %v453_v46 = vrot.slane %v451_v38, 4  ;;  %v464_v47 = vshrl.u32 %v5837_v19, 16  ;;  %3160 = vmatpush.bf16.msra.mxu2 %v5495_v23 }
  0x4c   : > { %v470_v48 = vshll.u32 %v5851_v33, 16  ;;  %v721_v49 = vpack.c.b16 %v704_v39, %v703_v36  ;;  %v348_v50 = vrot.slane %v347_v40, 4  ;;  %v456_v51 = vrot.slane %v454_v41, 5  ;;  %v229_v40 = vld [vmem:[%s5672_s25 + $0x24] sm:$0xf] }
  0x4d   : > { %v462_v52 = vrot.slane %v460_v42, 5  ;;  %v343_v54 = vsel %vm5693_vm2, %v338_v45, %v342_v28  ;;  %v466_v55 = vrot.slane %v464_v47, 4  ;;  %v547_v58 = vshrl.u32 %v245_v43, 16  ;;  %v5885_v47 = vld [vmem:[%s5672_s25 + $0x2c] sm:$0x1] }
  0x4e   : > { %v472_v56 = vrot.slane %v470_v48, 5  ;;  %4671 = vmatmul.msk.bf16.gmra.mxu3 %vm747_vm3, %v721_v49  ;;  %v353_v59 = vsel %vm5693_vm2, %v348_v50, %v352_v31  ;;  %v679_v61 = vunpack.c.l.b16 %v343_v54  ;;  %v457_v62 = vor.u32 %v456_v51, %v453_v46  ;;  %v5882_v46 = vld [vmem:[%s5672_s25 + $0x28] sm:$0xf]  ;;  %v5503_v54 = vld [vmem:[%s7140_s1 + $0x118] sm:$0xff] }
  0x4f   : > { %v550_v1 = vshll.u32 %v245_v43, 16  ;;  %v680_v2 = vunpack.c.l.b16 %v353_v59  ;;  %v467_v3 = vor.u32 %v466_v55, %v462_v52  ;;  %v549_v6 = vrot.slane %v547_v58, 4  ;;  %4268 = vmatpush.bf16.msra.mxu0 %v5503_v54 }
  0x50   : > { %v556_v7 = vshll.u32 %v246_v53, 16  ;;  %v458_v8 = vrot.slane %v457_v62, 4  ;;  %v560_v10 = vshrl.u32 %v246_v53, 16  ;;  %v566_v11 = vshll.u32 %v274_v57, 16  ;;  %v5475_v53 = vld [vmem:[%s7140_s1 + $0xb8] sm:$0xff] }
  0x51   : > { %v552_v9 = vrot.slane %v550_v1, 5  ;;  %v709_v13 = vpack.c.b16 %v680_v2, %v679_v61  ;;  %v468_v14 = vrot.slane %v467_v3, 4  ;;  %v643_v26 = vshrl.u32 %v253_v12, 16  ;;  %2845 = vmatpush.bf16.msra.mxu1 %v5475_v53  ;;  %v5420_v53 = vld [vmem:[%s5672_s25] sm:$0xff] }
  0x52   : > { %v558_v15 = vrot.slane %v556_v7, 5  ;;  %v463_v17 = vsel %vm5693_vm2, %v458_v8, %v462_v52  ;;  %v562_v20 = vrot.slane %v560_v10, 4  ;;  %v568_v21 = vrot.slane %v566_v11, 5  ;;  %v5499_v52 = vld [vmem:[%s7140_s1 + $0xf8] sm:$0xff]  ;;  %v1126_v8 = vld [vmem:[%s5672_s25] sm:$0xe] }
  0x53   : > { %v553_v18 = vor.u32 %v552_v9, %v549_v6  ;;  %4659 = vmatmul.msk.bf16.gmra.mxu0 %vm747_vm3, %v709_v13  ;;  %v473_v24 = vsel %vm5693_vm2, %v468_v14, %v472_v56  ;;  %v689_v25 = vunpack.c.l.b16 %v463_v17  ;;  %v646_v27 = vshll.u32 %v253_v12, 16  ;;  %3842 = vmatpush.bf16.msra.mxu3 %v5499_v52  ;;  %v4961_v17 = vld [vmem:[%s5672_s25 + $0xc] sm:$0xf] }
  0x54   : > { %v690_v28 = vunpack.c.l.b16 %v473_v24  ;;  %v563_v31 = vor.u32 %v562_v20, %v558_v15  ;;  %v652_v35 = vshll.u32 %v254_v16, 16  ;;  %v645_v36 = vrot.slane %v643_v26, 4 }
  0x55   : > { %v554_v30 = vrot.slane %v553_v18, 4  ;;  %v648_v37 = vrot.slane %v646_v27, 5  ;;  %v656_v38 = vshrl.u32 %v254_v16, 16  ;;  %v662_v39 = vshll.u32 %v278_v22, 16  ;;  %v4962_v18 = vld [vmem:[%s5672_s25 + $0x10] sm:$0xf] }
  0x56   : > { %v714_v41 = vpack.c.b16 %v690_v28, %v689_v25  ;;  %v564_v43 = vrot.slane %v563_v31, 4  ;;  %v654_v45 = vrot.slane %v652_v35, 5  ;;  %v1182_v48 = vrot.slane %v5715_v0, 5  ;;  %v4964_v0 = vld [vmem:[%s5672_s25 + $0x18] sm:$0xf] }
  0x57   : > { %v559_v42 = vsel %vm5693_vm2, %v554_v30, %v558_v15  ;;  %v649_v50 = vor.u32 %v648_v37, %v645_v36  ;;  %v658_v51 = vrot.slane %v656_v38, 4  ;;  %v664_v56 = vrot.slane %v662_v39, 5 }
  0x58   : > { %v697_v49 = vunpack.c.l.b16 %v559_v42  ;;  %4664 = vmatmul.msk.bf16.gmra.mxu1 %vm747_vm3, %v714_v41  ;;  %v569_v55 = vsel %vm5693_vm2, %v564_v43, %v568_v21  ;;  %v355_v57 = vshrl.u32 %v229_v40, 16  ;;  %v358_v58 = vshll.u32 %v229_v40, 16  ;;  %v4963_v42 = vld [vmem:[%s5672_s25 + $0x14] sm:$0x1] }
  0x59   : > { %v698_v59 = vunpack.c.l.b16 %v569_v55  ;;  %v650_v61 = vrot.slane %v649_v50, 4  ;;  %v659_v62 = vor.u32 %v658_v51, %v654_v45  ;;  %v364_v1 = vshll.u32 %v5882_v46, 16 }
  0x5a   : > { %v357_v2 = vrot.slane %v355_v57, 4  ;;  %v360_v3 = vrot.slane %v358_v58, 5  ;;  %v368_v6 = vshrl.u32 %v5882_v46, 16  ;;  %v374_v7 = vshll.u32 %v5885_v47, 16 }
  0x5b   : > { %v718_v9 = vpack.c.b16 %v698_v59, %v697_v49  ;;  %v655_v10 = vsel %vm5693_vm2, %v650_v61, %v654_v45  ;;  %v660_v11 = vrot.slane %v659_v62, 4  ;;  %v366_v12 = vrot.slane %v364_v1, 5 }
  0x5c   : > { %v705_v13 = vunpack.c.l.b16 %v655_v10  ;;  %v361_v14 = vor.u32 %v360_v3, %v357_v2  ;;  %v370_v15 = vrot.slane %v368_v6, 4  ;;  %v376_v16 = vrot.slane %v374_v7, 5  ;;  %v4965_v2 = vld [vmem:[%s5672_s25 + $0x1c] sm:$0xf]  ;;  %v1127_v3 = vld [vmem:[%s5672_s25 + $0xc] sm:$0xe] }
  0x5d   : > { %4668 = vmatmul.msk.bf16.gmra.mxu2 %vm747_vm3, %v718_v9  ;;  %v665_v20 = vsel %vm5693_vm2, %v660_v11, %v664_v56  ;;  %v4769_v21 = vrot.slane %v1126_v8, 9  ;;  %v1179_v26 = vrot.slane %v5712_v63, 5  ;;  %v1903_v27 = vshrl.u32 %v4961_v17, 16 }
  0x5e   : > { %v706_v22 = vunpack.c.l.b16 %v665_v20  ;;  %v362_v23 = vrot.slane %v361_v14, 4  ;;  %v371_v24 = vor.u32 %v370_v15, %v366_v12  ;;  %v1906_v28 = vshll.u32 %v4961_v17, 16 }
  0x5f   : > { %v1912_v30 = vshll.u32 %v4962_v18, 16  ;;  %v1916_v31 = vshrl.u32 %v4962_v18, 16  ;;  %v1180_v38 = vsel %vm5911_vm6, %v4769_v21, %v1179_v26  ;;  %v1181_v40 = vrot.slane %v1179_v26, 4 }
  0x60   : > { %v722_v35 = vpack.c.b16 %v706_v22, %v705_v13  ;;  %v367_v36 = vsel %vm5693_vm2, %v362_v23, %v366_v12  ;;  %v372_v37 = vrot.slane %v371_v24, 4  ;;  %v1298_v41 = vunpack.c.l.b16 %v1180_v38  ;;  %v5448_v12 = vld [vmem:[%s5672_s25 + $0xc] sm:$0xff]  ;;  %v4966_v22 = vld [vmem:[%s5672_s25 + $0x20] sm:$0x1] }
  0x61   : > { %v681_v39 = vunpack.c.l.b16 %v367_v36  ;;  %v1905_v43 = vrot.slane %v1903_v27, 4  ;;  %v1908_v45 = vrot.slane %v1906_v28, 5  ;;  %v1914_v49 = vrot.slane %v1912_v30, 5  ;;  %v5421_v27 = vld [vmem:[%s5672_s25 + $0xc] sm:$0xff] }
  0x62   : > { %4672 = vmatmul.msk.bf16.gmra.mxu3 %vm747_vm3, %v722_v35  ;;  %v377_v63 = vsel %vm5693_vm2, %v372_v37, %v376_v16  ;;  %v1918_v50 = vrot.slane %v1916_v31, 4  ;;  %v1183_v52 = vsel %vm5911_vm6, %v1181_v40, %v1182_v48  ;;  %v1922_v57 = vshll.u32 %v4963_v42, 16  ;;  %v4967_v37 = vld [vmem:[%s5672_s25 + $0x24] sm:$0xf]  ;;  %v4968_v40 = vld [vmem:[%s5672_s25 + $0x28] sm:$0xf] }
  0x63   : > { %v682_v51 = vunpack.c.l.b16 %v377_v63  ;;  %v1299_v54 = vunpack.c.l.b16 %v1183_v52  ;;  %v1909_v55 = vor.u32 %v1908_v45, %v1905_v43  ;;  %v1186_v48 = vrot.slane %v5766_v29, 5  ;;  %v1128_v42 = vld [vmem:[%s5672_s25 + $0x18] sm:$0xe] }
  0x64   : > { %v1919_v56 = vor.u32 %v1918_v50, %v1914_v49  ;;  %v1924_v1 = vrot.slane %v1922_v57, 5  ;;  %v1927_v6 = vshrl.u32 %v4964_v0, 16  ;;  %v1930_v7 = vshll.u32 %v4964_v0, 16 }
  0x65   : > { %v710_v58 = vpack.c.b16 %v682_v51, %v681_v39  ;;  %v1330_v59 = vpack.c.b16 %v1299_v54, %v1298_v41  ;;  %v1910_v61 = vrot.slane %v1909_v55, 4  ;;  %v1936_v10 = vshll.u32 %v4965_v2, 16  ;;  %v5449_v54 = vld [vmem:[%s5672_s25 + $0x18] sm:$0xff] }
  0x66   : > { %v1920_v62 = vrot.slane %v1919_v56, 4  ;;  %v1940_v11 = vshrl.u32 %v4965_v2, 16  ;;  %v4770_v13 = vrot.slane %v1127_v3, 9  ;;  %v1188_v14 = vrot.slane %v1186_v48, 4 }
  0x67   : > { %4660 = vmatmul.msk.bf16.gmra.mxu0 %vm747_vm3, %v710_v58  ;;  %v1915_v8 = vsel %vm5693_vm2, %v1910_v61, %v1914_v49  ;;  %v1189_v29 = vrot.slane %v5769_v34, 5  ;;  %v1929_v17 = vrot.slane %v1927_v6, 4  ;;  %v1932_v18 = vrot.slane %v1930_v7, 5  ;;  %v5422_v7 = vld [vmem:[%s5672_s25 + $0x18] sm:$0xff] }
  0x68   : > { %4753 = vmatmul.msk.bf16.vlgmr.msrb.gmra.mxu1 %vm747_vm3, %v5420_v53  ;;  %v1925_v9 = vsel %vm5693_vm2, %v1920_v62, %v1924_v1  ;;  %v2295_v15 = vunpack.c.l.b16 %v1915_v8  ;;  %v1938_v20 = vrot.slane %v1936_v10, 5  ;;  %v1942_v21 = vrot.slane %v1940_v11, 4  ;;  %v4969_v1 = vld [vmem:[%s5672_s25 + $0x2c] sm:$0x1] }
  0x69   : > { %v2296_v16 = vunpack.c.l.b16 %v1925_v9  ;;  %v1187_v23 = vsel %vm5911_vm6, %v4770_v13, %v1186_v48  ;;  %v1190_v24 = vsel %vm5911_vm6, %v1188_v14, %v1189_v29  ;;  %v1933_v34 = vor.u32 %v1932_v18, %v1929_v17  ;;  %v4970_v14 = vld [vmem:[%s5672_s25 + $0x30] sm:$0xf]  ;;  %v4971_v29 = vld [vmem:[%s5672_s25 + $0x34] sm:$0xf]  ;;  %v1129_v18 = vld [vmem:[%s5672_s25 + $0x24] sm:$0xe] }
  0x6a   : > { %v1943_v28 = vor.u32 %v1942_v21, %v1938_v20  ;;  %v1946_v30 = vshll.u32 %v4966_v22, 16  ;;  %v1300_v31 = vunpack.c.l.b16 %v1187_v23  ;;  %v1301_v35 = vunpack.c.l.b16 %v1190_v24  ;;  %v5450_v24 = vld [vmem:[%s5672_s25 + $0x24] sm:$0xff] }
  0x6b   : > { %v2327_v26 = vpack.c.b16 %v2296_v16, %v2295_v15  ;;  %v1934_v36 = vrot.slane %v1933_v34, 4  ;;  %v1193_v43 = vrot.slane %v5824_v4, 5  ;;  %v1951_v63 = vshrl.u32 %v4967_v37, 16 }
  0x6c   : > { %v1944_v38 = vrot.slane %v1943_v28, 4  ;;  %v1948_v39 = vrot.slane %v1946_v30, 5  ;;  %v1331_v41 = vpack.c.b16 %v1301_v35, %v1300_v31  ;;  %v1954_v49 = vshll.u32 %v4967_v37, 16  ;;  %v4972_v37 = vld [vmem:[%s5672_s25 + $0x38] sm:$0x1] }
  0x6d   : > { %4809 = vmatmul.msk.bf16.vlgmr.msrb.gmra.mxu2 %vm747_vm3, %v1330_v59  ;;  %v1939_v45 = vsel %vm5693_vm2, %v1934_v36, %v1938_v20  ;;  %v1960_v50 = vshll.u32 %v4968_v40, 16  ;;  %v1964_v51 = vshrl.u32 %v4968_v40, 16  ;;  %v4771_v53 = vrot.slane %v1128_v42, 9 }
  0x6e   : > { %v1949_v52 = vsel %vm5693_vm2, %v1944_v38, %v1948_v39  ;;  %v2297_v55 = vunpack.c.l.b16 %v1939_v45  ;;  %v1195_v56 = vrot.slane %v1193_v43, 4  ;;  %v1196_v4 = vrot.slane %v5827_v5, 5 }
  0x6f   : > { %v1953_v57 = vrot.slane %v1951_v63, 4  ;;  %v2298_v58 = vunpack.c.l.b16 %v1949_v52  ;;  %v1956_v59 = vrot.slane %v1954_v49, 5  ;;  %v1962_v61 = vrot.slane %v1960_v50, 5  ;;  %v4973_v50 = vld [vmem:[%s5672_s25 + $0x3c] sm:$0xf]  ;;  %v5498_v52 = vld [vmem:[%s7140_s1 + $0xf0] sm:$0xff] }
  0x70   : > { %v1966_v62 = vrot.slane %v1964_v51, 4  ;;  %v1194_v0 = vsel %vm5911_vm6, %v4771_v53, %v1193_v43  ;;  %v1197_v2 = vsel %vm5911_vm6, %v1195_v56, %v1196_v4  ;;  %v1970_v5 = vshll.u32 %v4969_v1, 16  ;;  %v4974_v51 = vld [vmem:[%s5672_s25 + $0x40] sm:$0xf]  ;;  %v5474_v53 = vld [vmem:[%s7140_s1 + $0xb0] sm:$0xff]  ;;  %3843 = vmatpush.bf16.msra.mxu3 %v5498_v52 }
  0x71   : > { %v2328_v48 = vpack.c.b16 %v2298_v58, %v2297_v55  ;;  %v1957_v3 = vor.u32 %v1956_v59, %v1953_v57  ;;  %v1302_v8 = vunpack.c.l.b16 %v1194_v0  ;;  %v1303_v9 = vunpack.c.l.b16 %v1197_v2  ;;  %v5542_v58 = vld [vmem:[%s5672_s25 + $0x34] sm:$0xf]  ;;  %2846 = vmatpush.bf16.msra.mxu1 %v5474_v53  ;;  %v5452_v52 = vld [vmem:[%s5672_s25 + $0x3c] sm:$0xff] }
  0x72   : > { %4945 = vmatmul.msk.bf16.vlgmr.msrb.gmra.mxu3 %vm747_vm3, %v5448_v12  ;;  %v1967_v6 = vor.u32 %v1966_v62, %v1962_v61  ;;  %v1972_v12 = vrot.slane %v1970_v5, 5  ;;  %v1200_v15 = vrot.slane %v5882_v46, 5  ;;  %v1975_v20 = vshrl.u32 %v4970_v14, 16 }
  0x73   : > { %v1958_v10 = vrot.slane %v1957_v3, 4  ;;  %v1332_v13 = vpack.c.b16 %v1303_v9, %v1302_v8  ;;  %v1978_v21 = vshll.u32 %v4970_v14, 16  ;;  %v1984_v22 = vshll.u32 %v4971_v29, 16  ;;  %v5543_v8 = vld [vmem:[%s5672_s25 + $0x38] sm:$0x1] }
  0x74   : > { %v1968_v11 = vrot.slane %v1967_v6, 4  ;;  %v1988_v23 = vshrl.u32 %v4971_v29, 16  ;;  %v1202_v34 = vrot.slane %v1200_v15, 4  ;;  %v1203_v46 = vrot.slane %v5885_v47, 5  ;;  %v5494_v47 = vld [vmem:[%s7140_s1 + $0xd0] sm:$0xff] }
  0x75   : > { %v1963_v16 = vsel %vm5693_vm2, %v1958_v10, %v1962_v61  ;;  %v1977_v30 = vrot.slane %v1975_v20, 4  ;;  %v1980_v31 = vrot.slane %v1978_v21, 5  ;;  %v1986_v35 = vrot.slane %v1984_v22, 5  ;;  %3161 = vmatpush.bf16.msra.mxu2 %v5494_v47  ;;  %v1130_v61 = vld [vmem:[%s5672_s25 + $0x30] sm:$0xe] }
  0x76   : > { %v1973_v17 = vsel %vm5693_vm2, %v1968_v11, %v1972_v12  ;;  %v1990_v36 = vrot.slane %v1988_v23, 4  ;;  %v1204_v39 = vsel %vm5911_vm6, %v1202_v34, %v1203_v46  ;;  %v1994_v63 = vshll.u32 %v4972_v37, 16  ;;  %v5451_v10 = vld [vmem:[%s5672_s25 + $0x30] sm:$0xff] }
  0x77   : > { %5033 = vmatmul.msk.bf16.vlgmr.msrb.gmra.mxu0 %vm747_vm3, %v2327_v26  ;;  %v4772_v26 = vrot.slane %v1129_v18, 9  ;;  %v2300_v28 = vunpack.c.l.b16 %v1973_v17  ;;  %v1981_v42 = vor.u32 %v1980_v31, %v1977_v30  ;;  %v1305_v49 = vunpack.c.l.b16 %v1204_v39 }
  0x78   : > { %4754 = vmatmul.msk.bf16.gmra.mxu1 %vm747_vm3, %v5421_v27  ;;  %v2299_v27 = vunpack.c.l.b16 %v1963_v16  ;;  %v1991_v43 = vor.u32 %v1990_v36, %v1986_v35  ;;  %v1996_v4 = vrot.slane %v1994_v63, 5  ;;  %v1207_v59 = vrot.slane %v5542_v58, 5  ;;  %v4975_v16 = vld [vmem:[%s5672_s25 + $0x44] sm:$0x1]  ;;  %v4977_v36 = vld [vmem:[%s5672_s25 + $0x4c] sm:$0xf] }
  0x79   : > { %v1201_v38 = vsel %vm5911_vm6, %v4772_v26, %v1200_v15  ;;  %v1982_v55 = vrot.slane %v1981_v42, 4  ;;  %v1999_v62 = vshrl.u32 %v4973_v50, 16  ;;  %v2002_v1 = vshll.u32 %v4973_v50, 16 }
  0x7a   : > { %v2329_v40 = vpack.c.b16 %v2300_v28, %v2299_v27  ;;  %v1304_v45 = vunpack.c.l.b16 %v1201_v38  ;;  %v1992_v56 = vrot.slane %v1991_v43, 4  ;;  %v2008_v0 = vshll.u32 %v4974_v51, 16  ;;  %v1131_v43 = vld [vmem:[%s5672_s25 + $0x3c] sm:$0xe] }
  0x7b   : > { %v2012_v2 = vshrl.u32 %v4974_v51, 16  ;;  %v1987_v3 = vsel %vm5693_vm2, %v1982_v55, %v1986_v35  ;;  %v4773_v5 = vrot.slane %v1130_v61, 9  ;;  %v1210_v9 = vrot.slane %v5543_v8, 5  ;;  %v4976_v35 = vld [vmem:[%s5672_s25 + $0x48] sm:$0xf] }
  0x7c   : > { %v1333_v57 = vpack.c.b16 %v1305_v49, %v1304_v45  ;;  %v1997_v6 = vsel %vm5693_vm2, %v1992_v56, %v1996_v4  ;;  %v2001_v11 = vrot.slane %v1999_v62, 4  ;;  %v2004_v12 = vrot.slane %v2002_v1, 5  ;;  %v5545_v4 = vld [vmem:[%s5672_s25 + $0x44] sm:$0x1] }
  0x7d   : > { %4810 = vmatmul.msk.bf16.gmra.mxu2 %vm747_vm3, %v1331_v41  ;;  %v5423_v41 = vld [vmem:[%s5672_s25 + $0x24] sm:$0xff]  ;;  %v2014_v14 = vrot.slane %v2012_v2, 4  ;;  %v2301_v29 = vunpack.c.l.b16 %v1987_v3  ;;  %v2302_v15 = vunpack.c.l.b16 %v1997_v6  ;;  %v1208_v17 = vsel %vm5911_vm6, %v4773_v5, %v1207_v59 }
  0x7e   : > { %v2005_v20 = vor.u32 %v2004_v12, %v2001_v11  ;;  %v2018_v22 = vshll.u32 %v4975_v16, 16  ;;  %v1306_v34 = vunpack.c.l.b16 %v1208_v17  ;;  %v2023_v63 = vshrl.u32 %v4976_v35, 16  ;;  %v5425_v11 = vld [vmem:[%s5672_s25 + $0x3c] sm:$0xff] }
  0x7f   : > { %v2330_v23 = vpack.c.b16 %v2302_v15, %v2301_v29  ;;  %v2026_v45 = vshll.u32 %v4976_v35, 16  ;;  %v2032_v49 = vshll.u32 %v4977_v36, 16  ;;  %v2036_v50 = vshrl.u32 %v4977_v36, 16  ;;  %v5453_v36 = vld [vmem:[%s5672_s25 + $0x48] sm:$0xff] }
  0x80   : > { %v2006_v28 = vrot.slane %v2005_v20, 4  ;;  %v2020_v31 = vrot.slane %v2018_v22, 5  ;;  %v4774_v55 = vrot.slane %v1131_v43, 9  ;;  %v4979_v20 = vld [vmem:[%s5672_s25 + $0x54] sm:$0xf]  ;;  %v1221_v22 = vrot.slane %v5777_v44, 5 }
  0x81   : > { %v2028_v61 = vrot.slane %v2026_v45, 5  ;;  %v2034_v62 = vrot.slane %v2032_v49, 5  ;;  %v2038_v1 = vrot.slane %v2036_v50, 4 }
  0x82   : > { %4946 = vmatmul.msk.bf16.gmra.mxu3 %vm747_vm3, %v5449_v54  ;;  %v5502_v54 = vld [vmem:[%s7140_s1 + $0x110] sm:$0xff] }
  0x83   : > { %4269 = vmatpush.bf16.msra.mxu0 %v5502_v54  ;;  %v2039_v8 = vor.u32 %v2038_v1, %v2034_v62 }
  0x85   : > { %v2040_v29 = vrot.slane %v2039_v8, 4 }
  0x87   : > { %5034 = vmatmul.msk.bf16.gmra.mxu0 %vm747_vm3, %v2328_v48 }
  0x88   : > { %4755 = vmatmul.msk.bf16.gmra.mxu1 %vm747_vm3, %v5422_v7  ;;  %v1209_v7 = vrot.slane %v1207_v59, 4  ;;  %v2025_v59 = vrot.slane %v2023_v63, 4 }
  0x8a   : > { %v1211_v18 = vsel %vm5911_vm6, %v1209_v7, %v1210_v9  ;;  %v2029_v7 = vor.u32 %v2028_v61, %v2025_v59 }
  0x8b   : > { %v1307_v46 = vunpack.c.l.b16 %v1211_v18 }
  0x8d   : > { %4811 = vmatmul.msk.bf16.gmra.mxu2 %vm747_vm3, %v1332_v13  ;;  %v2010_v13 = vrot.slane %v2008_v0, 5  ;;  %v1334_v38 = vpack.c.b16 %v1307_v46, %v1306_v34  ;;  %v4978_v0 = vld [vmem:[%s5672_s25 + $0x50] sm:$0x1]  ;;  %v1132_v34 = vld [vmem:[%s5672_s25 + $0x48] sm:$0xe]  ;;  %v2047_v46 = vshrl.u32 %v4979_v20, 16 }
  0x8e   : > { %v2042_v9 = vshll.u32 %v4978_v0, 16  ;;  %v4775_v44 = vrot.slane %v1132_v34, 9  ;;  %v4982_v0 = vld [vmem:[%s5672_s25 + $0x60] sm:$0xf] }
  0x8f   : > { %v2015_v21 = vor.u32 %v2014_v14, %v2010_v13  ;;  %v2011_v39 = vsel %vm5693_vm2, %v2006_v28, %v2010_v13  ;;  %v2030_v14 = vrot.slane %v2029_v7, 4  ;;  %v2050_v28 = vshll.u32 %v4979_v20, 16 }
  0x90   : > { %v2303_v51 = vunpack.c.l.b16 %v2011_v39  ;;  %v2044_v15 = vrot.slane %v2042_v9, 5  ;;  %v1223_v39 = vrot.slane %v1221_v22, 4  ;;  %v2049_v43 = vrot.slane %v2047_v46, 4  ;;  %v5454_v46 = vld [vmem:[%s5672_s25 + $0x54] sm:$0xff] }
  0x91   : > { %v2016_v30 = vrot.slane %v2015_v21, 4  ;;  %v4980_v21 = vld [vmem:[%s5672_s25 + $0x58] sm:$0xf]  ;;  %v2052_v63 = vrot.slane %v2050_v28, 5 }
  0x92   : > { %4947 = vmatmul.msk.bf16.gmra.mxu3 %vm747_vm3, %v5450_v24  ;;  %v5424_v24 = vld [vmem:[%s5672_s25 + $0x30] sm:$0xff] }
  0x93   : > { %v2021_v47 = vsel %vm5693_vm2, %v2016_v30, %v2020_v31  ;;  %v2056_v30 = vshll.u32 %v4980_v21, 16  ;;  %v2060_v31 = vshrl.u32 %v4980_v21, 16 }
  0x94   : > { %v2304_v53 = vunpack.c.l.b16 %v2021_v47  ;;  %v1224_v47 = vrot.slane %v5793_v60, 5 }
  0x95   : > { %v2058_v45 = vrot.slane %v2056_v30, 5  ;;  %v2062_v49 = vrot.slane %v2060_v31, 4  ;;  %v1231_v30 = vrot.slane %v5851_v33, 5 }
  0x96   : > { %v2331_v6 = vpack.c.b16 %v2304_v53, %v2303_v51  ;;  %v4981_v51 = vld [vmem:[%s5672_s25 + $0x5c] sm:$0x1]  ;;  %v1222_v53 = vsel %vm5911_vm6, %v4775_v44, %v1221_v22  ;;  %v1225_v60 = vsel %vm5911_vm6, %v1223_v39, %v1224_v47  ;;  %v4984_v39 = vld [vmem:[%s5672_s25 + $0x68] sm:$0x1] }
  0x97   : > { %5035 = vmatmul.msk.bf16.gmra.mxu0 %vm747_vm3, %v2329_v40  ;;  %v2066_v59 = vshll.u32 %v4981_v51, 16  ;;  %v1310_v61 = vunpack.c.l.b16 %v1222_v53  ;;  %v5427_v51 = vld [vmem:[%s5672_s25 + $0x54] sm:$0xff]  ;;  %v5493_v53 = vld [vmem:[%s7140_s1 + $0xc8] sm:$0xff] }
  0x98   : > { %4756 = vmatmul.msk.bf16.gmra.mxu1 %vm747_vm3, %v5423_v41  ;;  %v5544_v41 = vld [vmem:[%s5672_s25 + $0x40] sm:$0xf]  ;;  %3162 = vmatpush.bf16.msra.mxu2 %v5493_v53 }
  0x99   : > { %v1214_v42 = vrot.slane %v5544_v41, 5  ;;  %v2068_v8 = vrot.slane %v2066_v59, 5 }
  0x9b   : > { %v1216_v56 = vrot.slane %v1214_v42, 4  ;;  %v1215_v2 = vsel %vm5911_vm6, %v4774_v55, %v1214_v42 }
  0x9c   : > { %v1308_v12 = vunpack.c.l.b16 %v1215_v2  ;;  %v4983_v2 = vld [vmem:[%s5672_s25 + $0x64] sm:$0xf] }
  0x9d   : > { %v6007_v48 = vpop.f32.mrf.mxu1  ;;  %4812 = vmatmul.msk.bf16.gmra.mxu2 %vm747_vm3, %v1333_v57  ;;  %v1217_v57 = vrot.slane %v5545_v4, 5  ;;  %v2053_v4 = vor.u32 %v2052_v63, %v2049_v43 }
  0x9f   : > { %v1218_v3 = vsel %vm5911_vm6, %v1216_v56, %v1217_v57  ;;  %v5426_v56 = vld [vmem:[%s5672_s25 + $0x48] sm:$0xff]  ;;  %v2063_v57 = vor.u32 %v2062_v49, %v2058_v45  ;;  %v2090_v49 = vshll.u32 %v4984_v39, 16 }
  0xa0   : > { %v1309_v13 = vunpack.c.l.b16 %v1218_v3 }
  0xa1   : > { %v2064_v7 = vrot.slane %v2063_v57, 4 }
  0xa2   : > { %4948 = vmatmul.msk.bf16.gmra.mxu3 %vm747_vm3, %v5451_v10  ;;  %v1335_v17 = vpack.c.b16 %v1309_v13, %v1308_v12  ;;  %v2074_v12 = vshll.u32 %v4982_v0, 16  ;;  %v2080_v13 = vshll.u32 %v4983_v2, 16 }
  0xa3   : > { %v2069_v21 = vsel %vm5693_vm2, %v2064_v7, %v2068_v8 }
  0xa4   : > { %v2082_v34 = vrot.slane %v2080_v13, 5  ;;  %v2308_v44 = vunpack.c.l.b16 %v2069_v21 }
  0xa5   : > { %v6023_v26 = vpop.f32.mrf.mxu1 }
  0xa7   : > { %v6025_v27 = vpop.f32.mrf.mxu2  ;;  %5036 = vmatmul.msk.bf16.gmra.mxu0 %vm747_vm3, %v2330_v23  ;;  %v2035_v23 = vsel %vm5693_vm2, %v2030_v14, %v2034_v62  ;;  %v1311_v62 = vunpack.c.l.b16 %v1225_v60  ;;  %v1228_v14 = vrot.slane %v5837_v19, 5 }
  0xa8   : > { %4757 = vmatmul.msk.bf16.gmra.mxu1 %vm747_vm3, %v5424_v24  ;;  %v2045_v24 = vsel %vm5693_vm2, %v2040_v29, %v2044_v15  ;;  %v2305_v41 = vunpack.c.l.b16 %v2035_v23  ;;  %v2084_v29 = vshrl.u32 %v4983_v2, 16  ;;  %v4985_v2 = vld [vmem:[%s5672_s25 + $0x6c] sm:$0xf] }
  0xa9   : > { %v2306_v42 = vunpack.c.l.b16 %v2045_v24  ;;  %v1336_v9 = vpack.c.b16 %v1311_v62, %v1310_v61  ;;  %v2076_v24 = vrot.slane %v2074_v12, 5  ;;  %v1230_v28 = vrot.slane %v1228_v14, 4  ;;  %v5497_v62 = vld [vmem:[%s7140_s1 + $0xe8] sm:$0xff]  ;;  %v5546_v12 = vld [vmem:[%s5672_s25 + $0x64] sm:$0xf] }
  0xaa   : > { %v6031_v37 = vpop.f32.mrf.mxu0  ;;  %v2086_v31 = vrot.slane %v2084_v29, 4  ;;  %v2092_v61 = vrot.slane %v2090_v49, 5  ;;  %3844 = vmatpush.bf16.msra.mxu3 %v5497_v62  ;;  %v1235_v13 = vrot.slane %v5546_v12, 5  ;;  %v1134_v29 = vld [vmem:[%s5672_s25 + $0x60] sm:$0xe] }
  0xab   : > { %v6037_v40 = vpop.f32.mrf.mxu3  ;;  %v2332_v55 = vpack.c.b16 %v2306_v42, %v2305_v41  ;;  %v1232_v63 = vsel %vm5911_vm6, %v1230_v28, %v1231_v30  ;;  %v5455_v28 = vld [vmem:[%s5672_s25 + $0x60] sm:$0xff]  ;;  %v4987_v49 = vld [vmem:[%s5672_s25 + $0x74] sm:$0x1] }
  0xad   : > { %4813 = vmatmul.msk.bf16.gmra.mxu2 %vm747_vm3, %v1334_v38 }
  0xaf   : > { %v6043_v54 = vpop.f32.mrf.mxu1  ;;  %v6046_v58 = vpop.f32.mrf.mxu2 }
  0xb2   : > { %4949 = vmatmul.msk.bf16.gmra.mxu3 %vm747_vm3, %v5452_v52  ;;  %v6054_v5 = vpop.f32.mrf.mxu0 }
  0xb3   : > { %v6056_v10 = vpop.f32.mrf.mxu3 }
  0xb7   : > { %5037 = vmatmul.msk.bf16.gmra.mxu0 %vm747_vm3, %v2331_v6  ;;  %v6060_v16 = vpop.f32.mrf.mxu1  ;;  %v2054_v6 = vrot.slane %v2053_v4, 4 }
  0xb8   : > { %4758 = vmatmul.msk.bf16.gmra.mxu1 %vm747_vm3, %v5425_v11  ;;  %v2071_v11 = vshrl.u32 %v4982_v0, 16  ;;  %v5473_v0 = vld [vmem:[%s7140_s1 + $0xa8] sm:$0xff] }
  0xb9   : > { %v2059_v20 = vsel %vm5693_vm2, %v2054_v6, %v2058_v45  ;;  %v2087_v45 = vor.u32 %v2086_v31, %v2082_v34  ;;  %v4986_v6 = vld [vmem:[%s5672_s25 + $0x70] sm:$0xf]  ;;  %2847 = vmatpush.bf16.msra.mxu1 %v5473_v0 }
  0xba   : > { %v6063_v18 = vpop.f32.mrf.mxu2  ;;  %v2073_v23 = vrot.slane %v2071_v11, 4  ;;  %v2104_v21 = vshll.u32 %v4986_v6, 16 }
  0xbb   : > { %v2088_v59 = vrot.slane %v2087_v45, 4 }
  0xbc   : > { %v2077_v42 = vor.u32 %v2076_v24, %v2073_v23  ;;  %v2108_v23 = vshrl.u32 %v4986_v6, 16  ;;  %v5501_v24 = vld [vmem:[%s7140_s1 + $0x108] sm:$0xff] }
  0xbd   : > { %4814 = vmatmul.msk.bf16.gmra.mxu2 %vm747_vm3, %v1335_v17  ;;  %v1133_v17 = vld [vmem:[%s5672_s25 + $0x54] sm:$0xe]  ;;  %v2093_v11 = vsel %vm5693_vm2, %v2088_v59, %v2092_v61  ;;  %4270 = vmatpush.bf16.msra.mxu0 %v5501_v24  ;;  %v5428_v61 = vld [vmem:[%s5672_s25 + $0x60] sm:$0xff] }
  0xbe   : > { %v6073_v35 = vpop.f32.mrf.mxu0  ;;  %v4776_v19 = vrot.slane %v1133_v17, 9  ;;  %v2078_v57 = vrot.slane %v2077_v42, 4  ;;  %v2095_v17 = vshrl.u32 %v4985_v2, 16  ;;  %v2310_v31 = vunpack.c.l.b16 %v2093_v11 }
  0xbf   : > { %v6077_v38 = vpop.f32.mrf.mxu3 }
  0xc0   : > { %v1229_v43 = vsel %vm5911_vm6, %v4776_v19, %v1228_v14  ;;  %v2097_v39 = vrot.slane %v2095_v17, 4  ;;  %v4988_v17 = vld [vmem:[%s5672_s25 + $0x78] sm:$0xf] }
  0xc1   : > { %v6080_v50 = vpop.f32.mrf.mxu1 }
  0xc2   : > { %4950 = vmatmul.msk.bf16.gmra.mxu3 %vm747_vm3, %v5453_v36  ;;  %v6084_v52 = vpop.f32.mrf.mxu2  ;;  %v2307_v36 = vunpack.c.l.b16 %v2059_v20  ;;  %v2098_v20 = vshll.u32 %v4985_v2, 16 }
  0xc4   : > { %v2333_v33 = vpack.c.b16 %v2308_v44, %v2307_v36  ;;  %v4777_v36 = vrot.slane %v1134_v29, 9  ;;  %v1237_v44 = vrot.slane %v1235_v13, 4  ;;  %v2100_v42 = vrot.slane %v2098_v20, 5  ;;  %v4989_v20 = vld [vmem:[%s5672_s25 + $0x7c] sm:$0xf] }
  0xc6   : > { %v6091_v1 = vpop.f32.mrf.mxu0 }
  0xc7   : > { %5038 = vmatmul.msk.bf16.gmra.mxu0 %vm747_vm3, %v2332_v55  ;;  %v6096_v3 = vpop.f32.mrf.mxu3  ;;  %v1312_v55 = vunpack.c.l.b16 %v1229_v43  ;;  %v2106_v43 = vrot.slane %v2104_v21, 5  ;;  %v5548_v21 = vld [vmem:[%s5672_s25 + $0x70] sm:$0xf] }
  0xc8   : > { %4759 = vmatmul.msk.bf16.gmra.mxu1 %vm747_vm3, %v5426_v56  ;;  %v1313_v56 = vunpack.c.l.b16 %v1232_v63  ;;  %v2110_v63 = vrot.slane %v2108_v23, 4  ;;  %v1242_v23 = vrot.slane %v5548_v21, 5 }
  0xc9   : > { %v6100_v15 = vpop.f32.mrf.mxu1 }
  0xca   : > { %v1337_v7 = vpack.c.b16 %v1313_v56, %v1312_v55  ;;  %v2101_v55 = vor.u32 %v2100_v42, %v2097_v39  ;;  %v2111_v56 = vor.u32 %v2110_v63, %v2106_v43  ;;  %v5549_v42 = vld [vmem:[%s5672_s25 + $0x74] sm:$0x1] }
  0xcb   : > { %v1245_v63 = vrot.slane %v5549_v42, 5 }
  0xcc   : > { %v2112_v11 = vrot.slane %v2111_v56, 4 }
  0xcd   : > { %v6107_v22 = vpop.f32.mrf.mxu2  ;;  %4815 = vmatmul.msk.bf16.gmra.mxu2 %vm747_vm3, %v1336_v9  ;;  %v2083_v9 = vsel %vm5693_vm2, %v2078_v57, %v2082_v34  ;;  %v2114_v57 = vshll.u32 %v4987_v49, 16  ;;  %v5456_v49 = vld [vmem:[%s5672_s25 + $0x6c] sm:$0xff] }
  0xce   : > { %v2309_v30 = vunpack.c.l.b16 %v2083_v9  ;;  %v2102_v9 = vrot.slane %v2101_v55, 4 }
  0xcf   : > { %v2116_v12 = vrot.slane %v2114_v57, 5 }
  0xd0   : > { %v6113_v47 = vpop.f32.mrf.mxu0  ;;  %v2334_v53 = vpack.c.b16 %v2310_v31, %v2309_v30  ;;  %v2107_v24 = vsel %vm5693_vm2, %v2102_v9, %v2106_v43  ;;  %v2122_v30 = vshll.u32 %v4988_v17, 16  ;;  %v2128_v31 = vshll.u32 %v4989_v20, 16  ;;  %v4990_v9 = vld [vmem:[%s5672_s25 + $0x80] sm:$0x1] }
  0xd1   : > { %v6115_v41 = vpop.f32.mrf.mxu3 }
  0xd2   : > { %4951 = vmatmul.msk.bf16.gmra.mxu3 %vm747_vm3, %v5454_v46  ;;  %v5547_v46 = vld [vmem:[%s5672_s25 + $0x68] sm:$0x1] }
  0xd3   : > { %v1238_v19 = vrot.slane %v5547_v46, 5  ;;  %v1135_v46 = vld [vmem:[%s5672_s25 + $0x6c] sm:$0xe] }
  0xd5   : > { %v6126_v60 = vpop.f32.mrf.mxu1  ;;  %v6128_v4 = vpop.f32.mrf.mxu2 }
  0xd7   : > { %5039 = vmatmul.msk.bf16.gmra.mxu0 %vm747_vm3, %v2333_v33  ;;  %v1236_v33 = vsel %vm5911_vm6, %v4777_v36, %v1235_v13  ;;  %v2132_v36 = vshrl.u32 %v4989_v20, 16 }
  0xd8   : > { %4760 = vmatmul.msk.bf16.gmra.mxu1 %vm747_vm3, %v5427_v51  ;;  %v6140_v8 = vpop.f32.mrf.mxu0  ;;  %v1239_v51 = vsel %vm5911_vm6, %v1237_v44, %v1238_v19  ;;  %v1314_v2 = vunpack.c.l.b16 %v1236_v33  ;;  %v4778_v33 = vrot.slane %v1135_v46, 9 }
  0xd9   : > { %v6147_v14 = vpop.f32.mrf.mxu3  ;;  %v1315_v6 = vunpack.c.l.b16 %v1239_v51  ;;  %v1244_v51 = vrot.slane %v1242_v23, 4 }
  0xdb   : > { %v1338_v29 = vpack.c.b16 %v1315_v6, %v1314_v2  ;;  %v2134_v2 = vrot.slane %v2132_v36, 4 }
  0xdd   : > { %4816 = vmatmul.msk.bf16.gmra.mxu2 %vm747_vm3, %v1337_v7  ;;  %v6155_v34 = vpop.f32.mrf.mxu1 }
  0xe0   : > { %v6158_v45 = vpop.f32.mrf.mxu2 }
  0xe2   : > { %4952 = vmatmul.msk.bf16.gmra.mxu3 %vm747_vm3, %v5455_v28  ;;  %v2119_v28 = vshrl.u32 %v4988_v17, 16  ;;  %v5429_v17 = vld [vmem:[%s5672_s25 + $0x6c] sm:$0xff] }
  0xe4   : > { %v6166_v59 = vpop.f32.mrf.mxu0  ;;  %v2121_v57 = vrot.slane %v2119_v28, 4 }
  0xe5   : > { %v6169_v62 = vpop.f32.mrf.mxu3  ;;  %v1046_v0 = vpop.f32.mrf.mxu1 }
  0xe6   : > { %v1047_v7 = vadd.f32 %v1046_v0, %v6031_v37  ;;  %v2117_v37 = vsel %vm5693_vm2, %v2112_v11, %v2116_v12  ;;  %v2130_v0 = vrot.slane %v2128_v31, 5  ;;  %v1243_v11 = vsel %vm5911_vm6, %v4778_v33, %v1242_v23 }
  0xe7   : > { %5040 = vmatmul.msk.bf16.gmra.mxu0 %vm747_vm3, %v2334_v53  ;;  %v2311_v53 = vunpack.c.l.b16 %v2107_v24  ;;  %v2312_v55 = vunpack.c.l.b16 %v2117_v37  ;;  %v2138_v24 = vshll.u32 %v4990_v9, 16 }
  0xe8   : > { %v6173_v13 = vpop.f32.mrf.mxu2  ;;  %4761 = vmatmul.msk.bf16.gmra.mxu1 %vm747_vm3, %v5428_v61  ;;  %v2124_v61 = vrot.slane %v2122_v30, 5  ;;  %v2135_v21 = vor.u32 %v2134_v2, %v2130_v0 }
  0xe9   : > { %v2335_v12 = vpack.c.b16 %v2312_v55, %v2311_v53  ;;  %v2140_v42 = vrot.slane %v2138_v24, 5  ;;  %v4992_v53 = vld [vmem:[%s5672_s25 + $0x88] sm:$0xf]  ;;  %v5550_v55 = vld [vmem:[%s5672_s25 + $0x7c] sm:$0xf] }
  0xea   : > { %v2125_v20 = vor.u32 %v2124_v61, %v2121_v57  ;;  %v1136_v57 = vld [vmem:[%s5672_s25 + $0x78] sm:$0xe] }
  0xec   : > { %v6184_v19 = vpop.f32.mrf.mxu0  ;;  %v2126_v36 = vrot.slane %v2125_v20, 4 }
  0xed   : > { %v6186_v44 = vpop.f32.mrf.mxu3  ;;  %4817 = vmatmul.msk.bf16.gmra.mxu2 %vm747_vm3, %v1338_v29  ;;  %v1048_v39 = vpop.f32.mrf.mxu1 }
  0xee   : > { %v1049_v43 = vadd.f32 %v1048_v39, %v6054_v5  ;;  %v1246_v5 = vsel %vm5911_vm6, %v1244_v51, %v1245_v63  ;;  %v2136_v39 = vrot.slane %v2135_v21, 4  ;;  %v4991_v63 = vld [vmem:[%s5672_s25 + $0x84] sm:$0xf]  ;;  %v5457_v21 = vld [vmem:[%s5672_s25 + $0x78] sm:$0xff] }
  0xef   : > { %v1317_v28 = vunpack.c.l.b16 %v1246_v5  ;;  %v2146_v61 = vshll.u32 %v4991_v63, 16  ;;  %v2156_v5 = vshrl.u32 %v4992_v53, 16 }
  0xf0   : > { %v1427_v56 = vpop.f32.mrf.mxu2  ;;  %v2141_v9 = vsel %vm5693_vm2, %v2136_v39, %v2140_v42 }
  0xf1   : > { %v1507_v6 = vadd.f32 %v1427_v56, %v1047_v7  ;;  %v1316_v7 = vunpack.c.l.b16 %v1243_v11  ;;  %v1249_v56 = vrot.slane %v5550_v55, 5  ;;  %v2152_v11 = vshll.u32 %v4992_v53, 16 }
  0xf2   : > { %4953 = vmatmul.msk.bf16.gmra.mxu3 %vm747_vm3, %v5456_v49  ;;  %v2158_v39 = vrot.slane %v2156_v5, 4 }
  0xf3   : > { %v1339_v51 = vpack.c.b16 %v1317_v28, %v1316_v7 }
  0xf4   : > { %v2424_v29 = vpop.f32.mrf.mxu0 }
  0xf5   : > { %v1742_v37 = vpop.f32.mrf.mxu3  ;;  %v1051_v46 = vpop.f32.mrf.mxu1 }
  0xf6   : > { %v1822_v30 = vadd.f32 %v1742_v37, %v1507_v6  ;;  %v1052_v23 = vadd.f32 %v1051_v46, %v6073_v35  ;;  %v2143_v35 = vshrl.u32 %v4991_v63, 16  ;;  %v2131_v6 = vsel %vm5693_vm2, %v2126_v36, %v2130_v0 }
  0xf7   : > { %5041 = vmatmul.msk.bf16.gmra.mxu0 %vm747_vm3, %v2335_v12  ;;  %v5551_v12 = vld [vmem:[%s5672_s25 + $0x80] sm:$0x1]  ;;  %v4779_v37 = vrot.slane %v1136_v57, 9  ;;  %v1251_v46 = vrot.slane %v1249_v56, 4  ;;  %v2313_v7 = vunpack.c.l.b16 %v2131_v6  ;;  %v2314_v0 = vunpack.c.l.b16 %v2141_v9 }
  0xf8   : > { %v1429_v31 = vpop.f32.mrf.mxu2  ;;  %4762 = vmatmul.msk.bf16.gmra.mxu1 %vm747_vm3, %v5429_v17  ;;  %v6203_v49 = vadd.f32 %v2424_v29, %v1822_v30  ;;  %v1252_v29 = vrot.slane %v5551_v12, 5  ;;  %v2145_v28 = vrot.slane %v2143_v35, 4  ;;  %v2148_v30 = vrot.slane %v2146_v61, 5  ;;  %v5430_v35 = vld [vmem:[%s5672_s25 + $0x78] sm:$0xff] }
  0xf9   : > { %v1508_v33 = vadd.f32 %v1429_v31, %v1049_v43  ;;  %v2154_v36 = vrot.slane %v2152_v11, 5  ;;  %v2336_v53 = vpack.c.b16 %v2314_v0, %v2313_v7  ;;  %v4995_v7 = vld [vmem:[%s5672_s25 + $0x94] sm:$0xf]  ;;  %v5552_v0 = vld [vmem:[%s5672_s25 + $0x88] sm:$0xf] }
  0xfa   : > { %v2149_v55 = vor.u32 %v2148_v30, %v2145_v28  ;;  %v1256_v28 = vrot.slane %v5552_v0, 5  ;;  %v1137_v30 = vld [vmem:[%s5672_s25 + $0x84] sm:$0xe] }
  0xfb   : > { %v2159_v61 = vor.u32 %v2158_v39, %v2154_v36 }
  0xfc   : > { %v2426_v2 = vpop.f32.mrf.mxu0  ;;  %v2150_v12 = vrot.slane %v2149_v55, 4 }
  0xfd   : > { %v1744_v43 = vpop.f32.mrf.mxu3  ;;  %4818 = vmatmul.msk.bf16.gmra.mxu2 %vm747_vm3, %v1339_v51  ;;  %v1053_v17 = vpop.f32.mrf.mxu1  ;;  %v4993_v51 = vld [vmem:[%s5672_s25 + $0x8c] sm:$0x1] }
  0xfe   : > { %v1823_v20 = vadd.f32 %v1744_v43, %v1508_v33  ;;  %v1054_v24 = vadd.f32 %v1053_v17, %v6091_v1  ;;  %v1250_v33 = vsel %vm5911_vm6, %v4779_v37, %v1249_v56  ;;  %v1253_v1 = vsel %vm5911_vm6, %v1251_v46, %v1252_v29 }
  0xff   : > { %v2162_v6 = vshll.u32 %v4993_v51, 16  ;;  %v1319_v11 = vunpack.c.l.b16 %v1253_v1  ;;  %v2160_v43 = vrot.slane %v2159_v61, 4  ;;  %v2180_v1 = vshrl.u32 %v4995_v7, 16  ;;  %v5458_v61 = vld [vmem:[%s5672_s25 + $0x84] sm:$0xff] }
 0x100   : > { %v1432_v31 = vpop.f32.mrf.mxu2  ;;  %v6216_v42 = vadd.f32 %v2426_v2, %v1823_v20  ;;  %v4994_v20 = vld [vmem:[%s5672_s25 + $0x90] sm:$0xf] }
 0x101   : > { %v1509_v63 = vadd.f32 %v1432_v31, %v1052_v23  ;;  %v1318_v23 = vunpack.c.l.b16 %v1250_v33  ;;  %v2164_v17 = vrot.slane %v2162_v6, 5  ;;  %v2167_v31 = vshrl.u32 %v4994_v20, 16 }
 0x102   : > { %4954 = vmatmul.msk.bf16.gmra.mxu3 %vm747_vm3, %v5457_v21  ;;  %v2170_v51 = vshll.u32 %v4994_v20, 16  ;;  %v2176_v33 = vshll.u32 %v4995_v7, 16  ;;  %v4780_v6 = vrot.slane %v1137_v30, 9 }
 0x103   : > { %v1340_v46 = vpack.c.b16 %v1319_v11, %v1318_v23  ;;  %v2169_v11 = vrot.slane %v2167_v31, 4 }
 0x104   : > { %v2429_v57 = vpop.f32.mrf.mxu0 }
 0x105   : > { %v1747_v9 = vpop.f32.mrf.mxu3  ;;  %v1056_v2 = vpop.f32.mrf.mxu1 }
 0x106   : > { %v1824_v5 = vadd.f32 %v1747_v9, %v1509_v63  ;;  %v1057_v56 = vadd.f32 %v1056_v2, %v6113_v47  ;;  %v2155_v47 = vsel %vm5693_vm2, %v2150_v12, %v2154_v36  ;;  %v2165_v63 = vsel %vm5693_vm2, %v2160_v43, %v2164_v17 }
 0x107   : > { %5042 = vmatmul.msk.bf16.gmra.mxu0 %vm747_vm3, %v2336_v53  ;;  %v5553_v53 = vld [vmem:[%s5672_s25 + $0x8c] sm:$0x1]  ;;  %v1258_v9 = vrot.slane %v1256_v28, 4  ;;  %v2315_v2 = vunpack.c.l.b16 %v2155_v47  ;;  %v2316_v23 = vunpack.c.l.b16 %v2165_v63  ;;  %v2172_v12 = vrot.slane %v2170_v51, 5  ;;  %v5431_v47 = vld [vmem:[%s5672_s25 + $0x84] sm:$0xff] }
 0x108   : > { %v1434_v29 = vpop.f32.mrf.mxu2  ;;  %4763 = vmatmul.msk.bf16.gmra.mxu1 %vm747_vm3, %v5430_v35  ;;  %v6229_v21 = vadd.f32 %v2429_v57, %v1824_v5  ;;  %v1259_v55 = vrot.slane %v5553_v53, 5  ;;  %v2182_v43 = vrot.slane %v2180_v1, 4 }
 0x109   : > { %v1510_v37 = vadd.f32 %v1434_v29, %v1054_v24  ;;  %v2178_v29 = vrot.slane %v2176_v33, 5  ;;  %v2337_v7 = vpack.c.b16 %v2316_v23, %v2315_v2  ;;  %v2173_v30 = vor.u32 %v2172_v12, %v2169_v11  ;;  %v4998_v11 = vld [vmem:[%s5672_s25 + $0xa0] sm:$0xf] }
 0x10b   : > { %v2183_v31 = vor.u32 %v2182_v43, %v2178_v29  ;;  %v5554_v43 = vld [vmem:[%s5672_s25 + $0x94] sm:$0xf] }
 0x10c   : > { %v2431_v39 = vpop.f32.mrf.mxu0 }
 0x10d   : > { %v1749_v24 = vpop.f32.mrf.mxu3  ;;  %4819 = vmatmul.msk.bf16.gmra.mxu2 %vm747_vm3, %v1340_v46  ;;  %v1058_v57 = vpop.f32.mrf.mxu1  ;;  %v4996_v46 = vld [vmem:[%s5672_s25 + $0x98] sm:$0x1] }
 0x10e   : > { %v1825_v35 = vadd.f32 %v1749_v24, %v1510_v37  ;;  %v1059_v36 = vadd.f32 %v1058_v57, %v6140_v8  ;;  %v1257_v37 = vsel %vm5911_vm6, %v4780_v6, %v1256_v28  ;;  %v1260_v8 = vsel %vm5911_vm6, %v1258_v9, %v1259_v55  ;;  %v4997_v55 = vld [vmem:[%s5672_s25 + $0x9c] sm:$0xf]  ;;  %v5496_v24 = vld [vmem:[%s7140_s1 + $0xe0] sm:$0xff] }
 0x10f   : > { %v2186_v63 = vshll.u32 %v4996_v46, 16  ;;  %v1320_v33 = vunpack.c.l.b16 %v1257_v37  ;;  %v1321_v1 = vunpack.c.l.b16 %v1260_v8  ;;  %v5472_v57 = vld [vmem:[%s7140_s1 + $0xa0] sm:$0xff]  ;;  %v2184_v6 = vrot.slane %v2183_v31, 4  ;;  %3845 = vmatpush.bf16.msra.mxu3 %v5496_v24  ;;  %v1138_v46 = vld [vmem:[%s5672_s25 + $0x90] sm:$0xe] }
 0x110   : > { %v1437_v5 = vpop.f32.mrf.mxu2  ;;  %v6242_v17 = vadd.f32 %v2431_v39, %v1825_v35  ;;  %v2194_v12 = vshll.u32 %v4997_v55, 16  ;;  %2848 = vmatpush.bf16.msra.mxu1 %v5472_v57 }
 0x111   : > { %v1511_v20 = vadd.f32 %v1437_v5, %v1057_v56  ;;  %v5492_v56 = vld [vmem:[%s7140_s1 + $0xc0] sm:$0xff]  ;;  %v1341_v23 = vpack.c.b16 %v1321_v1, %v1320_v33  ;;  %v2191_v5 = vshrl.u32 %v4997_v55, 16 }
 0x112   : > { %4955 = vmatmul.msk.bf16.gmra.mxu3 %vm747_vm3, %v5458_v61  ;;  %3163 = vmatpush.bf16.msra.mxu2 %v5492_v56  ;;  %v2174_v61 = vrot.slane %v2173_v30, 4  ;;  %v5555_v30 = vld [vmem:[%s5672_s25 + $0x98] sm:$0x1] }
 0x113   : > { %v1266_v31 = vrot.slane %v5555_v30, 5 }
 0x114   : > { %v2434_v0 = vpop.f32.mrf.mxu0  ;;  %v2179_v8 = vsel %vm5693_vm2, %v2174_v61, %v2178_v29  ;;  %v5459_v29 = vld [vmem:[%s5672_s25 + $0x90] sm:$0xff] }
 0x115   : > { %v1752_v39 = vpop.f32.mrf.mxu3  ;;  %v1061_v51 = vpop.f32.mrf.mxu1  ;;  %v2317_v24 = vunpack.c.l.b16 %v2179_v8 }
 0x116   : > { %v1826_v28 = vadd.f32 %v1752_v39, %v1511_v20  ;;  %v1062_v53 = vadd.f32 %v1061_v51, %v6166_v59  ;;  %v2188_v59 = vrot.slane %v2186_v63, 5  ;;  %v1263_v20 = vrot.slane %v5554_v43, 5 }
 0x117   : > { %5043 = vmatmul.msk.bf16.gmra.mxu0 %vm747_vm3, %v2337_v7  ;;  %v2193_v39 = vrot.slane %v2191_v5, 4  ;;  %v2196_v51 = vrot.slane %v2194_v12, 5 }
 0x118   : > { %v1439_v35 = vpop.f32.mrf.mxu2  ;;  %4764 = vmatmul.msk.bf16.gmra.mxu1 %vm747_vm3, %v5431_v47  ;;  %v6264_v9 = vadd.f32 %v2434_v0, %v1826_v28  ;;  %v2189_v7 = vsel %vm5693_vm2, %v2184_v6, %v2188_v59  ;;  %v2200_v0 = vshll.u32 %v4998_v11, 16  ;;  %v5500_v47 = vld [vmem:[%s7140_s1 + $0x100] sm:$0xff]  ;;  %v4781_v28 = vrot.slane %v1138_v46, 9  ;;  %v5432_v46 = vld [vmem:[%s5672_s25 + $0x90] sm:$0xff] }
 0x119   : > { %v1512_v2 = vadd.f32 %v1439_v35, %v1059_v36  ;;  %v2204_v36 = vshrl.u32 %v4998_v11, 16  ;;  %v1265_v55 = vrot.slane %v1263_v20, 4  ;;  %4271 = vmatpush.bf16.msra.mxu0 %v5500_v47  ;;  %v2318_v57 = vunpack.c.l.b16 %v2189_v7  ;;  %v4999_v11 = vld [vmem:[%s5672_s25 + $0xa4] sm:$0x1] }
 0x11a   : > { %v2202_v61 = vrot.slane %v2200_v0, 5  ;;  %v2197_v5 = vor.u32 %v2196_v51, %v2193_v39  ;;  %v2210_v7 = vshll.u32 %v4999_v11, 16  ;;  %v5001_v39 = vld [vmem:[%s5672_s25 + $0xac] sm:$0xf] }
 0x11b   : > { %v2206_v6 = vrot.slane %v2204_v36, 4  ;;  %v2338_v12 = vpack.c.b16 %v2318_v57, %v2317_v24  ;;  %v5556_v24 = vld [vmem:[%s5672_s25 + $0xa0] sm:$0xf]  ;;  %v2228_v11 = vshrl.u32 %v5001_v39, 16 }
 0x11c   : > { %v2436_v37 = vpop.f32.mrf.mxu0  ;;  %v2198_v30 = vrot.slane %v2197_v5, 4  ;;  %v1270_v57 = vrot.slane %v5556_v24, 5  ;;  %v5557_v5 = vld [vmem:[%s5672_s25 + $0xa4] sm:$0x1] }
 0x11d   : > { %v1754_v63 = vpop.f32.mrf.mxu3  ;;  %4820 = vmatmul.msk.bf16.gmra.mxu2 %vm747_vm3, %v1341_v23  ;;  %v1063_v56 = vpop.f32.mrf.mxu1  ;;  %v2207_v8 = vor.u32 %v2206_v6, %v2202_v61  ;;  %v1139_v6 = vld [vmem:[%s5672_s25 + $0x9c] sm:$0xe] }
 0x11e   : > { %v1827_v33 = vadd.f32 %v1754_v63, %v1512_v2  ;;  %v1064_v1 = vadd.f32 %v1063_v56, %v6184_v19  ;;  %v1264_v2 = vsel %vm5911_vm6, %v4781_v28, %v1263_v20  ;;  %v1267_v19 = vsel %vm5911_vm6, %v1265_v55, %v1266_v31  ;;  %v5000_v63 = vld [vmem:[%s5672_s25 + $0xa8] sm:$0xf] }
 0x11f   : > { %v1323_v36 = vunpack.c.l.b16 %v1267_v19  ;;  %v2208_v31 = vrot.slane %v2207_v8, 4  ;;  %v2212_v56 = vrot.slane %v2210_v7, 5  ;;  %v2215_v28 = vshrl.u32 %v5000_v63, 16  ;;  %v5460_v7 = vld [vmem:[%s5672_s25 + $0x9c] sm:$0xff] }
 0x120   : > { %v1442_v35 = vpop.f32.mrf.mxu2  ;;  %v6280_v59 = vadd.f32 %v2436_v37, %v1827_v33  ;;  %v2203_v55 = vsel %vm5693_vm2, %v2198_v30, %v2202_v61 }
 0x121   : > { %v1513_v23 = vadd.f32 %v1442_v35, %v1062_v53  ;;  %v1322_v53 = vunpack.c.l.b16 %v1264_v2  ;;  %v2218_v35 = vshll.u32 %v5000_v63, 16  ;;  %v2213_v19 = vsel %vm5693_vm2, %v2208_v31, %v2212_v56  ;;  %v5002_v56 = vld [vmem:[%s5672_s25 + $0xb0] sm:$0x1] }
 0x122   : > { %4956 = vmatmul.msk.bf16.gmra.mxu3 %vm747_vm3, %v5459_v29  ;;  %v2217_v61 = vrot.slane %v2215_v28, 4  ;;  %v2320_v30 = vunpack.c.l.b16 %v2213_v19 }
 0x123   : > { %v1342_v29 = vpack.c.b16 %v1323_v36, %v1322_v53  ;;  %v1272_v53 = vrot.slane %v1270_v57, 4  ;;  %v2220_v36 = vrot.slane %v2218_v35, 5 }
 0x124   : > { %v2439_v43 = vpop.f32.mrf.mxu0 }
 0x125   : > { %v1757_v37 = vpop.f32.mrf.mxu3  ;;  %v1066_v0 = vpop.f32.mrf.mxu1  ;;  %v2221_v28 = vor.u32 %v2220_v36, %v2217_v61 }
 0x126   : > { %v1828_v47 = vadd.f32 %v1757_v37, %v1513_v23  ;;  %v2224_v23 = vshll.u32 %v5001_v39, 16  ;;  %v4782_v37 = vrot.slane %v1139_v6, 9  ;;  %v5433_v6 = vld [vmem:[%s5672_s25 + $0x9c] sm:$0xff] }
 0x127   : > { %5044 = vmatmul.msk.bf16.gmra.mxu0 %vm747_vm3, %v2338_v12  ;;  %v1273_v12 = vrot.slane %v5557_v5, 5 }
 0x128   : > { %v1444_v20 = vpop.f32.mrf.mxu2  ;;  %4765 = vmatmul.msk.bf16.gmra.mxu1 %vm747_vm3, %v5432_v46  ;;  %v6293_v51 = vadd.f32 %v2439_v43, %v1828_v47  ;;  %v2319_v43 = vunpack.c.l.b16 %v2203_v55  ;;  %v1067_v47 = vadd.f32 %v1066_v0, %v6007_v48  ;;  %v2226_v63 = vrot.slane %v2224_v23, 5 }
 0x129   : > { %v1514_v33 = vadd.f32 %v1444_v20, %v1064_v1  ;;  %v2230_v20 = vrot.slane %v2228_v11, 4  ;;  %v2234_v55 = vshll.u32 %v5002_v56, 16 }
 0x12a   : > { %v2339_v48 = vpack.c.b16 %v2320_v30, %v2319_v43  ;;  %v5003_v43 = vld [vmem:[%s5672_s25 + $0xb4] sm:$0xf] }
 0x12b   : > { %v2231_v0 = vor.u32 %v2230_v20, %v2226_v63  ;;  %v2236_v61 = vrot.slane %v2234_v55, 5  ;;  %v2242_v56 = vshll.u32 %v5003_v43, 16 }
 0x12c   : > { %v2441_v2 = vpop.f32.mrf.mxu0 }
 0x12d   : > { %v1759_v1 = vpop.f32.mrf.mxu3  ;;  %4821 = vmatmul.msk.bf16.gmra.mxu2 %vm747_vm3, %v1342_v29  ;;  %v1068_v46 = vpop.f32.mrf.mxu1  ;;  %v1274_v29 = vsel %vm5911_vm6, %v1272_v53, %v1273_v12  ;;  %v2232_v12 = vrot.slane %v2231_v0, 4 }
 0x12e   : > { %v1829_v8 = vadd.f32 %v1759_v1, %v1514_v33  ;;  %v1271_v33 = vsel %vm5911_vm6, %v4782_v37, %v1270_v57  ;;  %v1325_v19 = vunpack.c.l.b16 %v1274_v29  ;;  %v2222_v1 = vrot.slane %v2221_v28, 4  ;;  %v5559_v28 = vld [vmem:[%s5672_s25 + $0xb0] sm:$0x1] }
 0x12f   : > { %v1069_v57 = vadd.f32 %v1068_v46, %v6023_v26  ;;  %v2239_v26 = vshrl.u32 %v5003_v43, 16  ;;  %v2237_v46 = vsel %vm5693_vm2, %v2232_v12, %v2236_v61 }
 0x130   : > { %v1447_v31 = vpop.f32.mrf.mxu2  ;;  %v6306_v39 = vadd.f32 %v2441_v2, %v1829_v8  ;;  %v1324_v2 = vunpack.c.l.b16 %v1271_v33  ;;  %v2227_v20 = vsel %vm5693_vm2, %v2222_v1, %v2226_v63 }
 0x131   : > { %v1515_v24 = vadd.f32 %v1447_v31, %v1067_v47  ;;  %v5558_v47 = vld [vmem:[%s5672_s25 + $0xac] sm:$0xf]  ;;  %v1140_v31 = vld [vmem:[%s5672_s25 + $0xa8] sm:$0xe] }
 0x132   : > { %4957 = vmatmul.msk.bf16.gmra.mxu3 %vm747_vm3, %v5460_v7  ;;  %v5004_v7 = vld [vmem:[%s5672_s25 + $0xb8] sm:$0xf]  ;;  %v1343_v36 = vpack.c.b16 %v1325_v19, %v1324_v2  ;;  %v1277_v30 = vrot.slane %v5558_v47, 5  ;;  %v2321_v2 = vunpack.c.l.b16 %v2227_v20  ;;  %v2322_v19 = vunpack.c.l.b16 %v2237_v46  ;;  %v5005_v47 = vld [vmem:[%s5672_s25 + $0xbc] sm:$0x1] }
 0x133   : > { %v2252_v33 = vshrl.u32 %v5004_v7, 16 }
 0x134   : > { %v2444_v35 = vpop.f32.mrf.mxu0 }
 0x135   : > { %v1762_v23 = vpop.f32.mrf.mxu3  ;;  %v1071_v11 = vpop.f32.mrf.mxu1  ;;  %v2254_v61 = vrot.slane %v2252_v33, 4 }
 0x136   : > { %v1830_v5 = vadd.f32 %v1762_v23, %v1515_v24  ;;  %v2248_v24 = vshll.u32 %v5004_v7, 16  ;;  %v5461_v23 = vld [vmem:[%s5672_s25 + $0xa8] sm:$0xff]  ;;  %v1072_v1 = vadd.f32 %v1071_v11, %v6043_v54  ;;  %v2340_v54 = vpack.c.b16 %v2322_v19, %v2321_v2 }
 0x137   : > { %5045 = vmatmul.msk.bf16.gmra.mxu0 %vm747_vm3, %v2339_v48  ;;  %v1280_v48 = vrot.slane %v5559_v28, 5 }
 0x138   : > { %v1449_v8 = vpop.f32.mrf.mxu2  ;;  %4766 = vmatmul.msk.bf16.gmra.mxu1 %vm747_vm3, %v5433_v6  ;;  %v6319_v37 = vadd.f32 %v2444_v35, %v1830_v5  ;;  %v4783_v35 = vrot.slane %v1140_v31, 9  ;;  %v1279_v6 = vrot.slane %v1277_v30, 4  ;;  %v2241_v5 = vrot.slane %v2239_v26, 4  ;;  %v5434_v26 = vld [vmem:[%s5672_s25 + $0xa8] sm:$0xff] }
 0x139   : > { %v1516_v53 = vadd.f32 %v1449_v8, %v1069_v57  ;;  %v2244_v57 = vrot.slane %v2242_v56, 5  ;;  %v6331_v12 = vrot.slane %v2248_v24, 5  ;;  %v2258_v24 = vshll.u32 %v5005_v47, 16 }
 0x13b   : > { %v2245_v11 = vor.u32 %v2244_v57, %v2241_v5  ;;  %v2255_v20 = vor.u32 %v2254_v61, %v6331_v12  ;;  %v2260_v5 = vrot.slane %v2258_v24, 5 }
 0x13c   : > { %v2446_v29 = vpop.f32.mrf.mxu0 }
 0x13d   : > { %v1764_v0 = vpop.f32.mrf.mxu3  ;;  %4822 = vmatmul.msk.bf16.gmra.mxu2 %vm747_vm3, %v1343_v36  ;;  %v1073_v55 = vpop.f32.mrf.mxu1  ;;  %v1278_v36 = vsel %vm5911_vm6, %v4783_v35, %v1277_v30  ;;  %v5006_v30 = vld [vmem:[%s5672_s25 + $0xc0] sm:$0xf]  ;;  %v5560_v35 = vld [vmem:[%s5672_s25 + $0x10] sm:$0xf] }
 0x13e   : > { %v1831_v63 = vadd.f32 %v1764_v0, %v1516_v53  ;;  %v1281_v53 = vsel %vm5911_vm6, %v1279_v6, %v1280_v48  ;;  %v1326_v46 = vunpack.c.l.b16 %v1278_v36  ;;  %v5007_v0 = vld [vmem:[%s5672_s25 + $0xc4] sm:$0xf]  ;;  %v2602_v48 = vrot.slane %v5560_v35, 5 }
 0x13f   : > { %v1327_v56 = vunpack.c.l.b16 %v1281_v53  ;;  %v1074_v6 = vadd.f32 %v1073_v55, %v6060_v16  ;;  %v2266_v57 = vshll.u32 %v5006_v30, 16  ;;  %v5561_v53 = vld [vmem:[%s5672_s25 + $0xb8] sm:$0xf]  ;;  %v1141_v55 = vld [vmem:[%s5672_s25 + $0xb4] sm:$0xe] }
 0x140   : > { %v1452_v43 = vpop.f32.mrf.mxu2  ;;  %v6333_v8 = vadd.f32 %v2446_v29, %v1831_v63  ;;  %v2246_v63 = vrot.slane %v2245_v11, 4  ;;  %v1284_v47 = vrot.slane %v5561_v53, 5  ;;  %v2604_v11 = vrot.slane %v2602_v48, 4  ;;  %v5462_v53 = vld [vmem:[%s5672_s25 + $0xb4] sm:$0xff] }
 0x141   : > { %v1517_v7 = vadd.f32 %v1452_v43, %v1072_v1  ;;  %v1344_v19 = vpack.c.b16 %v1327_v56, %v1326_v46  ;;  %v2263_v1 = vshrl.u32 %v5006_v30, 16  ;;  %v2272_v43 = vshll.u32 %v5007_v0, 16 }
 0x142   : > { %7147 = vst [vmem:[#allocation2_spill] sm:$0xff] %v6333_v8  ;;  %4958 = vmatmul.msk.bf16.gmra.mxu3 %vm747_vm3, %v5461_v23  ;;  %v2256_v23 = vrot.slane %v2255_v20, 4  ;;  %v5563_v20 = vld [vmem:[%s5672_s25 + $0x14] sm:$0x1]  ;;  %v2251_v46 = vsel %vm5693_vm2, %v2246_v63, %v6331_v12 }
 0x143   : > { %v2265_v30 = vrot.slane %v2263_v1, 4  ;;  %v2323_v63 = vunpack.c.l.b16 %v2251_v46 }
 0x144   : > { %v2449_v31 = vpop.f32.mrf.mxu0  ;;  %v2261_v56 = vsel %vm5693_vm2, %v2256_v23, %v2260_v5  ;;  %v5008_v5 = vld [vmem:[%s5672_s25 + $0xc8] sm:$0x1] }
 0x145   : > { %v1767_v33 = vpop.f32.mrf.mxu3  ;;  %v1076_v29 = vpop.f32.mrf.mxu1  ;;  %v2324_v23 = vunpack.c.l.b16 %v2261_v56  ;;  %v5435_v56 = vld [vmem:[%s5672_s25 + $0xb4] sm:$0xff] }
 0x146   : > { %v1832_v28 = vadd.f32 %v1767_v33, %v1517_v7  ;;  %v2276_v7 = vshrl.u32 %v5007_v0, 16  ;;  %v2605_v33 = vrot.slane %v5563_v20, 5  ;;  %v6361_v0 = vrot.slane %v2272_v43, 5 }
 0x147   : > { %5046 = vmatmul.msk.bf16.gmra.mxu0 %vm747_vm3, %v2340_v54  ;;  %v5562_v54 = vld [vmem:[%s5672_s25 + $0xbc] sm:$0x1]  ;;  %v1286_v20 = vrot.slane %v1284_v47, 4  ;;  %v1077_v12 = vadd.f32 %v1076_v29, %v6080_v50 }
 0x148   : > { %v1454_v2 = vpop.f32.mrf.mxu2  ;;  %4767 = vmatmul.msk.bf16.gmra.mxu1 %vm747_vm3, %v5434_v26  ;;  %v6349_v36 = vadd.f32 %v2449_v31, %v1832_v28  ;;  %v1287_v16 = vrot.slane %v5562_v54, 5  ;;  %v2268_v28 = vrot.slane %v2266_v57, 5  ;;  %v2278_v35 = vrot.slane %v2276_v7, 4 }
 0x149   : > { %v1518_v61 = vadd.f32 %v1454_v2, %v1074_v6  ;;  %v5049_v6 = vld [vmem:[%s5672_s25 + $0xc] sm:$0xe]  ;;  %v4784_v54 = vrot.slane %v1141_v55, 9  ;;  %v2606_v1 = vsel %vm5911_vm6, %v2604_v11, %v2605_v33  ;;  %v5257_v11 = vld [vmem:[%s5672_s25 + $0x18] sm:$0xf] }
 0x14a   : > { %7148 = vst [vmem:[#allocation3_spill] sm:$0xff] %v6349_v36  ;;  %v5065_v36 = vrot.slane %v5049_v6, 9  ;;  %v2722_v7 = vunpack.c.l.b16 %v2606_v1  ;;  %v1288_v29 = vsel %vm5911_vm6, %v1286_v20, %v1287_v16  ;;  %v2279_v55 = vor.u32 %v2278_v35, %v6361_v0 }
 0x14b   : > { %v1285_v50 = vsel %vm5911_vm6, %v4784_v54, %v1284_v47  ;;  %v1329_v47 = vunpack.c.l.b16 %v1288_v29  ;;  %v3326_v35 = vshrl.u32 %v5257_v11, 16  ;;  %v5259_v29 = vld [vmem:[%s5672_s25 + $0x20] sm:$0x1] }
 0x14c   : > { %v2451_v26 = vpop.f32.mrf.mxu0  ;;  %v1328_v6 = vunpack.c.l.b16 %v1285_v50  ;;  %v2280_v16 = vrot.slane %v2279_v55, 4 }
 0x14d   : > { %v1769_v31 = vpop.f32.mrf.mxu3  ;;  %4823 = vmatmul.msk.bf16.gmra.mxu2 %vm747_vm3, %v1344_v19  ;;  %v1078_v24 = vpop.f32.mrf.mxu1  ;;  %v2603_v19 = vsel %vm5911_vm6, %v5065_v36, %v2602_v48  ;;  %v2282_v48 = vshll.u32 %v5008_v5, 16  ;;  %v2341_v36 = vpack.c.b16 %v2324_v23, %v2323_v63 }
 0x14e   : > { %v1833_v2 = vadd.f32 %v1769_v31, %v1518_v61  ;;  %v2269_v61 = vor.u32 %v2268_v28, %v2265_v30  ;;  %v2721_v43 = vunpack.c.l.b16 %v2603_v19  ;;  %v6384_v31 = vld [vmem:[%s5672_s25 + $0x1c] sm:$0xf]  ;;  %v1345_v19 = vpack.c.b16 %v1329_v47, %v1328_v6 }
 0x14f   : > { %v2284_v20 = vrot.slane %v2282_v48, 5  ;;  %v3339_v63 = vshrl.u32 %v6384_v31, 16  ;;  %v3345_v47 = vshll.u32 %v5259_v29, 16 }
 0x150   : > { %v1457_v8 = vpop.f32.mrf.mxu2  ;;  %v6377_v46 = vpack.c.b16 %v2722_v7, %v2721_v43  ;;  %v6380_v33 = vadd.f32 %v2451_v26, %v1833_v2  ;;  %v3329_v26 = vshll.u32 %v5257_v11, 16  ;;  %v3335_v2 = vshll.u32 %v6384_v31, 16  ;;  %v5463_v11 = vld [vmem:[%s5672_s25 + $0xc0] sm:$0xff] }
 0x151   : > { %v1519_v57 = vadd.f32 %v1457_v8, %v1077_v12  ;;  %v1079_v12 = vadd.f32 %v1078_v24, %v6100_v15  ;;  %v2285_v15 = vsel %vm5693_vm2, %v2280_v16, %v2284_v20  ;;  %v3328_v24 = vrot.slane %v3326_v35, 4  ;;  %v5260_v16 = vld [vmem:[%s5672_s25 + $0x24] sm:$0xf] }
 0x152   : > { %4959 = vmatmul.msk.bf16.gmra.mxu3 %vm747_vm3, %v5462_v53  ;;  %v2270_v53 = vrot.slane %v2269_v61, 4  ;;  %v3331_v61 = vrot.slane %v3329_v26, 5  ;;  %v3337_v43 = vrot.slane %v3335_v2, 5  ;;  %v3341_v7 = vrot.slane %v3339_v63, 4  ;;  %v6405_v2 = vld [vmem:[%s5672_s25 + $0x28] sm:$0xf] }
 0x153   : > { %v3347_v26 = vrot.slane %v3345_v47, 5 }
 0x154   : > { %v2454_v8 = vpop.f32.mrf.mxu0  ;;  %v3342_v6 = vor.u32 %v3341_v7, %v3337_v43  ;;  %v5565_v7 = vld [vmem:[%s5672_s25 + $0x20] sm:$0x1] }
 0x155   : > { %v1772_v30 = vpop.f32.mrf.mxu3  ;;  %v1081_v28 = vpop.f32.mrf.mxu1 }
 0x156   : > { %v1834_v54 = vadd.f32 %v1772_v30, %v1519_v57  ;;  %v2275_v57 = vsel %vm5693_vm2, %v2270_v53, %v6361_v0  ;;  %v1082_v0 = vadd.f32 %v1081_v28, %v6126_v60  ;;  %v3332_v30 = vor.u32 %v3331_v61, %v3328_v24  ;;  %v5345_v28 = vld [vmem:[%s5672_s25 + $0x18] sm:$0xe]  ;;  %v5564_v24 = vld [vmem:[%s5672_s25 + $0x1c] sm:$0xf] }
 0x157   : > { %5047 = vmatmul.msk.bf16.gmra.mxu0 %vm747_vm3, %v2341_v36  ;;  %v2609_v61 = vrot.slane %v5564_v24, 5 }
 0x158   : > { %v1459_v23 = vpop.f32.mrf.mxu2  ;;  %4768 = vmatmul.msk.bf16.gmra.mxu1 %vm747_vm3, %v5435_v56  ;;  %v6391_v1 = vadd.f32 %v2454_v8, %v1834_v54  ;;  %v2325_v8 = vunpack.c.l.b16 %v2275_v57  ;;  %v2326_v56 = vunpack.c.l.b16 %v2285_v15  ;;  %v3333_v35 = vrot.slane %v3332_v30, 4 }
 0x159   : > { %v1520_v5 = vadd.f32 %v1459_v23, %v1079_v12  ;;  %v3343_v12 = vrot.slane %v3342_v6, 4  ;;  %v4025_v23 = vrot.slane %v6384_v31, 5  ;;  %v5361_v30 = vrot.slane %v5345_v28, 9 }
 0x15a   : > { %v2342_v20 = vpack.c.b16 %v2326_v56, %v2325_v8  ;;  %v5050_v8 = vld [vmem:[%s5672_s25 + $0x18] sm:$0xe]  ;;  %v3359_v56 = vshll.u32 %v6405_v2, 16  ;;  %v3338_v31 = vsel %vm5693_vm2, %v3333_v35, %v3337_v43 }
 0x15b   : > { %v4027_v47 = vrot.slane %v4025_v23, 4  ;;  %v5066_v24 = vrot.slane %v5050_v8, 9  ;;  %v3718_v43 = vunpack.c.l.b16 %v3338_v31 }
 0x15c   : > { %v2456_v50 = vpop.f32.mrf.mxu0 }
 0x15d   : > { %v1774_v55 = vpop.f32.mrf.mxu3  ;;  %4824 = vmatmul.msk.bf16.gmra.mxu2 %vm747_vm3, %v1345_v19  ;;  %v1083_v48 = vpop.f32.mrf.mxu1  ;;  %v3353_v19 = vshll.u32 %v5260_v16, 16 }
 0x15e   : > { %v1835_v36 = vadd.f32 %v1774_v55, %v1520_v5  ;;  %v3350_v5 = vshrl.u32 %v5260_v16, 16  ;;  %v2612_v55 = vrot.slane %v5565_v7, 5  ;;  %v3361_v7 = vrot.slane %v3359_v56, 5 }
 0x15f   : > { %v3355_v16 = vrot.slane %v3353_v19, 5 }
 0x160   : > { %v1462_v53 = vpop.f32.mrf.mxu2  ;;  %v6407_v63 = vadd.f32 %v2456_v50, %v1835_v36  ;;  %v3363_v50 = vshrl.u32 %v6405_v2, 16  ;;  %v1084_v36 = vadd.f32 %v1083_v48, %v6155_v34  ;;  %v2611_v34 = vrot.slane %v2609_v61, 4 }
 0x161   : > { %v1521_v54 = vadd.f32 %v1462_v53, %v1082_v0  ;;  %v3348_v0 = vsel %vm5693_vm2, %v3343_v12, %v3347_v26  ;;  %v4028_v53 = vrot.slane %v5259_v29, 5  ;;  %v6428_v26 = vld [vmem:[%s5672_s25 + $0x2c] sm:$0x1] }
 0x162   : > { %4960 = vmatmul.msk.bf16.gmra.mxu3 %vm747_vm3, %v5463_v11  ;;  %v3719_v35 = vunpack.c.l.b16 %v3348_v0  ;;  %v3365_v12 = vrot.slane %v3363_v50, 4 }
 0x163   : > { %v4029_v29 = vsel %vm5911_vm6, %v4027_v47, %v4028_v53 }
 0x164   : > { %v2459_v60 = vpop.f32.mrf.mxu0  ;;  %v3750_v50 = vpack.c.b16 %v3719_v35, %v3718_v43  ;;  %v6448_v35 = vld [vmem:[%s5672_s25 + $0x34] sm:$0xf] }
 0x165   : > { %v1777_v57 = vpop.f32.mrf.mxu3  ;;  %v1086_v15 = vpop.f32.mrf.mxu1 }
 0x166   : > { %v1836_v11 = vadd.f32 %v1777_v57, %v1521_v54  ;;  %v3352_v54 = vrot.slane %v3350_v5, 4  ;;  %v1087_v31 = vadd.f32 %v1086_v15, %v6025_v27 }
 0x167   : > { %5048 = vmatmul.msk.bf16.gmra.mxu0 %vm747_vm3, %v2342_v20  ;;  %v5476_v20 = vld [vmem:[%s5672_s25 + $0x18] sm:$0xff] }
 0x168   : > { %v1464_v6 = vpop.f32.mrf.mxu2  ;;  %5105 = vmatmul.msk.bf16.vlgmr.msra.gmra.mxu1 %vm747_vm3, %v6377_v46  ;;  %v6425_v48 = vadd.f32 %v2459_v60, %v1836_v11  ;;  %v4026_v46 = vsel %vm5911_vm6, %v5361_v30, %v4025_v23  ;;  %v2610_v60 = vsel %vm5911_vm6, %v5066_v24, %v2609_v61  ;;  %v2613_v11 = vsel %vm5911_vm6, %v2611_v34, %v2612_v55  ;;  %v5263_v34 = vld [vmem:[%s5672_s25 + $0x30] sm:$0xf] }
 0x169   : > { %v1522_v57 = vadd.f32 %v1464_v6, %v1084_v36  ;;  %v3356_v8 = vor.u32 %v3355_v16, %v3352_v54  ;;  %v3366_v36 = vor.u32 %v3365_v12, %v3361_v7  ;;  %v3369_v23 = vshll.u32 %v6428_v26, 16  ;;  %v5346_v16 = vld [vmem:[%s5672_s25 + $0x24] sm:$0xe] }
 0x16a   : > { %v4144_v0 = vunpack.c.l.b16 %v4026_v46  ;;  %v4145_v30 = vunpack.c.l.b16 %v4029_v29  ;;  %v2723_v47 = vunpack.c.l.b16 %v2610_v60  ;;  %v2724_v53 = vunpack.c.l.b16 %v2613_v11  ;;  %v5566_v11 = vld [vmem:[%s5672_s25 + $0x28] sm:$0xf] }
 0x16b   : > { %v3367_v55 = vrot.slane %v3366_v36, 4  ;;  %v3371_v54 = vrot.slane %v3369_v23, 5  ;;  %v4035_v60 = vrot.slane %v6428_v26, 5  ;;  %v3374_v36 = vshrl.u32 %v5263_v34, 16  ;;  %v5567_v26 = vld [vmem:[%s5672_s25 + $0x2c] sm:$0x1] }
 0x16c   : > { %v2461_v28 = vpop.f32.mrf.mxu0  ;;  %v4176_v24 = vpack.c.b16 %v4145_v30, %v4144_v0  ;;  %v2754_v43 = vpack.c.b16 %v2724_v53, %v2723_v47  ;;  %v3387_v0 = vshrl.u32 %v6448_v35, 16  ;;  %v2619_v30 = vrot.slane %v5567_v26, 5  ;;  %v5477_v53 = vld [vmem:[%s5672_s25 + $0x24] sm:$0xff] }
 0x16d   : > { %v1779_v5 = vpop.f32.mrf.mxu3  ;;  %5241 = vmatmul.msk.bf16.vlgmr.msra.gmra.mxu2 %vm747_vm3, %v5476_v20  ;;  %v1088_v19 = vpop.f32.mrf.mxu1  ;;  %v3357_v20 = vrot.slane %v3356_v8, 4 }
 0x16e   : > { %v1837_v56 = vadd.f32 %v1779_v5, %v1522_v57  ;;  %v4032_v57 = vrot.slane %v6405_v2, 5  ;;  %v5362_v5 = vrot.slane %v5346_v16, 9  ;;  %v2616_v2 = vrot.slane %v5566_v11, 5 }
 0x16f   : > { %v3362_v29 = vsel %vm5693_vm2, %v3357_v20, %v3361_v7  ;;  %v1089_v23 = vadd.f32 %v1088_v19, %v6046_v58  ;;  %v3383_v7 = vshll.u32 %v6448_v35, 16  ;;  %v3389_v11 = vrot.slane %v3387_v0, 4 }
 0x170   : > { %v1467_v6 = vpop.f32.mrf.mxu2  ;;  %v6445_v27 = vadd.f32 %v2461_v28, %v1837_v56  ;;  %v3372_v28 = vsel %vm5693_vm2, %v3367_v55, %v3371_v54  ;;  %v4034_v56 = vrot.slane %v4032_v57, 4  ;;  %v2618_v20 = vrot.slane %v2616_v2, 4 }
 0x171   : > { %v1523_v61 = vadd.f32 %v1467_v6, %v1087_v31  ;;  %v3377_v31 = vshll.u32 %v5263_v34, 16  ;;  %v3720_v54 = vunpack.c.l.b16 %v3362_v29  ;;  %v3721_v16 = vunpack.c.l.b16 %v3372_v28 }
 0x172   : > { %5329 = vmatmul.msk.bf16.vlgmr.msra.gmra.mxu3 %vm747_vm3, %v3750_v50  ;;  %v5051_v50 = vld [vmem:[%s5672_s25 + $0x24] sm:$0xe]  ;;  %v4033_v58 = vsel %vm5911_vm6, %v5362_v5, %v4032_v57  ;;  %v4036_v19 = vsel %vm5911_vm6, %v4034_v56, %v4035_v60  ;;  %v2620_v57 = vsel %vm5911_vm6, %v2618_v20, %v2619_v30 }
 0x173   : > { %v3379_v34 = vrot.slane %v3377_v31, 5  ;;  %v3751_v60 = vpack.c.b16 %v3721_v16, %v3720_v54  ;;  %v4147_v28 = vunpack.c.l.b16 %v4036_v19  ;;  %v4039_v19 = vrot.slane %v6448_v35, 5 }
 0x174   : > { %v2464_v15 = vpop.f32.mrf.mxu0 }
 0x175   : > { %v1782_v12 = vpop.f32.mrf.mxu3  ;;  %v1091_v46 = vpop.f32.mrf.mxu1 }
 0x176   : > { %v1838_v8 = vadd.f32 %v1782_v12, %v1523_v61  ;;  %v5067_v61 = vrot.slane %v5051_v50, 9  ;;  %v3385_v12 = vrot.slane %v3383_v7, 5  ;;  %v1092_v56 = vadd.f32 %v1091_v46, %v6063_v18  ;;  %v6483_v18 = vld [vmem:[%s5672_s25 + $0x40] sm:$0xf] }
 0x177   : > { %5401 = vmatmul.msk.bf16.vlgmr.msra.gmra.mxu0 %vm747_vm3, %v4176_v24  ;;  %v3376_v24 = vrot.slane %v3374_v36, 4 }
 0x178   : > { %v1469_v6 = vpop.f32.mrf.mxu2  ;;  %5106 = vmatmul.msk.bf16.gmra.mxu1 %vm747_vm3, %v2754_v43  ;;  %v6464_v55 = vadd.f32 %v2464_v15, %v1838_v8  ;;  %v6471_v43 = vld [vmem:[%s5672_s25 + $0x38] sm:$0x1]  ;;  %v2617_v29 = vsel %vm5911_vm6, %v5067_v61, %v2616_v2  ;;  %v4146_v8 = vunpack.c.l.b16 %v4033_v58  ;;  %v3390_v36 = vor.u32 %v3389_v11, %v3385_v12  ;;  %v5266_v2 = vld [vmem:[%s5672_s25 + $0x3c] sm:$0xf]  ;;  %v5347_v58 = vld [vmem:[%s5672_s25 + $0x30] sm:$0xe] }
 0x179   : > { %v1524_v47 = vadd.f32 %v1469_v6, %v1089_v23  ;;  %v3380_v50 = vor.u32 %v3379_v34, %v3376_v24  ;;  %v3393_v31 = vshll.u32 %v6471_v43, 16  ;;  %v2725_v0 = vunpack.c.l.b16 %v2617_v29  ;;  %v5568_v29 = vld [vmem:[%s5672_s25 + $0x34] sm:$0xf] }
 0x17a   : > { %v2726_v6 = vunpack.c.l.b16 %v2620_v57  ;;  %v4177_v30 = vpack.c.b16 %v4147_v28, %v4146_v8  ;;  %v3391_v61 = vrot.slane %v3390_v36, 4  ;;  %v3398_v24 = vshrl.u32 %v5266_v2, 16 }
 0x17b   : > { %v3395_v20 = vrot.slane %v3393_v31, 5  ;;  %v3401_v34 = vshll.u32 %v5266_v2, 16  ;;  %v2623_v57 = vrot.slane %v5568_v29, 5  ;;  %v5363_v31 = vrot.slane %v5347_v58, 9 }
 0x17c   : > { %v2466_v26 = vpop.f32.mrf.mxu0  ;;  %v2755_v16 = vpack.c.b16 %v2726_v6, %v2725_v0  ;;  %v4041_v0 = vrot.slane %v4039_v19, 4  ;;  %v4042_v6 = vrot.slane %v6471_v43, 5 }
 0x17d   : > { %v1784_v23 = vpop.f32.mrf.mxu3  ;;  %5242 = vmatmul.msk.bf16.gmra.mxu2 %vm747_vm3, %v5477_v53  ;;  %v1093_v15 = vpop.f32.mrf.mxu1  ;;  %v3396_v36 = vsel %vm5693_vm2, %v3391_v61, %v3395_v20  ;;  %v3403_v2 = vrot.slane %v3401_v34, 5  ;;  %v6506_v20 = vld [vmem:[%s5672_s25 + $0x44] sm:$0x1] }
 0x17e   : > { %v1839_v5 = vadd.f32 %v1784_v23, %v1524_v47  ;;  %v3381_v47 = vrot.slane %v3380_v50, 4  ;;  %v3407_v50 = vshll.u32 %v6483_v18, 16  ;;  %v4043_v43 = vsel %vm5911_vm6, %v4041_v0, %v4042_v6 }
 0x180   : > { %v1472_v7 = vpop.f32.mrf.mxu2  ;;  %v6485_v46 = vadd.f32 %v2466_v26, %v1839_v5  ;;  %v3411_v26 = vshrl.u32 %v6483_v18, 16  ;;  %v1094_v5 = vadd.f32 %v1093_v15, %v6084_v52  ;;  %v3386_v35 = vsel %vm5693_vm2, %v3381_v47, %v3385_v12 }
 0x181   : > { %v1525_v53 = vadd.f32 %v1472_v7, %v1092_v56  ;;  %v5052_v56 = vld [vmem:[%s5672_s25 + $0x30] sm:$0xe]  ;;  %v2625_v52 = vrot.slane %v2623_v57, 4  ;;  %v3722_v12 = vunpack.c.l.b16 %v3386_v35  ;;  %v3723_v47 = vunpack.c.l.b16 %v3396_v36 }
 0x182   : > { %5330 = vmatmul.msk.bf16.gmra.mxu3 %vm747_vm3, %v3751_v60  ;;  %v5569_v60 = vld [vmem:[%s5672_s25 + $0x38] sm:$0x1]  ;;  %v5068_v29 = vrot.slane %v5052_v56, 9  ;;  %v3413_v61 = vrot.slane %v3411_v26, 4 }
 0x183   : > { %v2626_v8 = vrot.slane %v5569_v60, 5  ;;  %v3409_v60 = vrot.slane %v3407_v50, 5  ;;  %v3752_v26 = vpack.c.b16 %v3723_v47, %v3722_v12  ;;  %v6526_v47 = vld [vmem:[%s5672_s25 + $0x4c] sm:$0xf] }
 0x184   : > { %v2469_v54 = vpop.f32.mrf.mxu0 }
 0x185   : > { %v1787_v11 = vpop.f32.mrf.mxu3  ;;  %v1096_v23 = vpop.f32.mrf.mxu1 }
 0x186   : > { %v1840_v28 = vadd.f32 %v1787_v11, %v1525_v53  ;;  %v3400_v53 = vrot.slane %v3398_v24, 4  ;;  %v1097_v35 = vadd.f32 %v1096_v23, %v6107_v22 }
 0x187   : > { %5402 = vmatmul.msk.bf16.gmra.mxu0 %vm747_vm3, %v4177_v30  ;;  %v5478_v30 = vld [vmem:[%s5672_s25 + $0x30] sm:$0xff] }
 0x188   : > { %v1474_v7 = vpop.f32.mrf.mxu2  ;;  %5107 = vmatmul.msk.bf16.gmra.mxu1 %vm747_vm3, %v2755_v16  ;;  %v6503_v15 = vadd.f32 %v2469_v54, %v1840_v28  ;;  %v4040_v16 = vsel %vm5911_vm6, %v5363_v31, %v4039_v19  ;;  %v2624_v54 = vsel %vm5911_vm6, %v5068_v29, %v2623_v57  ;;  %v2627_v28 = vsel %vm5911_vm6, %v2625_v52, %v2626_v8  ;;  %v5269_v52 = vld [vmem:[%s5672_s25 + $0x48] sm:$0xf] }
 0x189   : > { %v1526_v11 = vadd.f32 %v1474_v7, %v1094_v5  ;;  %v3404_v56 = vor.u32 %v3403_v2, %v3400_v53  ;;  %v3414_v5 = vor.u32 %v3413_v61, %v3409_v60  ;;  %v3417_v19 = vshll.u32 %v6506_v20, 16  ;;  %v5348_v2 = vld [vmem:[%s5672_s25 + $0x3c] sm:$0xe] }
 0x18a   : > { %v4148_v36 = vunpack.c.l.b16 %v4040_v16  ;;  %v4149_v31 = vunpack.c.l.b16 %v4043_v43  ;;  %v2727_v0 = vunpack.c.l.b16 %v2624_v54  ;;  %v2728_v6 = vunpack.c.l.b16 %v2627_v28  ;;  %v5570_v28 = vld [vmem:[%s5672_s25 + $0x40] sm:$0xf] }
 0x18b   : > { %v3415_v8 = vrot.slane %v3414_v5, 4  ;;  %v3419_v53 = vrot.slane %v3417_v19, 5  ;;  %v4049_v54 = vrot.slane %v6506_v20, 5  ;;  %v3422_v5 = vshrl.u32 %v5269_v52, 16  ;;  %v5571_v20 = vld [vmem:[%s5672_s25 + $0x44] sm:$0x1] }
 0x18c   : > { %v2471_v58 = vpop.f32.mrf.mxu0  ;;  %v4178_v29 = vpack.c.b16 %v4149_v31, %v4148_v36  ;;  %v2756_v12 = vpack.c.b16 %v2728_v6, %v2727_v0  ;;  %v3435_v36 = vshrl.u32 %v6526_v47, 16  ;;  %v2633_v31 = vrot.slane %v5571_v20, 5  ;;  %v5479_v6 = vld [vmem:[%s5672_s25 + $0x3c] sm:$0xff] }
 0x18d   : > { %v1789_v24 = vpop.f32.mrf.mxu3  ;;  %5243 = vmatmul.msk.bf16.gmra.mxu2 %vm747_vm3, %v5478_v30  ;;  %v1098_v34 = vpop.f32.mrf.mxu1  ;;  %v3405_v30 = vrot.slane %v3404_v56, 4 }
 0x18e   : > { %v1841_v50 = vadd.f32 %v1789_v24, %v1526_v11  ;;  %v4046_v11 = vrot.slane %v6483_v18, 5  ;;  %v5364_v24 = vrot.slane %v5348_v2, 9  ;;  %v2630_v18 = vrot.slane %v5570_v28, 5 }
 0x18f   : > { %v3410_v43 = vsel %vm5693_vm2, %v3405_v30, %v3409_v60  ;;  %v1099_v19 = vadd.f32 %v1098_v34, %v6128_v4  ;;  %v3431_v60 = vshll.u32 %v6526_v47, 16  ;;  %v3437_v28 = vrot.slane %v3435_v36, 4 }
 0x190   : > { %v1477_v7 = vpop.f32.mrf.mxu2  ;;  %v6523_v22 = vadd.f32 %v2471_v58, %v1841_v50  ;;  %v3420_v58 = vsel %vm5693_vm2, %v3415_v8, %v3419_v53  ;;  %v4048_v50 = vrot.slane %v4046_v11, 4  ;;  %v2632_v30 = vrot.slane %v2630_v18, 4 }
 0x191   : > { %v1527_v57 = vadd.f32 %v1477_v7, %v1097_v35  ;;  %v3425_v35 = vshll.u32 %v5269_v52, 16  ;;  %v3724_v53 = vunpack.c.l.b16 %v3410_v43  ;;  %v3725_v2 = vunpack.c.l.b16 %v3420_v58 }
 0x192   : > { %5331 = vmatmul.msk.bf16.gmra.mxu3 %vm747_vm3, %v3752_v26  ;;  %v5053_v26 = vld [vmem:[%s5672_s25 + $0x3c] sm:$0xe]  ;;  %v4047_v4 = vsel %vm5911_vm6, %v5364_v24, %v4046_v11  ;;  %v4050_v34 = vsel %vm5911_vm6, %v4048_v50, %v4049_v54  ;;  %v2634_v11 = vsel %vm5911_vm6, %v2632_v30, %v2633_v31 }
 0x193   : > { %v3427_v52 = vrot.slane %v3425_v35, 5  ;;  %v3753_v54 = vpack.c.b16 %v3725_v2, %v3724_v53  ;;  %v4151_v58 = vunpack.c.l.b16 %v4050_v34  ;;  %v4053_v34 = vrot.slane %v6526_v47, 5 }
 0x194   : > { %v2474_v23 = vpop.f32.mrf.mxu0 }
 0x195   : > { %v1792_v61 = vpop.f32.mrf.mxu3  ;;  %v1101_v16 = vpop.f32.mrf.mxu1 }
 0x196   : > { %v1842_v56 = vadd.f32 %v1792_v61, %v1527_v57  ;;  %v5069_v57 = vrot.slane %v5053_v26, 9  ;;  %v3433_v61 = vrot.slane %v3431_v60, 5  ;;  %v1102_v50 = vadd.f32 %v1101_v16, %v6158_v45  ;;  %v6561_v45 = vld [vmem:[%s5672_s25 + $0x58] sm:$0xf] }
 0x197   : > { %5403 = vmatmul.msk.bf16.gmra.mxu0 %vm747_vm3, %v4178_v29  ;;  %v3424_v29 = vrot.slane %v3422_v5, 4 }
 0x198   : > { %v1479_v7 = vpop.f32.mrf.mxu2  ;;  %5108 = vmatmul.msk.bf16.gmra.mxu1 %vm747_vm3, %v2756_v12  ;;  %v6542_v8 = vadd.f32 %v2474_v23, %v1842_v56  ;;  %v6549_v12 = vld [vmem:[%s5672_s25 + $0x50] sm:$0x1]  ;;  %v2631_v43 = vsel %vm5911_vm6, %v5069_v57, %v2630_v18  ;;  %v4150_v56 = vunpack.c.l.b16 %v4047_v4  ;;  %v3438_v5 = vor.u32 %v3437_v28, %v3433_v61  ;;  %v5272_v18 = vld [vmem:[%s5672_s25 + $0x54] sm:$0xf]  ;;  %v5349_v4 = vld [vmem:[%s5672_s25 + $0x48] sm:$0xe] }
 0x199   : > { %v1528_v0 = vadd.f32 %v1479_v7, %v1099_v19  ;;  %v3428_v26 = vor.u32 %v3427_v52, %v3424_v29  ;;  %v3441_v35 = vshll.u32 %v6549_v12, 16  ;;  %v2729_v36 = vunpack.c.l.b16 %v2631_v43  ;;  %v5572_v43 = vld [vmem:[%s5672_s25 + $0x4c] sm:$0xf] }
 0x19a   : > { %v2730_v7 = vunpack.c.l.b16 %v2634_v11  ;;  %v4179_v31 = vpack.c.b16 %v4151_v58, %v4150_v56  ;;  %v3439_v57 = vrot.slane %v3438_v5, 4  ;;  %v3446_v29 = vshrl.u32 %v5272_v18, 16 }
 0x19b   : > { %v3443_v30 = vrot.slane %v3441_v35, 5  ;;  %v3449_v52 = vshll.u32 %v5272_v18, 16  ;;  %v2637_v11 = vrot.slane %v5572_v43, 5  ;;  %v5365_v35 = vrot.slane %v5349_v4, 9 }
 0x19c   : > { %v2476_v20 = vpop.f32.mrf.mxu0  ;;  %v2757_v2 = vpack.c.b16 %v2730_v7, %v2729_v36  ;;  %v4055_v36 = vrot.slane %v4053_v34, 4  ;;  %v4056_v7 = vrot.slane %v6549_v12, 5 }
 0x19d   : > { %v1794_v19 = vpop.f32.mrf.mxu3  ;;  %5244 = vmatmul.msk.bf16.gmra.mxu2 %vm747_vm3, %v5479_v6  ;;  %v1103_v23 = vpop.f32.mrf.mxu1  ;;  %v3444_v5 = vsel %vm5693_vm2, %v3439_v57, %v3443_v30  ;;  %v3451_v18 = vrot.slane %v3449_v52, 5  ;;  %v6584_v30 = vld [vmem:[%s5672_s25 + $0x5c] sm:$0x1] }
 0x19e   : > { %v1843_v24 = vadd.f32 %v1794_v19, %v1528_v0  ;;  %v3429_v0 = vrot.slane %v3428_v26, 4  ;;  %v3455_v26 = vshll.u32 %v6561_v45, 16  ;;  %v4057_v12 = vsel %vm5911_vm6, %v4055_v36, %v4056_v7 }
 0x1a0   : > { %v1482_v60 = vpop.f32.mrf.mxu2  ;;  %v6563_v16 = vadd.f32 %v2476_v20, %v1843_v24  ;;  %v3459_v20 = vshrl.u32 %v6561_v45, 16  ;;  %v1104_v24 = vadd.f32 %v1103_v23, %v6173_v13  ;;  %v3434_v47 = vsel %vm5693_vm2, %v3429_v0, %v3433_v61 }
 0x1a1   : > { %v1529_v6 = vadd.f32 %v1482_v60, %v1102_v50  ;;  %v5054_v50 = vld [vmem:[%s5672_s25 + $0x48] sm:$0xe]  ;;  %v2639_v13 = vrot.slane %v2637_v11, 4  ;;  %v3726_v61 = vunpack.c.l.b16 %v3434_v47  ;;  %v3727_v0 = vunpack.c.l.b16 %v3444_v5 }
 0x1a2   : > { %5332 = vmatmul.msk.bf16.gmra.mxu3 %vm747_vm3, %v3753_v54  ;;  %v5573_v54 = vld [vmem:[%s5672_s25 + $0x50] sm:$0x1]  ;;  %v5070_v43 = vrot.slane %v5054_v50, 9  ;;  %v3461_v57 = vrot.slane %v3459_v20, 4 }
 0x1a3   : > { %v2640_v56 = vrot.slane %v5573_v54, 5  ;;  %v3457_v54 = vrot.slane %v3455_v26, 5  ;;  %v3754_v20 = vpack.c.b16 %v3727_v0, %v3726_v61  ;;  %v6604_v0 = vld [vmem:[%s5672_s25 + $0x64] sm:$0xf] }
 0x1a4   : > { %v2479_v53 = vpop.f32.mrf.mxu0 }
 0x1a5   : > { %v1797_v28 = vpop.f32.mrf.mxu3  ;;  %v1106_v19 = vpop.f32.mrf.mxu1 }
 0x1a6   : > { %v1844_v58 = vadd.f32 %v1797_v28, %v1529_v6  ;;  %v3448_v6 = vrot.slane %v3446_v29, 4  ;;  %v1107_v47 = vadd.f32 %v1106_v19, %v6037_v40 }
 0x1a7   : > { %5404 = vmatmul.msk.bf16.gmra.mxu0 %vm747_vm3, %v4179_v31  ;;  %v5480_v31 = vld [vmem:[%s5672_s25 + $0x48] sm:$0xff] }
 0x1a8   : > { %v1484_v60 = vpop.f32.mrf.mxu2  ;;  %5109 = vmatmul.msk.bf16.gmra.mxu1 %vm747_vm3, %v2757_v2  ;;  %v6581_v23 = vadd.f32 %v2479_v53, %v1844_v58  ;;  %v4054_v2 = vsel %vm5911_vm6, %v5365_v35, %v4053_v34  ;;  %v2638_v53 = vsel %vm5911_vm6, %v5070_v43, %v2637_v11  ;;  %v2641_v58 = vsel %vm5911_vm6, %v2639_v13, %v2640_v56  ;;  %v5275_v13 = vld [vmem:[%s5672_s25 + $0x60] sm:$0xf] }
 0x1a9   : > { %v1530_v28 = vadd.f32 %v1484_v60, %v1104_v24  ;;  %v3452_v50 = vor.u32 %v3451_v18, %v3448_v6  ;;  %v3462_v24 = vor.u32 %v3461_v57, %v3457_v54  ;;  %v3465_v34 = vshll.u32 %v6584_v30, 16  ;;  %v5350_v18 = vld [vmem:[%s5672_s25 + $0x54] sm:$0xe] }
 0x1aa   : > { %v4152_v5 = vunpack.c.l.b16 %v4054_v2  ;;  %v4153_v35 = vunpack.c.l.b16 %v4057_v12  ;;  %v2731_v36 = vunpack.c.l.b16 %v2638_v53  ;;  %v2732_v7 = vunpack.c.l.b16 %v2641_v58  ;;  %v5574_v58 = vld [vmem:[%s5672_s25 + $0x58] sm:$0xf] }
 0x1ab   : > { %v3463_v56 = vrot.slane %v3462_v24, 4  ;;  %v3467_v6 = vrot.slane %v3465_v34, 5  ;;  %v4063_v53 = vrot.slane %v6584_v30, 5  ;;  %v3470_v24 = vshrl.u32 %v5275_v13, 16  ;;  %v5575_v30 = vld [vmem:[%s5672_s25 + $0x5c] sm:$0x1] }
 0x1ac   : > { %v2481_v4 = vpop.f32.mrf.mxu0  ;;  %v4180_v43 = vpack.c.b16 %v4153_v35, %v4152_v5  ;;  %v2758_v61 = vpack.c.b16 %v2732_v7, %v2731_v36  ;;  %v3483_v5 = vshrl.u32 %v6604_v0, 16  ;;  %v2647_v35 = vrot.slane %v5575_v30, 5  ;;  %v5481_v7 = vld [vmem:[%s5672_s25 + $0x54] sm:$0xff] }
 0x1ad   : > { %v1799_v29 = vpop.f32.mrf.mxu3  ;;  %5245 = vmatmul.msk.bf16.gmra.mxu2 %vm747_vm3, %v5480_v31  ;;  %v1108_v52 = vpop.f32.mrf.mxu1  ;;  %v3453_v31 = vrot.slane %v3452_v50, 4 }
 0x1ae   : > { %v1845_v26 = vadd.f32 %v1799_v29, %v1530_v28  ;;  %v4060_v28 = vrot.slane %v6561_v45, 5  ;;  %v5366_v29 = vrot.slane %v5350_v18, 9  ;;  %v2644_v45 = vrot.slane %v5574_v58, 5 }
 0x1af   : > { %v3458_v12 = vsel %vm5693_vm2, %v3453_v31, %v3457_v54  ;;  %v1109_v34 = vadd.f32 %v1108_v52, %v6056_v10  ;;  %v3479_v54 = vshll.u32 %v6604_v0, 16  ;;  %v3485_v58 = vrot.slane %v3483_v5, 4 }
 0x1b0   : > { %v1487_v60 = vpop.f32.mrf.mxu2  ;;  %v6601_v40 = vadd.f32 %v2481_v4, %v1845_v26  ;;  %v3468_v4 = vsel %vm5693_vm2, %v3463_v56, %v3467_v6  ;;  %v4062_v26 = vrot.slane %v4060_v28, 4  ;;  %v2646_v31 = vrot.slane %v2644_v45, 4 }
 0x1b1   : > { %v1531_v11 = vadd.f32 %v1487_v60, %v1107_v47  ;;  %v3473_v47 = vshll.u32 %v5275_v13, 16  ;;  %v3728_v6 = vunpack.c.l.b16 %v3458_v12  ;;  %v3729_v18 = vunpack.c.l.b16 %v3468_v4 }
 0x1b2   : > { %5333 = vmatmul.msk.bf16.gmra.mxu3 %vm747_vm3, %v3754_v20  ;;  %v5055_v20 = vld [vmem:[%s5672_s25 + $0x54] sm:$0xe]  ;;  %v4061_v10 = vsel %vm5911_vm6, %v5366_v29, %v4060_v28  ;;  %v4064_v52 = vsel %vm5911_vm6, %v4062_v26, %v4063_v53  ;;  %v2648_v28 = vsel %vm5911_vm6, %v2646_v31, %v2647_v35 }
 0x1b3   : > { %v3475_v13 = vrot.slane %v3473_v47, 5  ;;  %v3755_v53 = vpack.c.b16 %v3729_v18, %v3728_v6  ;;  %v4155_v4 = vunpack.c.l.b16 %v4064_v52  ;;  %v4067_v52 = vrot.slane %v6604_v0, 5 }
 0x1b4   : > { %v2484_v19 = vpop.f32.mrf.mxu0 }
 0x1b5   : > { %v1802_v57 = vpop.f32.mrf.mxu3  ;;  %v1111_v2 = vpop.f32.mrf.mxu1 }
 0x1b6   : > { %v1846_v50 = vadd.f32 %v1802_v57, %v1531_v11  ;;  %v5071_v11 = vrot.slane %v5055_v20, 9  ;;  %v3481_v57 = vrot.slane %v3479_v54, 5  ;;  %v1112_v26 = vadd.f32 %v1111_v2, %v6077_v38  ;;  %v6639_v38 = vld [vmem:[%s5672_s25 + $0x70] sm:$0xf] }
 0x1b7   : > { %5405 = vmatmul.msk.bf16.gmra.mxu0 %vm747_vm3, %v4180_v43  ;;  %v3472_v43 = vrot.slane %v3470_v24, 4 }
 0x1b8   : > { %v1489_v60 = vpop.f32.mrf.mxu2  ;;  %5110 = vmatmul.msk.bf16.gmra.mxu1 %vm747_vm3, %v2758_v61  ;;  %v6620_v56 = vadd.f32 %v2484_v19, %v1846_v50  ;;  %v6627_v61 = vld [vmem:[%s5672_s25 + $0x68] sm:$0x1]  ;;  %v2645_v12 = vsel %vm5911_vm6, %v5071_v11, %v2644_v45  ;;  %v4154_v50 = vunpack.c.l.b16 %v4061_v10  ;;  %v3486_v24 = vor.u32 %v3485_v58, %v3481_v57  ;;  %v5278_v45 = vld [vmem:[%s5672_s25 + $0x6c] sm:$0xf]  ;;  %v5351_v10 = vld [vmem:[%s5672_s25 + $0x60] sm:$0xe] }
 0x1b9   : > { %v1532_v36 = vadd.f32 %v1489_v60, %v1109_v34  ;;  %v3476_v20 = vor.u32 %v3475_v13, %v3472_v43  ;;  %v3489_v47 = vshll.u32 %v6627_v61, 16  ;;  %v2733_v5 = vunpack.c.l.b16 %v2645_v12  ;;  %v5576_v12 = vld [vmem:[%s5672_s25 + $0x64] sm:$0xf] }
 0x1ba   : > { %v2734_v60 = vunpack.c.l.b16 %v2648_v28  ;;  %v4181_v35 = vpack.c.b16 %v4155_v4, %v4154_v50  ;;  %v3487_v11 = vrot.slane %v3486_v24, 4  ;;  %v3494_v43 = vshrl.u32 %v5278_v45, 16 }
 0x1bb   : > { %v3491_v31 = vrot.slane %v3489_v47, 5  ;;  %v3497_v13 = vshll.u32 %v5278_v45, 16  ;;  %v2651_v28 = vrot.slane %v5576_v12, 5  ;;  %v5367_v47 = vrot.slane %v5351_v10, 9 }
 0x1bc   : > { %v2486_v30 = vpop.f32.mrf.mxu0  ;;  %v2759_v18 = vpack.c.b16 %v2734_v60, %v2733_v5  ;;  %v4069_v5 = vrot.slane %v4067_v52, 4  ;;  %v4070_v60 = vrot.slane %v6627_v61, 5 }
 0x1bd   : > { %v1804_v34 = vpop.f32.mrf.mxu3  ;;  %5246 = vmatmul.msk.bf16.gmra.mxu2 %vm747_vm3, %v5481_v7  ;;  %v1113_v19 = vpop.f32.mrf.mxu1  ;;  %v3492_v24 = vsel %vm5693_vm2, %v3487_v11, %v3491_v31  ;;  %v3499_v45 = vrot.slane %v3497_v13, 5  ;;  %v6664_v31 = vld [vmem:[%s5672_s25 + $0x74] sm:$0x1] }
 0x1be   : > { %v1847_v29 = vadd.f32 %v1804_v34, %v1532_v36  ;;  %v3477_v36 = vrot.slane %v3476_v20, 4  ;;  %v3503_v20 = vshll.u32 %v6639_v38, 16  ;;  %v4071_v61 = vsel %vm5911_vm6, %v4069_v5, %v4070_v60 }
 0x1c0   : > { %v1492_v54 = vpop.f32.mrf.mxu2  ;;  %v6641_v2 = vadd.f32 %v2486_v30, %v1847_v29  ;;  %v3507_v30 = vshrl.u32 %v6639_v38, 16  ;;  %v1114_v29 = vadd.f32 %v1113_v19, %v6096_v3  ;;  %v3482_v0 = vsel %vm5693_vm2, %v3477_v36, %v3481_v57 }
 0x1c1   : > { %v1533_v7 = vadd.f32 %v1492_v54, %v1112_v26  ;;  %v5056_v26 = vld [vmem:[%s5672_s25 + $0x60] sm:$0xe]  ;;  %v2653_v3 = vrot.slane %v2651_v28, 4  ;;  %v3730_v57 = vunpack.c.l.b16 %v3482_v0  ;;  %v3731_v36 = vunpack.c.l.b16 %v3492_v24 }
 0x1c2   : > { %5334 = vmatmul.msk.bf16.gmra.mxu3 %vm747_vm3, %v3755_v53  ;;  %v5577_v53 = vld [vmem:[%s5672_s25 + $0x68] sm:$0x1]  ;;  %v5072_v12 = vrot.slane %v5056_v26, 9  ;;  %v3509_v11 = vrot.slane %v3507_v30, 4 }
 0x1c3   : > { %v2654_v50 = vrot.slane %v5577_v53, 5  ;;  %v6661_v53 = vrot.slane %v3503_v20, 5  ;;  %v3756_v30 = vpack.c.b16 %v3731_v36, %v3730_v57  ;;  %v6683_v57 = vld [vmem:[%s5672_s25 + $0x7c] sm:$0xf] }
 0x1c4   : > { %v2489_v6 = vpop.f32.mrf.mxu0  ;;  %v2652_v13 = vsel %vm5911_vm6, %v5072_v12, %v2651_v28  ;;  %v5281_v28 = vld [vmem:[%s5672_s25 + $0x78] sm:$0xf] }
 0x1c5   : > { %v1807_v58 = vpop.f32.mrf.mxu3  ;;  %v1116_v34 = vpop.f32.mrf.mxu1  ;;  %v2735_v5 = vunpack.c.l.b16 %v2652_v13 }
 0x1c6   : > { %v1848_v4 = vadd.f32 %v1807_v58, %v1533_v7  ;;  %v3496_v7 = vrot.slane %v3494_v43, 4  ;;  %v1117_v0 = vadd.f32 %v1116_v34, %v6115_v41  ;;  %v3518_v41 = vshrl.u32 %v5281_v28, 16 }
 0x1c7   : > { %5406 = vmatmul.msk.bf16.gmra.mxu0 %vm747_vm3, %v4181_v35  ;;  %v5482_v35 = vld [vmem:[%s5672_s25 + $0x60] sm:$0xff]  ;;  %v3521_v34 = vshll.u32 %v5281_v28, 16  ;;  %v5483_v28 = vld [vmem:[%s5672_s25 + $0x6c] sm:$0xff] }
 0x1c8   : > { %v1494_v54 = vpop.f32.mrf.mxu2  ;;  %5111 = vmatmul.msk.bf16.gmra.mxu1 %vm747_vm3, %v2759_v18  ;;  %v6659_v19 = vadd.f32 %v2489_v6, %v1848_v4  ;;  %v4068_v18 = vsel %vm5911_vm6, %v5367_v47, %v4067_v52  ;;  %v2655_v4 = vsel %vm5911_vm6, %v2653_v3, %v2654_v50  ;;  %v3500_v26 = vor.u32 %v3499_v45, %v3496_v7  ;;  %v5352_v45 = vld [vmem:[%s5672_s25 + $0x6c] sm:$0xe] }
 0x1c9   : > { %v1534_v58 = vadd.f32 %v1494_v54, %v1114_v29  ;;  %v3510_v52 = vor.u32 %v3509_v11, %v6661_v53  ;;  %v3513_v29 = vshll.u32 %v6664_v31, 16  ;;  %v4156_v24 = vunpack.c.l.b16 %v4068_v18 }
 0x1ca   : > { %v4157_v47 = vunpack.c.l.b16 %v4071_v61  ;;  %v2736_v60 = vunpack.c.l.b16 %v2655_v4  ;;  %v3501_v12 = vrot.slane %v3500_v26, 4  ;;  %v5368_v4 = vrot.slane %v5352_v45, 9 }
 0x1cb   : > { %v3511_v50 = vrot.slane %v3510_v52, 4  ;;  %v3515_v7 = vrot.slane %v3513_v29, 5  ;;  %v4077_v26 = vrot.slane %v6664_v31, 5  ;;  %v3531_v31 = vshrl.u32 %v6683_v57, 16 }
 0x1cc   : > { %v2491_v10 = vpop.f32.mrf.mxu0  ;;  %v4182_v3 = vpack.c.b16 %v4157_v47, %v4156_v24  ;;  %v2760_v18 = vpack.c.b16 %v2736_v60, %v2735_v5  ;;  %v3506_v13 = vsel %vm5693_vm2, %v3501_v12, %v6661_v53  ;;  %v3520_v53 = vrot.slane %v3518_v41, 4  ;;  %v5579_v12 = vld [vmem:[%s5672_s25 + $0x74] sm:$0x1] }
 0x1cd   : > { %v1809_v43 = vpop.f32.mrf.mxu3  ;;  %5247 = vmatmul.msk.bf16.gmra.mxu2 %vm747_vm3, %v5482_v35  ;;  %v1118_v6 = vpop.f32.mrf.mxu1  ;;  %v3523_v47 = vrot.slane %v3521_v34, 5  ;;  %v3732_v45 = vunpack.c.l.b16 %v3506_v13 }
 0x1ce   : > { %v1849_v20 = vadd.f32 %v1809_v43, %v1534_v58  ;;  %v4074_v58 = vrot.slane %v6639_v38, 5  ;;  %v5578_v38 = vld [vmem:[%s5672_s25 + $0x70] sm:$0xf]  ;;  %v1119_v24 = vadd.f32 %v1118_v6, %v6147_v14 }
 0x1cf   : > { %v2658_v52 = vrot.slane %v5578_v38, 5  ;;  %v3524_v41 = vor.u32 %v3523_v47, %v3520_v53 }
 0x1d0   : > { %v1497_v54 = vpop.f32.mrf.mxu2  ;;  %v6685_v36 = vadd.f32 %v2491_v10, %v1849_v20  ;;  %v3516_v10 = vsel %vm5693_vm2, %v3511_v50, %v3515_v7  ;;  %v4076_v20 = vrot.slane %v4074_v58, 4  ;;  %v2661_v50 = vrot.slane %v5579_v12, 5 }
 0x1d1   : > { %v1535_v35 = vadd.f32 %v1497_v54, %v1117_v0  ;;  %v3527_v0 = vshll.u32 %v6683_v57, 16  ;;  %v4075_v14 = vsel %vm5911_vm6, %v5368_v4, %v4074_v58 }
 0x1d2   : > { %5335 = vmatmul.msk.bf16.gmra.mxu3 %vm747_vm3, %v3756_v30  ;;  %v5057_v30 = vld [vmem:[%s5672_s25 + $0x6c] sm:$0xe]  ;;  %v4078_v6 = vsel %vm5911_vm6, %v4076_v20, %v4077_v26  ;;  %v4158_v26 = vunpack.c.l.b16 %v4075_v14  ;;  %v3525_v20 = vrot.slane %v3524_v41, 4 }
 0x1d3   : > { %v5073_v5 = vrot.slane %v5057_v30, 9  ;;  %v3529_v34 = vrot.slane %v3527_v0, 5  ;;  %v5283_v30 = vld [vmem:[%s5672_s25 + $0x80] sm:$0x1] }
 0x1d4   : > { %v2494_v11 = vpop.f32.mrf.mxu0  ;;  %v3537_v53 = vshll.u32 %v5283_v30, 16 }
 0x1d5   : > { %v1812_v61 = vpop.f32.mrf.mxu3  ;;  %v1121_v43 = vpop.f32.mrf.mxu1 }
 0x1d6   : > { %v1850_v29 = vadd.f32 %v1812_v61, %v1535_v35  ;;  %v2660_v35 = vrot.slane %v2658_v52, 4 }
 0x1d7   : > { %5407 = vmatmul.msk.bf16.gmra.mxu0 %vm747_vm3, %v4182_v3  ;;  %v3733_v3 = vunpack.c.l.b16 %v3516_v10  ;;  %v1122_v10 = vadd.f32 %v1121_v43, %v6169_v62  ;;  %v3530_v62 = vsel %vm5693_vm2, %v3525_v20, %v3529_v34 }
 0x1d8   : > { %v1499_v54 = vpop.f32.mrf.mxu2  ;;  %5112 = vmatmul.msk.bf16.gmra.mxu1 %vm747_vm3, %v2760_v18  ;;  %v6702_v7 = vadd.f32 %v2494_v11, %v1850_v29  ;;  %v3533_v18 = vrot.slane %v3531_v31, 4  ;;  %v2659_v11 = vsel %vm5911_vm6, %v5073_v5, %v2658_v52  ;;  %v2662_v58 = vsel %vm5911_vm6, %v2660_v35, %v2661_v50  ;;  %v6722_v50 = vld [vmem:[%s5672_s25 + $0x88] sm:$0xf] }
 0x1d9   : > { %v1536_v60 = vadd.f32 %v1499_v54, %v1119_v24  ;;  %v3757_v4 = vpack.c.b16 %v3733_v3, %v3732_v45  ;;  %v4159_v29 = vunpack.c.l.b16 %v4078_v6  ;;  %v2737_v31 = vunpack.c.l.b16 %v2659_v11 }
 0x1da   : > { %7149 = vst [vmem:[#allocation4_spill] sm:$0xff] %v6702_v7  ;;  %v3534_v0 = vor.u32 %v3533_v18, %v3529_v34  ;;  %v2738_v54 = vunpack.c.l.b16 %v2662_v58  ;;  %v5284_v7 = vld [vmem:[%s5672_s25 + $0x84] sm:$0xf]  ;;  %v4081_v5 = vrot.slane %v6683_v57, 5  ;;  %v4084_v11 = vrot.slane %v5283_v30, 5 }
 0x1db   : > { %v4183_v52 = vpack.c.b16 %v4159_v29, %v4158_v26  ;;  %v3542_v14 = vshrl.u32 %v5284_v7, 16  ;;  %v3545_v6 = vshll.u32 %v5284_v7, 16  ;;  %v5058_v58 = vld [vmem:[%s5672_s25 + $0x78] sm:$0xe]  ;;  %v3551_v29 = vshll.u32 %v6722_v50, 16 }
 0x1dc   : > { %v2496_v61 = vpop.f32.mrf.mxu0  ;;  %v3535_v43 = vrot.slane %v3534_v0, 4  ;;  %v2761_v3 = vpack.c.b16 %v2738_v54, %v2737_v31  ;;  %v4083_v34 = vrot.slane %v4081_v5, 4  ;;  %v5074_v0 = vrot.slane %v5058_v58, 9  ;;  %v5484_v54 = vld [vmem:[%s5672_s25 + $0x78] sm:$0xff] }
 0x1dd   : > { %v1814_v38 = vpop.f32.mrf.mxu3  ;;  %5248 = vmatmul.msk.bf16.gmra.mxu2 %vm747_vm3, %v5483_v28  ;;  %v1123_v24 = vpop.f32.mrf.mxu1  ;;  %v5353_v28 = vld [vmem:[%s5672_s25 + $0x78] sm:$0xe] }
 0x1de   : > { %v1851_v13 = vadd.f32 %v1814_v38, %v1536_v60  ;;  %v3539_v60 = vrot.slane %v3537_v53, 5  ;;  %v5369_v35 = vrot.slane %v5353_v28, 9  ;;  %v1124_v7 = vadd.f32 %v1123_v24, %v6186_v44 }
 0x1df   : > { %v3544_v53 = vrot.slane %v3542_v14, 4 }
 0x1e0   : > { %v1502_v47 = vpop.f32.mrf.mxu2  ;;  %v6724_v41 = vadd.f32 %v2496_v61, %v1851_v13  ;;  %v3540_v61 = vsel %vm5693_vm2, %v3535_v43, %v3539_v60  ;;  %v3734_v13 = vunpack.c.l.b16 %v3530_v62  ;;  %v4082_v20 = vsel %vm5911_vm6, %v5369_v35, %v4081_v5 }
 0x1e1   : > { %v1537_v12 = vadd.f32 %v1502_v47, %v1122_v10  ;;  %v3555_v10 = vshrl.u32 %v6722_v50, 16  ;;  %v3547_v47 = vrot.slane %v3545_v6, 5  ;;  %v3735_v24 = vunpack.c.l.b16 %v3540_v61 }
 0x1e2   : > { %5336 = vmatmul.msk.bf16.gmra.mxu3 %vm747_vm3, %v3757_v4  ;;  %v5580_v4 = vld [vmem:[%s5672_s25 + $0x7c] sm:$0xf]  ;;  %v4085_v62 = vsel %vm5911_vm6, %v4083_v34, %v4084_v11  ;;  %v6743_v43 = vrot.slane %v3551_v29, 5  ;;  %v4160_v35 = vunpack.c.l.b16 %v4082_v20 }
 0x1e3   : > { %v2665_v57 = vrot.slane %v5580_v4, 5  ;;  %v3557_v60 = vrot.slane %v3555_v10, 4  ;;  %v4161_v6 = vunpack.c.l.b16 %v4085_v62  ;;  %v3548_v58 = vor.u32 %v3547_v47, %v3544_v53  ;;  %v5354_v10 = vld [vmem:[%s5672_s25 + $0x84] sm:$0xe]  ;;  %v6757_v62 = vld [vmem:[%s5672_s25 + $0x94] sm:$0xf] }
 0x1e4   : > { %v2499_v45 = vpop.f32.mrf.mxu0 }
 0x1e5   : > { %v1817_v18 = vpop.f32.mrf.mxu3  ;;  %v2850_v38 = vpop.f32.mrf.mxu1  ;;  %v2667_v28 = vrot.slane %v2665_v57, 4  ;;  %v3558_v34 = vor.u32 %v3557_v60, %v6743_v43 }
 0x1e6   : > { %v1852_v26 = vadd.f32 %v1817_v18, %v1537_v12  ;;  %v5581_v12 = vld [vmem:[%s5672_s25 + $0x80] sm:$0x1]  ;;  %v2930_v61 = vadd.f32 %v2850_v38, %v6203_v49 }
 0x1e7   : > { %5408 = vmatmul.msk.bf16.gmra.mxu0 %vm747_vm3, %v4183_v52  ;;  %v2668_v52 = vrot.slane %v5581_v12, 5  ;;  %v5287_v12 = vld [vmem:[%s5672_s25 + $0x90] sm:$0xf]  ;;  %v3559_v53 = vrot.slane %v3558_v34, 4 }
 0x1e8   : > { %v1504_v30 = vpop.f32.mrf.mxu2  ;;  %5113 = vmatmul.msk.bf16.gmra.mxu1 %vm747_vm3, %v2761_v3  ;;  %v6739_v44 = vadd.f32 %v2499_v45, %v1852_v26  ;;  %v5286_v3 = vld [vmem:[%s5672_s25 + $0x8c] sm:$0x1]  ;;  %v2666_v45 = vsel %vm5911_vm6, %v5074_v0, %v2665_v57  ;;  %v3758_v26 = vpack.c.b16 %v3735_v24, %v3734_v13  ;;  %v4184_v57 = vpack.c.b16 %v4161_v6, %v4160_v35 }
 0x1e9   : > { %v1538_v31 = vadd.f32 %v1504_v30, %v1124_v7  ;;  %v2669_v11 = vsel %vm5911_vm6, %v2667_v28, %v2668_v52  ;;  %v3561_v29 = vshll.u32 %v5286_v3, 16  ;;  %v4088_v7 = vrot.slane %v6722_v50, 5 }
 0x1ea   : > { %v2739_v20 = vunpack.c.l.b16 %v2666_v45  ;;  %v3549_v0 = vrot.slane %v3548_v58, 4  ;;  %v4091_v50 = vrot.slane %v5286_v3, 5  ;;  %v3566_v52 = vshrl.u32 %v5287_v12, 16  ;;  %v5582_v45 = vld [vmem:[%s5672_s25 + $0x88] sm:$0xf] }
 0x1eb   : > { %v3563_v47 = vrot.slane %v3561_v29, 5  ;;  %v4090_v28 = vrot.slane %v4088_v7, 4  ;;  %v3569_v60 = vshll.u32 %v5287_v12, 16  ;;  %v3575_v35 = vshll.u32 %v6757_v62, 16  ;;  %v6768_v3 = vld [vmem:[%s7141_s2] ss:$0 sm:$0xff] }
 0x1ec   : > { %v2501_v5 = vpop.f32.mrf.mxu0  ;;  %v3579_v58 = vshrl.u32 %v6757_v62, 16 }
 0x1ed   : > { %v1819_v14 = vpop.f32.mrf.mxu3  ;;  %5249 = vmatmul.msk.bf16.gmra.mxu2 %vm747_vm3, %v5484_v54  ;;  %v2852_v18 = vpop.f32.mrf.mxu1  ;;  %v2740_v54 = vunpack.c.l.b16 %v2669_v11  ;;  %v2672_v11 = vrot.slane %v5582_v45, 5  ;;  %v3564_v34 = vsel %vm5693_vm2, %v3559_v53, %v3563_v47  ;;  %v6783_v12 = vrot.slane %v3575_v35, 5  ;;  %v5583_v53 = vld [vmem:[%s5672_s25 + $0x8c] sm:$0x1] }
 0x1ee   : > { %v1853_v4 = vadd.f32 %v1819_v14, %v1538_v31  ;;  %v5370_v31 = vrot.slane %v5354_v10, 9  ;;  %v4092_v10 = vsel %vm5911_vm6, %v4090_v28, %v4091_v50  ;;  %v2675_v47 = vrot.slane %v5583_v53, 5  ;;  %v6809_v53 = vld [vmem:[%s5672_s25 + $0xa0] sm:$0xf] }
 0x1ef   : > { %v2762_v24 = vpack.c.b16 %v2740_v54, %v2739_v20  ;;  %v2931_v20 = vadd.f32 %v2852_v18, %v6216_v42  ;;  %v3571_v54 = vrot.slane %v3569_v60, 5  ;;  %v6790_v42 = vld [vmem:[%s5672_s25 + $0x98] sm:$0x1]  ;;  %v4163_v60 = vunpack.c.l.b16 %v4092_v10 }
 0x1f0   : > { %v3165_v30 = vpop.f32.mrf.mxu2  ;;  %v6760_v49 = vadd.f32 %v2501_v5, %v1853_v4  ;;  %v3554_v5 = vsel %vm5693_vm2, %v3549_v0, %v6743_v43  ;;  %v5059_v4 = vld [vmem:[%s5672_s25 + $0x84] sm:$0xe]  ;;  %v4089_v29 = vsel %vm5911_vm6, %v5370_v31, %v4088_v7  ;;  %v3581_v7 = vrot.slane %v3579_v58, 4 }
 0x1f1   : > { %v3245_v13 = vadd.f32 %v3165_v30, %v2930_v61  ;;  %v3568_v61 = vrot.slane %v3566_v52, 4  ;;  %v5075_v0 = vrot.slane %v5059_v4, 9  ;;  %v3736_v50 = vunpack.c.l.b16 %v3554_v5 }
 0x1f2   : > { %5337 = vmatmul.msk.bf16.gmra.mxu3 %vm747_vm3, %v3758_v26  ;;  %v3737_v52 = vunpack.c.l.b16 %v3564_v34  ;;  %v3582_v5 = vor.u32 %v3581_v7, %v6783_v12  ;;  %v3585_v10 = vshll.u32 %v6790_v42, 16 }
 0x1f3   : > { %v2673_v45 = vsel %vm5911_vm6, %v5075_v0, %v2672_v11  ;;  %v5290_v0 = vld [vmem:[%s5672_s25 + $0x9c] sm:$0xf] }
 0x1f4   : > { %v4273_v38 = vpop.f32.mrf.mxu0 }
 0x1f5   : > { %v3847_v14 = vpop.f32.mrf.mxu3  ;;  %v2855_v6 = vpop.f32.mrf.mxu1 }
 0x1f6   : > { %v3927_v26 = vadd.f32 %v3847_v14, %v3245_v13  ;;  %v2674_v13 = vrot.slane %v2672_v11, 4 }
 0x1f7   : > { %5409 = vmatmul.msk.bf16.gmra.mxu0 %vm747_vm3, %v4184_v57  ;;  %v5485_v57 = vld [vmem:[%s5672_s25 + $0x84] sm:$0xff] }
 0x1f8   : > { %v4353_v30 = vadd.f32 %v4273_v38, %v3927_v26  ;;  %v3167_v43 = vpop.f32.mrf.mxu2  ;;  %5114 = vmatmul.msk.bf16.gmra.mxu1 %vm747_vm3, %v2762_v24  ;;  %v4162_v24 = vunpack.c.l.b16 %v4089_v29  ;;  %v2676_v58 = vsel %vm5911_vm6, %v2674_v13, %v2675_v47  ;;  %v3572_v26 = vor.u32 %v3571_v54, %v3568_v61 }
 0x1f9   : > { %v3246_v28 = vadd.f32 %v3167_v43, %v2931_v20  ;;  %v3759_v29 = vpack.c.b16 %v3737_v52, %v3736_v50  ;;  %v2932_v20 = vadd.f32 %v2855_v6, %v6229_v21  ;;  %v2742_v11 = vunpack.c.l.b16 %v2676_v58 }
 0x1fa   : > { %v4389_v31 = vadd.f32 %v6768_v3, %v4353_v30  ;;  %v4185_v61 = vpack.c.b16 %v4163_v60, %v4162_v24  ;;  %v3573_v54 = vrot.slane %v3572_v26, 4  ;;  %v3583_v13 = vrot.slane %v3582_v5, 4 }
 0x1fb   : > { %v4095_v21 = vrot.slane %v6757_v62, 5  ;;  %v3590_v6 = vshrl.u32 %v5290_v0, 16  ;;  %v3593_v50 = vshll.u32 %v5290_v0, 16  ;;  %v3599_v52 = vshll.u32 %v6809_v53, 16  ;;  %v5060_v62 = vld [vmem:[%s5672_s25 + $0x90] sm:$0xe] }
 0x1fc   : > { %v4421_v18 = vmax.f32 %v4389_v31, 0.0  ;;  %v4275_v38 = vpop.f32.mrf.mxu0  ;;  %v3587_v31 = vrot.slane %v3585_v10, 5  ;;  %v3578_v58 = vsel %vm5693_vm2, %v3573_v54, %v6783_v12  ;;  %v4098_v5 = vrot.slane %v6790_v42, 5 }
 0x1fd   : > { %v3849_v35 = vpop.f32.mrf.mxu3  ;;  %5250 = vmatmul.msk.bf16.gmra.mxu2 %vm747_vm3, %v5485_v57  ;;  %v2857_v14 = vpop.f32.mrf.mxu1  ;;  %v2741_v57 = vunpack.c.l.b16 %v2673_v45  ;;  %v6826_v12 = vrot.slane %v3599_v52, 5 }
 0x1fe   : > { %v4453_v4 = vpack.c.bf16 %v4421_v18, %v4421_v18  ;;  %v3928_v34 = vadd.f32 %v3849_v35, %v3246_v28  ;;  %v5355_v28 = vld [vmem:[%s5672_s25 + $0x90] sm:$0xe]  ;;  %v3603_v18 = vshrl.u32 %v6809_v53, 16  ;;  %v2933_v0 = vadd.f32 %v2857_v14, %v6242_v17 }
 0x1ff   : > { %v2763_v60 = vpack.c.b16 %v2742_v11, %v2741_v57  ;;  %v5371_v26 = vrot.slane %v5355_v28, 9  ;;  %v3595_v57 = vrot.slane %v3593_v50, 5 }
 0x200   : > { %4486 = vst.msk [vmem:[%s6795_s4] sm:$0xf] %vm4485_vm7, %v4453_v4  ;;  %v4354_v30 = vadd.f32 %v4275_v38, %v3928_v34  ;;  %v3170_v43 = vpop.f32.mrf.mxu2  ;;  %v5584_v4 = vld [vmem:[%s5672_s25 + $0x94] sm:$0xf]  ;;  %v3605_v11 = vrot.slane %v3603_v18, 4 }
 0x201   : > { %v3247_v7 = vadd.f32 %v3170_v43, %v2932_v20  ;;  %v2679_v34 = vrot.slane %v5584_v4, 5  ;;  %v4097_v20 = vrot.slane %v4095_v21, 4  ;;  %v3592_v43 = vrot.slane %v3590_v6, 4 }
 0x202   : > { %v4390_v47 = vadd.f32 %v6768_v3, %v4354_v30  ;;  %5338 = vmatmul.msk.bf16.gmra.mxu3 %vm747_vm3, %v3759_v29  ;;  %v3588_v30 = vsel %vm5693_vm2, %v3583_v13, %v3587_v31  ;;  %v5486_v13 = vld [vmem:[%s5672_s25 + $0x90] sm:$0xff]  ;;  %v3738_v31 = vunpack.c.l.b16 %v3578_v58 }
 0x203   : > { %v2681_v28 = vrot.slane %v2679_v34, 4  ;;  %v3739_v18 = vunpack.c.l.b16 %v3588_v30  ;;  %v4099_v17 = vsel %vm5911_vm6, %v4097_v20, %v4098_v5  ;;  %v3596_v14 = vor.u32 %v3595_v57, %v3592_v43 }
 0x204   : > { %v4422_v38 = vmax.f32 %v4390_v47, 0.0  ;;  %v4278_v24 = vpop.f32.mrf.mxu0  ;;  %v5076_v47 = vrot.slane %v5060_v62, 9  ;;  %v4165_v20 = vunpack.c.l.b16 %v4099_v17 }
 0x205   : > { %v3852_v35 = vpop.f32.mrf.mxu3  ;;  %v2860_v45 = vpop.f32.mrf.mxu1  ;;  %v3760_v30 = vpack.c.b16 %v3739_v18, %v3738_v31  ;;  %v3597_v57 = vrot.slane %v3596_v14, 4 }
 0x206   : > { %v4454_v29 = vpack.c.bf16 %v4422_v38, %v4422_v38  ;;  %v3929_v10 = vadd.f32 %v3852_v35, %v3247_v7  ;;  %v6833_v7 = vld [vmem:[%s5672_s25 + $0xa4] sm:$0x1]  ;;  %v4096_v38 = vsel %vm5911_vm6, %v5371_v26, %v4095_v21  ;;  %v2680_v62 = vsel %vm5911_vm6, %v5076_v47, %v2679_v34 }
 0x207   : > { %5410 = vmatmul.msk.bf16.gmra.mxu0 %vm747_vm3, %v4185_v61  ;;  %v5585_v61 = vld [vmem:[%s5672_s25 + $0x98] sm:$0x1]  ;;  %v2743_v43 = vunpack.c.l.b16 %v2680_v62  ;;  %v4105_v18 = vrot.slane %v6833_v7, 5  ;;  %v5586_v62 = vld [vmem:[%s5672_s25 + $0xa0] sm:$0xf] }
 0x208   : > { %4487 = vst.msk [vmem:[%s6795_s4 + $0x4] sm:$0xf] %vm4485_vm7, %v4454_v29  ;;  %v4355_v42 = vadd.f32 %v4278_v24, %v3929_v10  ;;  %v3172_v54 = vpop.f32.mrf.mxu2  ;;  %5115 = vmatmul.msk.bf16.gmra.mxu1 %vm747_vm3, %v2763_v60  ;;  %v2682_v6 = vrot.slane %v5585_v61, 5  ;;  %v3606_v24 = vor.u32 %v3605_v11, %v6826_v12  ;;  %v3609_v60 = vshll.u32 %v6833_v7, 16  ;;  %v5293_v61 = vld [vmem:[%s5672_s25 + $0xa8] sm:$0xf] }
 0x209   : > { %v3248_v52 = vadd.f32 %v3172_v54, %v2933_v0  ;;  %v4164_v29 = vunpack.c.l.b16 %v4096_v38  ;;  %v2934_v0 = vadd.f32 %v2860_v45, %v6264_v9 }
 0x20a   : > { %v4391_v50 = vadd.f32 %v6768_v3, %v4355_v42  ;;  %v2683_v26 = vsel %vm5911_vm6, %v2681_v28, %v2682_v6  ;;  %v3607_v11 = vrot.slane %v3606_v24, 4  ;;  %v3611_v42 = vrot.slane %v3609_v60, 5 }
 0x20b   : > { %v2744_v47 = vunpack.c.l.b16 %v2683_v26  ;;  %v4102_v28 = vrot.slane %v6809_v53, 5  ;;  %v4186_v31 = vpack.c.b16 %v4165_v20, %v4164_v29  ;;  %v6864_v53 = vld [vmem:[%s5672_s25 + $0xac] sm:$0xf]  ;;  %v3614_v60 = vshrl.u32 %v5293_v61, 16 }
 0x20c   : > { %v4423_v35 = vmax.f32 %v4391_v50, 0.0  ;;  %v4280_v58 = vpop.f32.mrf.mxu0  ;;  %v3612_v9 = vsel %vm5693_vm2, %v3607_v11, %v3611_v42  ;;  %v3627_v7 = vshrl.u32 %v6864_v53, 16 }
 0x20d   : > { %v3854_v4 = vpop.f32.mrf.mxu3  ;;  %5251 = vmatmul.msk.bf16.gmra.mxu2 %vm747_vm3, %v5486_v13  ;;  %v2862_v21 = vpop.f32.mrf.mxu1  ;;  %v5356_v13 = vld [vmem:[%s5672_s25 + $0x9c] sm:$0xe]  ;;  %v2764_v14 = vpack.c.b16 %v2744_v47, %v2743_v43  ;;  %v4104_v24 = vrot.slane %v4102_v28, 4  ;;  %v3741_v20 = vunpack.c.l.b16 %v3612_v9 }
 0x20e   : > { %v4455_v5 = vpack.c.bf16 %v4423_v35, %v4423_v35  ;;  %v3930_v10 = vadd.f32 %v3854_v4, %v3248_v52  ;;  %v3602_v52 = vsel %vm5693_vm2, %v3597_v57, %v6826_v12  ;;  %v5372_v45 = vrot.slane %v5356_v13, 9 }
 0x20f   : > { %v2686_v4 = vrot.slane %v5586_v62, 5  ;;  %v3617_v12 = vshll.u32 %v5293_v61, 16  ;;  %v2935_v11 = vadd.f32 %v2862_v21, %v6280_v59  ;;  %v5587_v61 = vld [vmem:[%s5672_s25 + $0xa4] sm:$0x1]  ;;  %v3629_v9 = vrot.slane %v3627_v7, 4 }
 0x210   : > { %4488 = vst.msk [vmem:[%s6795_s4 + $0x8] sm:$0xf] %vm4485_vm7, %v4455_v5  ;;  %v4356_v34 = vadd.f32 %v4280_v58, %v3930_v10  ;;  %v3175_v54 = vpop.f32.mrf.mxu2  ;;  %v5061_v5 = vld [vmem:[%s5672_s25 + $0x9c] sm:$0xe]  ;;  %v3623_v10 = vshll.u32 %v6864_v53, 16  ;;  %v4103_v43 = vsel %vm5911_vm6, %v5372_v45, %v4102_v28 }
 0x211   : > { %v3249_v50 = vadd.f32 %v3175_v54, %v2934_v0  ;;  %v3616_v0 = vrot.slane %v3614_v60, 4  ;;  %v5487_v54 = vld [vmem:[%s5672_s25 + $0x9c] sm:$0xff]  ;;  %v5077_v47 = vrot.slane %v5061_v5, 9  ;;  %v2688_v13 = vrot.slane %v2686_v4, 4  ;;  %v6885_v59 = vld [vmem:[%s5672_s25 + $0xb0] sm:$0x1] }
 0x212   : > { %v4392_v6 = vadd.f32 %v6768_v3, %v4356_v34  ;;  %5339 = vmatmul.msk.bf16.gmra.mxu3 %vm747_vm3, %v3760_v30  ;;  %v3740_v30 = vunpack.c.l.b16 %v3602_v52  ;;  %v4106_v34 = vsel %vm5911_vm6, %v4104_v24, %v4105_v18  ;;  %v6882_v52 = vrot.slane %v3623_v10, 5 }
 0x213   : > { %v4166_v18 = vunpack.c.l.b16 %v4103_v43  ;;  %v2687_v60 = vsel %vm5911_vm6, %v5077_v47, %v2686_v4  ;;  %v3633_v5 = vshll.u32 %v6885_v59, 16  ;;  %v5296_v4 = vld [vmem:[%s5672_s25 + $0xb4] sm:$0xf] }
 0x214   : > { %v4424_v38 = vmax.f32 %v4392_v6, 0.0  ;;  %v4283_v17 = vpop.f32.mrf.mxu0  ;;  %v2689_v6 = vrot.slane %v5587_v61, 5  ;;  %v3638_v61 = vshrl.u32 %v5296_v4, 16 }
 0x215   : > { %v3857_v35 = vpop.f32.mrf.mxu3  ;;  %v2865_v58 = vpop.f32.mrf.mxu1  ;;  %v3635_v47 = vrot.slane %v3633_v5, 5 }
 0x216   : > { %v4456_v29 = vpack.c.bf16 %v4424_v38, %v4424_v38  ;;  %v3931_v26 = vadd.f32 %v3857_v35, %v3249_v50  ;;  %v3761_v38 = vpack.c.b16 %v3741_v20, %v3740_v30  ;;  %v2690_v35 = vsel %vm5911_vm6, %v2688_v13, %v2689_v6  ;;  %v5357_v13 = vld [vmem:[%s5672_s25 + $0xa8] sm:$0xe] }
 0x217   : > { %5411 = vmatmul.msk.bf16.gmra.mxu0 %vm747_vm3, %v4186_v31  ;;  %v3619_v31 = vrot.slane %v3617_v12, 5  ;;  %v2936_v7 = vadd.f32 %v2865_v58, %v6293_v51  ;;  %v2745_v20 = vunpack.c.l.b16 %v2687_v60  ;;  %v2746_v43 = vunpack.c.l.b16 %v2690_v35 }
 0x218   : > { %4489 = vst.msk [vmem:[%s6795_s4 + $0xc] sm:$0xf] %vm4485_vm7, %v4456_v29  ;;  %v4357_v57 = vadd.f32 %v4283_v17, %v3931_v26  ;;  %v3177_v42 = vpop.f32.mrf.mxu2  ;;  %5116 = vmatmul.msk.bf16.gmra.mxu1 %vm747_vm3, %v2764_v14  ;;  %v4167_v14 = vunpack.c.l.b16 %v4106_v34  ;;  %v3630_v26 = vor.u32 %v3629_v9, %v6882_v52  ;;  %v3641_v6 = vshll.u32 %v5296_v4, 16  ;;  %v5488_v4 = vld [vmem:[%s5672_s25 + $0xa8] sm:$0xff] }
 0x219   : > { %v3250_v50 = vadd.f32 %v3177_v42, %v2935_v11  ;;  %v3620_v62 = vor.u32 %v3619_v31, %v3616_v0  ;;  %v4109_v9 = vrot.slane %v6864_v53, 5  ;;  %v3640_v53 = vrot.slane %v3638_v61, 4 }
 0x21a   : > { %v4393_v28 = vadd.f32 %v6768_v3, %v4357_v57  ;;  %v6899_v57 = vld [vmem:[%s5672_s25 + $0xb8] sm:$0xf]  ;;  %v4187_v11 = vpack.c.b16 %v4167_v14, %v4166_v18  ;;  %v5588_v18 = vld [vmem:[%s5672_s25 + $0xac] sm:$0xf] }
 0x21b   : > { %v3621_v42 = vrot.slane %v3620_v62, 4  ;;  %v3647_v51 = vshll.u32 %v6899_v57, 16  ;;  %v3651_v58 = vshrl.u32 %v6899_v57, 16 }
 0x21c   : > { %v4425_v21 = vmax.f32 %v4393_v28, 0.0  ;;  %v4285_v45 = vpop.f32.mrf.mxu0 }
 0x21d   : > { %v3859_v17 = vpop.f32.mrf.mxu3  ;;  %5252 = vmatmul.msk.bf16.gmra.mxu2 %vm747_vm3, %v5487_v54  ;;  %v2867_v24 = vpop.f32.mrf.mxu1  ;;  %v3631_v54 = vrot.slane %v3630_v26, 4  ;;  %v3626_v35 = vsel %vm5693_vm2, %v3621_v42, %v6882_v52  ;;  %v6915_v26 = vrot.slane %v3647_v51, 5  ;;  %v3653_v5 = vrot.slane %v3651_v58, 4 }
 0x21e   : > { %v4457_v12 = vpack.c.bf16 %v4425_v21, %v4425_v21  ;;  %v3932_v29 = vadd.f32 %v3859_v17, %v3250_v50  ;;  %v2765_v50 = vpack.c.b16 %v2746_v43, %v2745_v20  ;;  %v2693_v17 = vrot.slane %v5588_v18, 5  ;;  %v6923_v43 = vld [vmem:[%s5672_s25 + $0xbc] sm:$0x1] }
 0x21f   : > { %v3636_v62 = vsel %vm5693_vm2, %v3631_v54, %v3635_v47  ;;  %v4111_v52 = vrot.slane %v4109_v9, 4  ;;  %v4112_v20 = vrot.slane %v6885_v59, 5  ;;  %v3657_v59 = vshll.u32 %v6923_v43, 16 }
 0x220   : > { %4490 = vst.msk [vmem:[%s6795_s4 + $0x10] sm:$0xf] %vm4485_vm7, %v4457_v12  ;;  %v4358_v10 = vadd.f32 %v4285_v45, %v3932_v29  ;;  %v3180_v30 = vpop.f32.mrf.mxu2  ;;  %v5062_v12 = vld [vmem:[%s5672_s25 + $0xa8] sm:$0xe]  ;;  %v3643_v29 = vrot.slane %v3641_v6, 5  ;;  %v2695_v42 = vrot.slane %v2693_v17, 4  ;;  %v3743_v61 = vunpack.c.l.b16 %v3636_v62 }
 0x221   : > { %v3251_v0 = vadd.f32 %v3180_v30, %v2936_v7  ;;  %v2937_v7 = vadd.f32 %v2867_v24, %v6306_v39  ;;  %v3654_v6 = vor.u32 %v3653_v5, %v6915_v26 }
 0x222   : > { %v4394_v34 = vadd.f32 %v6768_v3, %v4358_v10  ;;  %5340 = vmatmul.msk.bf16.gmra.mxu3 %vm747_vm3, %v3761_v38  ;;  %v5373_v38 = vrot.slane %v5357_v13, 9  ;;  %v3742_v13 = vunpack.c.l.b16 %v3626_v35  ;;  %v3644_v24 = vor.u32 %v3643_v29, %v3640_v53 }
 0x223   : > { %v3659_v53 = vrot.slane %v3657_v59, 5 }
 0x224   : > { %v4426_v31 = vmax.f32 %v4394_v34, 0.0  ;;  %v4288_v28 = vpop.f32.mrf.mxu0  ;;  %v5589_v34 = vld [vmem:[%s5672_s25 + $0xb0] sm:$0x1]  ;;  %v4110_v39 = vsel %vm5911_vm6, %v5373_v38, %v4109_v9  ;;  %v3645_v62 = vrot.slane %v3644_v24, 4  ;;  %v5590_v24 = vld [vmem:[%s5672_s25 + $0xb8] sm:$0xf] }
 0x225   : > { %v3862_v21 = vpop.f32.mrf.mxu3  ;;  %v2870_v45 = vpop.f32.mrf.mxu1 }
 0x226   : > { %v4458_v14 = vpack.c.bf16 %v4426_v31, %v4426_v31  ;;  %v3933_v60 = vadd.f32 %v3862_v21, %v3251_v0  ;;  %v2696_v0 = vrot.slane %v5589_v34, 5  ;;  %v4113_v31 = vsel %vm5911_vm6, %v4111_v52, %v4112_v20 }
 0x227   : > { %5412 = vmatmul.msk.bf16.gmra.mxu0 %vm747_vm3, %v4187_v11  ;;  %v5078_v11 = vrot.slane %v5062_v12, 9  ;;  %v4169_v35 = vunpack.c.l.b16 %v4113_v31  ;;  %v3655_v12 = vrot.slane %v3654_v6, 4  ;;  %v2938_v5 = vadd.f32 %v2870_v45, %v6319_v37  ;;  %v6951_v37 = vld [vmem:[%s5672_s25 + $0xc4] sm:$0xf] }
 0x228   : > { %4491 = vst.msk [vmem:[%s6795_s4 + $0x14] sm:$0xf] %vm4485_vm7, %v4458_v14  ;;  %v4359_v10 = vadd.f32 %v4288_v28, %v3933_v60  ;;  %v3182_v30 = vpop.f32.mrf.mxu2  ;;  %5117 = vmatmul.msk.bf16.gmra.mxu1 %vm747_vm3, %v2765_v50  ;;  %v2697_v9 = vsel %vm5911_vm6, %v2695_v42, %v2696_v0  ;;  %v3762_v14 = vpack.c.b16 %v3743_v61, %v3742_v13  ;;  %v4168_v60 = vunpack.c.l.b16 %v4110_v39 }
 0x229   : > { %v3252_v47 = vadd.f32 %v3182_v30, %v2937_v7  ;;  %v2694_v21 = vsel %vm5911_vm6, %v5078_v11, %v2693_v17  ;;  %v2748_v7 = vunpack.c.l.b16 %v2697_v9  ;;  %v5299_v30 = vld [vmem:[%s5672_s25 + $0xc0] sm:$0xf]  ;;  %v3650_v11 = vsel %vm5693_vm2, %v3645_v62, %v6915_v26 }
 0x22a   : > { %v4395_v54 = vadd.f32 %v6768_v3, %v4359_v10  ;;  %v2747_v10 = vunpack.c.l.b16 %v2694_v21  ;;  %v3660_v42 = vsel %vm5693_vm2, %v3655_v12, %v3659_v53  ;;  %v3662_v13 = vshrl.u32 %v5299_v30, 16  ;;  %v5489_v53 = vld [vmem:[%s5672_s25 + $0xb4] sm:$0xff] }
 0x22b   : > { %v2700_v6 = vrot.slane %v5590_v24, 5  ;;  %v3665_v59 = vshll.u32 %v5299_v30, 16  ;;  %v3671_v31 = vshll.u32 %v6951_v37, 16  ;;  %v3744_v21 = vunpack.c.l.b16 %v3650_v11 }
 0x22c   : > { %v4427_v51 = vmax.f32 %v4395_v54, 0.0  ;;  %v4290_v58 = vpop.f32.mrf.mxu0  ;;  %v2766_v0 = vpack.c.b16 %v2748_v7, %v2747_v10  ;;  %v5358_v54 = vld [vmem:[%s5672_s25 + $0xb4] sm:$0xe]  ;;  %v3664_v12 = vrot.slane %v3662_v13, 4 }
 0x22d   : > { %v3864_v28 = vpop.f32.mrf.mxu3  ;;  %5253 = vmatmul.msk.bf16.gmra.mxu2 %vm747_vm3, %v5488_v4  ;;  %v2872_v50 = vpop.f32.mrf.mxu1  ;;  %v4188_v4 = vpack.c.b16 %v4169_v35, %v4168_v60  ;;  %v5374_v9 = vrot.slane %v5358_v54, 9  ;;  %v3667_v7 = vrot.slane %v3665_v59, 5 }
 0x22e   : > { %v4459_v38 = vpack.c.bf16 %v4427_v51, %v4427_v51  ;;  %v3934_v18 = vadd.f32 %v3864_v28, %v3252_v47  ;;  %v4116_v47 = vrot.slane %v6899_v57, 5  ;;  %v3675_v28 = vshrl.u32 %v6951_v37, 16 }
 0x22f   : > { %v3745_v57 = vunpack.c.l.b16 %v3660_v42  ;;  %v3668_v24 = vor.u32 %v3667_v7, %v3664_v12  ;;  %v5359_v12 = vld [vmem:[%s5672_s25 + $0xc0] sm:$0xe]  ;;  %v6993_v7 = vld [vmem:[%s5672_s25 + $0xd0] sm:$0xf] }
 0x230   : > { %4492 = vst.msk [vmem:[%s6795_s4 + $0x18] sm:$0xf] %vm4485_vm7, %v4459_v38  ;;  %v4360_v29 = vadd.f32 %v4290_v58, %v3934_v18  ;;  %v3185_v17 = vpop.f32.mrf.mxu2  ;;  %v5063_v58 = vld [vmem:[%s5672_s25 + $0xb4] sm:$0xe]  ;;  %v4119_v38 = vrot.slane %v6923_v43, 5  ;;  %v4118_v62 = vrot.slane %v4116_v47, 4  ;;  %v4117_v42 = vsel %vm5911_vm6, %v5374_v9, %v4116_v47 }
 0x231   : > { %v3253_v20 = vadd.f32 %v3185_v17, %v2938_v5  ;;  %v2702_v5 = vrot.slane %v2700_v6, 4  ;;  %v5591_v17 = vld [vmem:[%s5672_s25 + $0xbc] sm:$0x1] }
 0x232   : > { %v4396_v52 = vadd.f32 %v6768_v3, %v4360_v29  ;;  %5341 = vmatmul.msk.bf16.gmra.mxu3 %vm747_vm3, %v3762_v14  ;;  %v7150_v14 = vld [vmem:[#allocation2_spill] sm:$0xff]  ;;  %v5079_v29 = vrot.slane %v5063_v58, 9  ;;  %v2703_v10 = vrot.slane %v5591_v17, 5  ;;  %v4170_v58 = vunpack.c.l.b16 %v4117_v42 }
 0x233   : > { %v2939_v60 = vadd.f32 %v2872_v50, %v7150_v14  ;;  %v4123_v17 = vrot.slane %v6951_v37, 5  ;;  %v5064_v37 = vld [vmem:[%s5672_s25 + $0xc0] sm:$0xe] }
 0x234   : > { %v4428_v45 = vmax.f32 %v4396_v52, 0.0  ;;  %v4293_v34 = vpop.f32.mrf.mxu0  ;;  %v6968_v52 = vrot.slane %v3671_v31, 5  ;;  %v2701_v13 = vsel %vm5911_vm6, %v5079_v29, %v2700_v6 }
 0x235   : > { %v3867_v61 = vpop.f32.mrf.mxu3  ;;  %v2875_v39 = vpop.f32.mrf.mxu1  ;;  %v2749_v9 = vunpack.c.l.b16 %v2701_v13 }
 0x236   : > { %v4460_v26 = vpack.c.bf16 %v4428_v45, %v4428_v45  ;;  %v3935_v51 = vadd.f32 %v3867_v61, %v3253_v20  ;;  %v3677_v20 = vrot.slane %v3675_v28, 4  ;;  %v4120_v45 = vsel %vm5911_vm6, %v4118_v62, %v4119_v38 }
 0x237   : > { %5413 = vmatmul.msk.bf16.gmra.mxu0 %vm747_vm3, %v4188_v4  ;;  %v6971_v4 = vld [vmem:[%s5672_s25 + $0xc8] sm:$0x1]  ;;  %v2704_v61 = vsel %vm5911_vm6, %v2702_v5, %v2703_v10  ;;  %v4171_v31 = vunpack.c.l.b16 %v4120_v45  ;;  %v5302_v10 = vld [vmem:[%s5672_s25 + $0xcc] sm:$0xf] }
 0x238   : > { %4493 = vst.msk [vmem:[%s6795_s4 + $0x1c] sm:$0xf] %vm4485_vm7, %v4460_v26  ;;  %v4361_v18 = vadd.f32 %v4293_v34, %v3935_v51  ;;  %v3187_v35 = vpop.f32.mrf.mxu2  ;;  %5118 = vmatmul.msk.bf16.gmra.mxu1 %vm747_vm3, %v2766_v0  ;;  %v3763_v0 = vpack.c.b16 %v3745_v57, %v3744_v21  ;;  %v3678_v51 = vor.u32 %v3677_v20, %v6968_v52  ;;  %v3681_v47 = vshll.u32 %v6971_v4, 16  ;;  %v7151_v21 = vld [vmem:[#allocation3_spill] sm:$0xff] }
 0x239   : > { %v3254_v43 = vadd.f32 %v3187_v35, %v2939_v60  ;;  %v2940_v57 = vadd.f32 %v2875_v39, %v7151_v21  ;;  %v2750_v38 = vunpack.c.l.b16 %v2704_v61  ;;  %v5375_v20 = vrot.slane %v5359_v12, 9 }
 0x23a   : > { %v4397_v30 = vadd.f32 %v6768_v3, %v4361_v18  ;;  %v3669_v18 = vrot.slane %v3668_v24, 4  ;;  %v3679_v35 = vrot.slane %v3678_v51, 4  ;;  %v3683_v62 = vrot.slane %v3681_v47, 5 }
 0x23b   : > { %v2767_v39 = vpack.c.b16 %v2750_v38, %v2749_v9  ;;  %v3686_v13 = vshrl.u32 %v5302_v10, 16  ;;  %v3689_v61 = vshll.u32 %v5302_v10, 16  ;;  %v3695_v24 = vshll.u32 %v6993_v7, 16 }
 0x23c   : > { %v4429_v50 = vmax.f32 %v4397_v30, 0.0  ;;  %v4295_v11 = vpop.f32.mrf.mxu0  ;;  %v5080_v21 = vrot.slane %v5064_v37, 9 }
 0x23d   : > { %v3869_v34 = vpop.f32.mrf.mxu3  ;;  %5254 = vmatmul.msk.bf16.gmra.mxu2 %vm747_vm3, %v5489_v53  ;;  %v2877_v54 = vpop.f32.mrf.mxu1  ;;  %v4189_v53 = vpack.c.b16 %v4171_v31, %v4170_v58  ;;  %v4126_v58 = vrot.slane %v6971_v4, 5  ;;  %v5490_v31 = vld [vmem:[%s5672_s25 + $0xc0] sm:$0xff] }
 0x23e   : > { %v4461_v59 = vpack.c.bf16 %v4429_v50, %v4429_v50  ;;  %v3936_v26 = vadd.f32 %v3869_v34, %v3254_v43  ;;  %v5592_v50 = vld [vmem:[%s5672_s25 + $0xc4] sm:$0xf]  ;;  %v3674_v34 = vsel %vm5693_vm2, %v3669_v18, %v6968_v52  ;;  %v2941_v51 = vadd.f32 %v2877_v54, %v6380_v33 }
 0x23f   : > { %v4125_v52 = vrot.slane %v4123_v17, 4  ;;  %v4124_v33 = vsel %vm5911_vm6, %v5375_v20, %v4123_v17  ;;  %v3688_v54 = vrot.slane %v3686_v13, 4 }
 0x240   : > { %4494 = vst.msk [vmem:[%s6795_s4 + $0x20] sm:$0xf] %vm4485_vm7, %v4461_v59  ;;  %v4362_v28 = vadd.f32 %v4295_v11, %v3936_v26  ;;  %v3190_v6 = vpop.f32.mrf.mxu2  ;;  %v2707_v11 = vrot.slane %v5592_v50, 5  ;;  %v3699_v59 = vshrl.u32 %v6993_v7, 16 }
 0x241   : > { %v3255_v60 = vadd.f32 %v3190_v6, %v2940_v57  ;;  %v5593_v6 = vld [vmem:[%s5672_s25 + $0xc8] sm:$0x1] }
 0x242   : > { %v4398_v14 = vadd.f32 %v6768_v3, %v4362_v28  ;;  %5342 = vmatmul.msk.bf16.gmra.mxu3 %vm747_vm3, %v3763_v0  ;;  %v3684_v0 = vsel %vm5693_vm2, %v3679_v35, %v3683_v62  ;;  %v3746_v28 = vunpack.c.l.b16 %v3674_v34  ;;  %v2709_v57 = vrot.slane %v2707_v11, 4 }
 0x243   : > { %v2710_v9 = vrot.slane %v5593_v6, 5  ;;  %v3697_v35 = vrot.slane %v3695_v24, 5  ;;  %v3701_v62 = vrot.slane %v3699_v59, 4  ;;  %v2708_v10 = vsel %vm5911_vm6, %v5080_v21, %v2707_v11  ;;  %v5360_v6 = vld [vmem:[%s5672_s25 + $0xcc] sm:$0xe] }
 0x244   : > { %v4430_v29 = vmax.f32 %v4398_v14, 0.0  ;;  %v4298_v5 = vpop.f32.mrf.mxu0  ;;  %v3747_v14 = vunpack.c.l.b16 %v3684_v0  ;;  %v2751_v59 = vunpack.c.l.b16 %v2708_v10 }
 0x245   : > { %v3872_v30 = vpop.f32.mrf.mxu3  ;;  %v2880_v43 = vpop.f32.mrf.mxu1  ;;  %v2711_v17 = vsel %vm5911_vm6, %v2709_v57, %v2710_v9  ;;  %v3702_v0 = vor.u32 %v3701_v62, %v3697_v35  ;;  %v4130_v9 = vrot.slane %v6993_v7, 5 }
 0x246   : > { %v4462_v42 = vpack.c.bf16 %v4430_v29, %v4430_v29  ;;  %v3937_v45 = vadd.f32 %v3872_v30, %v3255_v60  ;;  %v3691_v60 = vrot.slane %v3689_v61, 5  ;;  %v5304_v29 = vld [vmem:[%s5672_s25 + $0xd4] sm:$0x1]  ;;  %v3764_v50 = vpack.c.b16 %v3747_v14, %v3746_v28 }
 0x247   : > { %5414 = vmatmul.msk.bf16.gmra.mxu0 %vm747_vm3, %v4189_v53  ;;  %v4127_v53 = vsel %vm5911_vm6, %v4125_v52, %v4126_v58  ;;  %v3705_v37 = vshll.u32 %v5304_v29, 16  ;;  %v2942_v61 = vadd.f32 %v2880_v43, %v6391_v1  ;;  %v2752_v11 = vunpack.c.l.b16 %v2711_v17 }
 0x248   : > { %4495 = vst.msk [vmem:[%s6795_s4 + $0x24] sm:$0xf] %vm4485_vm7, %v4462_v42  ;;  %v4363_v26 = vadd.f32 %v4298_v5, %v3937_v45  ;;  %v3192_v47 = vpop.f32.mrf.mxu2  ;;  %5119 = vmatmul.msk.bf16.gmra.mxu1 %vm747_vm3, %v2767_v39  ;;  %v4172_v42 = vunpack.c.l.b16 %v4124_v33  ;;  %v4173_v45 = vunpack.c.l.b16 %v4127_v53  ;;  %v3692_v34 = vor.u32 %v3691_v60, %v3688_v54  ;;  %v5491_v53 = vld [vmem:[%s5672_s25 + $0xcc] sm:$0xff] }
 0x249   : > { %v3256_v18 = vadd.f32 %v3192_v47, %v2941_v51  ;;  %v3703_v58 = vrot.slane %v3702_v0, 4  ;;  %v2768_v57 = vpack.c.b16 %v2752_v11, %v2751_v59  ;;  %v5376_v54 = vrot.slane %v5360_v6, 9 }
 0x24a   : > { %v4399_v38 = vadd.f32 %v6768_v3, %v4363_v26  ;;  %v4190_v47 = vpack.c.b16 %v4173_v45, %v4172_v42  ;;  %v3693_v52 = vrot.slane %v3692_v34, 4 }
 0x24c   : > { %v4431_v12 = vmax.f32 %v4399_v38, 0.0  ;;  %v4300_v4 = vpop.f32.mrf.mxu0  ;;  %v3698_v14 = vsel %vm5693_vm2, %v3693_v52, %v3697_v35 }
 0x24d   : > { %v3874_v5 = vpop.f32.mrf.mxu3  ;;  %5255 = vmatmul.msk.bf16.gmra.mxu2 %vm747_vm3, %v5490_v31  ;;  %v2882_v39 = vpop.f32.mrf.mxu1  ;;  %v3707_v31 = vrot.slane %v3705_v37, 5  ;;  %v3748_v35 = vunpack.c.l.b16 %v3698_v14 }
 0x24e   : > { %v4463_v30 = vpack.c.bf16 %v4431_v12, %v4431_v12  ;;  %v3938_v20 = vadd.f32 %v3874_v5, %v3256_v18  ;;  %v2943_v62 = vadd.f32 %v2882_v39, %v6407_v63  ;;  %v4132_v12 = vrot.slane %v4130_v9, 4 }
 0x24f   : > { %v3708_v33 = vsel %vm5693_vm2, %v3703_v58, %v3707_v31 }
 0x250   : > { %4496 = vst.msk [vmem:[%s6795_s4 + $0x28] sm:$0xf] %vm4485_vm7, %v4463_v30  ;;  %v4364_v13 = vadd.f32 %v4300_v4, %v3938_v20  ;;  %v3195_v24 = vpop.f32.mrf.mxu2  ;;  %v4133_v4 = vrot.slane %v5304_v29, 5  ;;  %v3749_v17 = vunpack.c.l.b16 %v3708_v33  ;;  %v4131_v20 = vsel %vm5911_vm6, %v5376_v54, %v4130_v9 }
 0x251   : > { %v3257_v51 = vadd.f32 %v3195_v24, %v2942_v61  ;;  %v4174_v34 = vunpack.c.l.b16 %v4131_v20 }
 0x252   : > { %v4400_v26 = vadd.f32 %v6768_v3, %v4364_v13  ;;  %5343 = vmatmul.msk.bf16.gmra.mxu3 %vm747_vm3, %v3764_v50  ;;  %v4134_v63 = vsel %vm5911_vm6, %v4132_v12, %v4133_v4  ;;  %v3765_v45 = vpack.c.b16 %v3749_v17, %v3748_v35 }
 0x253   : > { %v4175_v0 = vunpack.c.l.b16 %v4134_v63 }
 0x254   : > { %v4432_v28 = vmax.f32 %v4400_v26, 0.0  ;;  %v4303_v21 = vpop.f32.mrf.mxu0 }
 0x255   : > { %v3877_v1 = vpop.f32.mrf.mxu3  ;;  %v2885_v43 = vpop.f32.mrf.mxu1  ;;  %v4191_v59 = vpack.c.b16 %v4175_v0, %v4174_v34 }
 0x256   : > { %v4464_v38 = vpack.c.bf16 %v4432_v28, %v4432_v28  ;;  %v3939_v18 = vadd.f32 %v3877_v1, %v3257_v51  ;;  %v2944_v13 = vadd.f32 %v2885_v43, %v6425_v48 }
 0x257   : > { %5415 = vmatmul.msk.bf16.gmra.mxu0 %vm747_vm3, %v4190_v47 }
 0x258   : > { %4497 = vst.msk [vmem:[%s6795_s4 + $0x2c] sm:$0xf] %vm4485_vm7, %v4464_v38  ;;  %v4365_v60 = vadd.f32 %v4303_v21, %v3939_v18  ;;  %v3197_v7 = vpop.f32.mrf.mxu2  ;;  %5120 = vmatmul.msk.bf16.gmra.mxu1 %vm747_vm3, %v2768_v57 }
 0x259   : > { %v3258_v10 = vadd.f32 %v3197_v7, %v2943_v62 }
 0x25a   : > { %v4401_v5 = vadd.f32 %v6768_v3, %v4365_v60 }
 0x25c   : > { %v4433_v32 = vmax.f32 %v4401_v5, 0.0  ;;  %v4305_v30 = vpop.f32.mrf.mxu0 }
 0x25d   : > { %v3879_v39 = vpop.f32.mrf.mxu3  ;;  %5256 = vmatmul.msk.bf16.gmra.mxu2 %vm747_vm3, %v5491_v53  ;;  %v2887_v50 = vpop.f32.mrf.mxu1 }
 0x25e   : > { %v4465_v29 = vpack.c.bf16 %v4433_v32, %v4433_v32  ;;  %v3940_v42 = vadd.f32 %v3879_v39, %v3258_v10  ;;  %v2945_v48 = vadd.f32 %v2887_v50, %v6445_v27 }
 0x260   : > { %4498 = vst.msk [vmem:[%s6795_s4 + $0x30] sm:$0xf] %vm4485_vm7, %v4465_v29  ;;  %v4366_v37 = vadd.f32 %v4305_v30, %v3940_v42  ;;  %v3200_v61 = vpop.f32.mrf.mxu2 }
 0x261   : > { %v3259_v25 = vadd.f32 %v3200_v61, %v2944_v13 }
 0x262   : > { %v4402_v24 = vadd.f32 %v6768_v3, %v4366_v37  ;;  %5344 = vmatmul.msk.bf16.gmra.mxu3 %vm747_vm3, %v3765_v45 }
 0x264   : > { %v4434_v11 = vmax.f32 %v4402_v24, 0.0  ;;  %v4308_v26 = vpop.f32.mrf.mxu0 }
 0x265   : > { %v3882_v51 = vpop.f32.mrf.mxu3  ;;  %v2890_v47 = vpop.f32.mrf.mxu1 }
 0x266   : > { %v4466_v52 = vpack.c.bf16 %v4434_v11, %v4434_v11  ;;  %v3941_v58 = vadd.f32 %v3882_v51, %v3259_v25  ;;  %v2946_v33 = vadd.f32 %v2890_v47, %v6464_v55 }
 0x267   : > { %5416 = vmatmul.msk.bf16.gmra.mxu0 %vm747_vm3, %v4191_v59 }
 0x268   : > { %4499 = vst.msk [vmem:[%s6795_s4 + $0x34] sm:$0xf] %vm4485_vm7, %v4466_v52  ;;  %v4367_v31 = vadd.f32 %v4308_v26, %v3941_v58  ;;  %v3202_v28 = vpop.f32.mrf.mxu2 }
 0x269   : > { %v3260_v57 = vadd.f32 %v3202_v28, %v2945_v48 }
 0x26a   : > { %v4403_v21 = vadd.f32 %v6768_v3, %v4367_v31 }
 0x26c   : > { %v4435_v6 = vmax.f32 %v4403_v21, 0.0  ;;  %v4310_v9 = vpop.f32.mrf.mxu0 }
 0x26d   : > { %v3884_v1 = vpop.f32.mrf.mxu3  ;;  %v2892_v43 = vpop.f32.mrf.mxu1 }
 0x26e   : > { %v4467_v38 = vpack.c.bf16 %v4435_v6, %v4435_v6  ;;  %v3942_v18 = vadd.f32 %v3884_v1, %v3260_v57  ;;  %v2947_v35 = vadd.f32 %v2892_v43, %v6485_v46 }
 0x270   : > { %4500 = vst.msk [vmem:[%s6795_s4 + $0x38] sm:$0xf] %vm4485_vm7, %v4467_v38  ;;  %v4368_v14 = vadd.f32 %v4310_v9, %v3942_v18  ;;  %v3205_v54 = vpop.f32.mrf.mxu2 }
 0x271   : > { %v3261_v27 = vadd.f32 %v3205_v54, %v2946_v33 }
 0x272   : > { %v4404_v60 = vadd.f32 %v6768_v3, %v4368_v14 }
 0x274   : > { %v4436_v62 = vmax.f32 %v4404_v60, 0.0  ;;  %v4313_v7 = vpop.f32.mrf.mxu0 }
 0x275   : > { %v3887_v12 = vpop.f32.mrf.mxu3  ;;  %v2895_v4 = vpop.f32.mrf.mxu1 }
 0x276   : > { %v4468_v53 = vpack.c.bf16 %v4436_v62, %v4436_v62  ;;  %v3943_v5 = vadd.f32 %v3887_v12, %v3261_v27  ;;  %v2948_v45 = vadd.f32 %v2895_v4, %v6503_v15  ;;  %v7074_v15 = vld [vmem:[%s7141_s2] ss:$0 sm:$0xff] }
 0x278   : > { %4501 = vst.msk [vmem:[%s6795_s4 + $0x3c] sm:$0xf] %vm4485_vm7, %v4468_v53  ;;  %v4369_v10 = vadd.f32 %v4313_v7, %v3943_v5  ;;  %v3207_v17 = vpop.f32.mrf.mxu2 }
 0x279   : > { %v3262_v55 = vadd.f32 %v3207_v17, %v2947_v35 }
 0x27a   : > { %v4405_v32 = vadd.f32 %v6768_v3, %v4369_v10 }
 0x27c   : > { %v4437_v30 = vmax.f32 %v4405_v32, 0.0  ;;  %v4315_v20 = vpop.f32.mrf.mxu0 }
 0x27d   : > { %v3889_v63 = vpop.f32.mrf.mxu3  ;;  %v2897_v39 = vpop.f32.mrf.mxu1 }
 0x27e   : > { %v4469_v50 = vpack.c.bf16 %v4437_v30, %v4437_v30  ;;  %v3944_v29 = vadd.f32 %v3889_v63, %v3262_v55  ;;  %v2949_v26 = vadd.f32 %v2897_v39, %v6523_v22 }
 0x280   : > { %4502 = vst.msk [vmem:[%s6795_s4 + $0x40] sm:$0xf] %vm4485_vm7, %v4469_v50  ;;  %v4370_v42 = vadd.f32 %v4315_v20, %v3944_v29  ;;  %v3210_v34 = vpop.f32.mrf.mxu2 }
 0x281   : > { %v3263_v46 = vadd.f32 %v3210_v34, %v2948_v45 }
 0x282   : > { %v4406_v0 = vadd.f32 %v6768_v3, %v4370_v42 }
 0x284   : > { %v4438_v37 = vmax.f32 %v4406_v0, 0.0  ;;  %v4318_v13 = vpop.f32.mrf.mxu0 }
 0x285   : > { %v3892_v61 = vpop.f32.mrf.mxu3  ;;  %v2900_v24 = vpop.f32.mrf.mxu1 }
 0x286   : > { %v4470_v25 = vpack.c.bf16 %v4438_v37, %v4438_v37  ;;  %v3945_v59 = vadd.f32 %v3892_v61, %v3263_v46  ;;  %v2950_v22 = vadd.f32 %v2900_v24, %v6542_v8 }
 0x288   : > { %4503 = vst.msk [vmem:[%s6795_s4 + $0x44] sm:$0xf] %vm4485_vm7, %v4470_v25  ;;  %v4371_v11 = vadd.f32 %v4318_v13, %v3945_v59  ;;  %v3212_v51 = vpop.f32.mrf.mxu2 }
 0x289   : > { %v3264_v47 = vadd.f32 %v3212_v51, %v2949_v26 }
 0x28a   : > { %v4407_v3 = vadd.f32 %v7074_v15, %v4371_v11 }
 0x28c   : > { %v4439_v52 = vmax.f32 %v4407_v3, 0.0  ;;  %v4320_v58 = vpop.f32.mrf.mxu0 }
 0x28d   : > { %v3894_v31 = vpop.f32.mrf.mxu3  ;;  %v2902_v48 = vpop.f32.mrf.mxu1 }
 0x28e   : > { %v4471_v28 = vpack.c.bf16 %v4439_v52, %v4439_v52  ;;  %v3946_v21 = vadd.f32 %v3894_v31, %v3264_v47  ;;  %v2951_v27 = vadd.f32 %v2902_v48, %v6563_v16 }
 0x290   : > { %4504 = vst.msk [vmem:[%s6795_s4 + $0x48] sm:$0xf] %vm4485_vm7, %v4471_v28  ;;  %v4372_v57 = vadd.f32 %v4320_v58, %v3946_v21  ;;  %v3215_v6 = vpop.f32.mrf.mxu2 }
 0x291   : > { %v3265_v1 = vadd.f32 %v3215_v6, %v2950_v22 }
 0x292   : > { %v4408_v9 = vadd.f32 %v7074_v15, %v4372_v57 }
 0x294   : > { %v4440_v43 = vmax.f32 %v4408_v9, 0.0  ;;  %v4323_v38 = vpop.f32.mrf.mxu0 }
 0x295   : > { %v3897_v18 = vpop.f32.mrf.mxu3  ;;  %v2905_v14 = vpop.f32.mrf.mxu1 }
 0x296   : > { %v4472_v33 = vpack.c.bf16 %v4440_v43, %v4440_v43  ;;  %v3947_v54 = vadd.f32 %v3897_v18, %v3265_v1  ;;  %v2952_v32 = vadd.f32 %v2905_v14, %v6581_v23 }
 0x298   : > { %4505 = vst.msk [vmem:[%s6795_s4 + $0x4c] sm:$0xf] %vm4485_vm7, %v4472_v33  ;;  %v4373_v60 = vadd.f32 %v4323_v38, %v3947_v54  ;;  %v3217_v62 = vpop.f32.mrf.mxu2 }
 0x299   : > { %v3266_v8 = vadd.f32 %v3217_v62, %v2951_v27 }
 0x29a   : > { %v4409_v7 = vadd.f32 %v7074_v15, %v4373_v60 }
 0x29c   : > { %v4441_v12 = vmax.f32 %v4409_v7, 0.0  ;;  %v4325_v4 = vpop.f32.mrf.mxu0 }
 0x29d   : > { %v3899_v53 = vpop.f32.mrf.mxu3  ;;  %v2907_v5 = vpop.f32.mrf.mxu1 }
 0x29e   : > { %v4473_v10 = vpack.c.bf16 %v4441_v12, %v4441_v12  ;;  %v3948_v35 = vadd.f32 %v3899_v53, %v3266_v8  ;;  %v2953_v34 = vadd.f32 %v2907_v5, %v6601_v40 }
 0x2a0   : > { %4506 = vst.msk [vmem:[%s6795_s4 + $0x50] sm:$0xf] %vm4485_vm7, %v4473_v10  ;;  %v4374_v17 = vadd.f32 %v4325_v4, %v3948_v35  ;;  %v3220_v55 = vpop.f32.mrf.mxu2 }
 0x2a1   : > { %v3267_v16 = vadd.f32 %v3220_v55, %v2952_v32 }
 0x2a2   : > { %v4410_v30 = vadd.f32 %v7074_v15, %v4374_v17 }
 0x2a4   : > { %v4442_v20 = vmax.f32 %v4410_v30, 0.0  ;;  %v4328_v63 = vpop.f32.mrf.mxu0 }
 0x2a5   : > { %v3902_v39 = vpop.f32.mrf.mxu3  ;;  %v2910_v50 = vpop.f32.mrf.mxu1 }
 0x2a6   : > { %v4474_v29 = vpack.c.bf16 %v4442_v20, %v4442_v20  ;;  %v3949_v42 = vadd.f32 %v3902_v39, %v3267_v16  ;;  %v2954_v26 = vadd.f32 %v2910_v50, %v6620_v56  ;;  %v7152_v39 = vld [vmem:[#allocation4_spill] sm:$0xff] }
 0x2a8   : > { %4507 = vst.msk [vmem:[%s6795_s4 + $0x54] sm:$0xf] %vm4485_vm7, %v4474_v29  ;;  %v4375_v45 = vadd.f32 %v4328_v63, %v3949_v42  ;;  %v3222_v0 = vpop.f32.mrf.mxu2 }
 0x2a9   : > { %v3268_v23 = vadd.f32 %v3222_v0, %v2953_v34 }
 0x2aa   : > { %v4411_v46 = vadd.f32 %v7074_v15, %v4375_v45 }
 0x2ac   : > { %v4443_v37 = vmax.f32 %v4411_v46, 0.0  ;;  %v4330_v13 = vpop.f32.mrf.mxu0 }
 0x2ad   : > { %v3904_v61 = vpop.f32.mrf.mxu3  ;;  %v2912_v24 = vpop.f32.mrf.mxu1 }
 0x2ae   : > { %v4475_v25 = vpack.c.bf16 %v4443_v37, %v4443_v37  ;;  %v3950_v59 = vadd.f32 %v3904_v61, %v3268_v23  ;;  %v2955_v57 = vadd.f32 %v2912_v24, %v6641_v2 }
 0x2b0   : > { %4508 = vst.msk [vmem:[%s6795_s4 + $0x58] sm:$0xf] %vm4485_vm7, %v4475_v25  ;;  %v4376_v11 = vadd.f32 %v4330_v13, %v3950_v59  ;;  %v3225_v51 = vpop.f32.mrf.mxu2 }
 0x2b1   : > { %v3269_v40 = vadd.f32 %v3225_v51, %v2954_v26 }
 0x2b2   : > { %v4412_v3 = vadd.f32 %v7074_v15, %v4376_v11 }
 0x2b4   : > { %v4444_v47 = vmax.f32 %v4412_v3, 0.0  ;;  %v4333_v52 = vpop.f32.mrf.mxu0 }
 0x2b5   : > { %v3907_v58 = vpop.f32.mrf.mxu3  ;;  %v2915_v31 = vpop.f32.mrf.mxu1 }
 0x2b6   : > { %v4476_v48 = vpack.c.bf16 %v4444_v47, %v4444_v47  ;;  %v3951_v28 = vadd.f32 %v3907_v58, %v3269_v40  ;;  %v2956_v54 = vadd.f32 %v2915_v31, %v6659_v19 }
 0x2b8   : > { %4509 = vst.msk [vmem:[%s6795_s4 + $0x5c] sm:$0xf] %vm4485_vm7, %v4476_v48  ;;  %v4377_v21 = vadd.f32 %v4333_v52, %v3951_v28  ;;  %v3227_v22 = vpop.f32.mrf.mxu2 }
 0x2b9   : > { %v3270_v56 = vadd.f32 %v3227_v22, %v2955_v57 }
 0x2ba   : > { %v4413_v6 = vadd.f32 %v7074_v15, %v4377_v21 }
 0x2bc   : > { %v4445_v9 = vmax.f32 %v4413_v6, 0.0  ;;  %v4335_v1 = vpop.f32.mrf.mxu0 }
 0x2bd   : > { %v3909_v43 = vpop.f32.mrf.mxu3  ;;  %v2917_v38 = vpop.f32.mrf.mxu1 }
 0x2be   : > { %v4477_v18 = vpack.c.bf16 %v4445_v9, %v4445_v9  ;;  %v3952_v14 = vadd.f32 %v3909_v43, %v3270_v56  ;;  %v2957_v10 = vadd.f32 %v2917_v38, %v6685_v36 }
 0x2c0   : > { %4510 = vst.msk [vmem:[%s6795_s4 + $0x60] sm:$0xf] %vm4485_vm7, %v4477_v18  ;;  %v4378_v33 = vadd.f32 %v4335_v1, %v3952_v14  ;;  %v3230_v60 = vpop.f32.mrf.mxu2 }
 0x2c1   : > { %v3271_v2 = vadd.f32 %v3230_v60, %v2956_v54 }
 0x2c2   : > { %v4414_v27 = vadd.f32 %v7074_v15, %v4378_v33 }
 0x2c4   : > { %v4446_v62 = vmax.f32 %v4414_v27, 0.0  ;;  %v4338_v7 = vpop.f32.mrf.mxu0 }
 0x2c5   : > { %v3912_v8 = vpop.f32.mrf.mxu3  ;;  %v2920_v53 = vpop.f32.mrf.mxu1 }
 0x2c6   : > { %v4478_v12 = vpack.c.bf16 %v4446_v62, %v4446_v62  ;;  %v3953_v4 = vadd.f32 %v3912_v8, %v3271_v2  ;;  %v2958_v50 = vadd.f32 %v2920_v53, %v7152_v39 }
 0x2c8   : > { %4511 = vst.msk [vmem:[%s6795_s4 + $0x64] sm:$0xf] %vm4485_vm7, %v4478_v12  ;;  %v4379_v5 = vadd.f32 %v4338_v7, %v3953_v4  ;;  %v3232_v35 = vpop.f32.mrf.mxu2 }
 0x2c9   : > { %v3272_v19 = vadd.f32 %v3232_v35, %v2957_v10 }
 0x2ca   : > { %v4415_v17 = vadd.f32 %v7074_v15, %v4379_v5 }
 0x2cc   : > { %v4447_v32 = vmax.f32 %v4415_v17, 0.0  ;;  %v4340_v55 = vpop.f32.mrf.mxu0 }
 0x2cd   : > { %v3914_v30 = vpop.f32.mrf.mxu3  ;;  %v2922_v42 = vpop.f32.mrf.mxu1 }
 0x2ce   : > { %v4479_v16 = vpack.c.bf16 %v4447_v32, %v4447_v32  ;;  %v3954_v20 = vadd.f32 %v3914_v30, %v3272_v19  ;;  %v2959_v61 = vadd.f32 %v2922_v42, %v6724_v41 }
 0x2d0   : > { %4512 = vst.msk [vmem:[%s6795_s4 + $0x68] sm:$0xf] %vm4485_vm7, %v4479_v16  ;;  %v4380_v63 = vadd.f32 %v4340_v55, %v3954_v20  ;;  %v3235_v29 = vpop.f32.mrf.mxu2 }
 0x2d1   : > { %v3273_v36 = vadd.f32 %v3235_v29, %v2958_v50 }
 0x2d2   : > { %v4416_v45 = vadd.f32 %v7074_v15, %v4380_v63 }
 0x2d4   : > { %v4448_v34 = vmax.f32 %v4416_v45, 0.0  ;;  %v4343_v0 = vpop.f32.mrf.mxu0 }
 0x2d5   : > { %v3917_v46 = vpop.f32.mrf.mxu3  ;;  %v2925_v11 = vpop.f32.mrf.mxu1 }
 0x2d6   : > { %v4480_v23 = vpack.c.bf16 %v4448_v34, %v4448_v34  ;;  %v3955_v37 = vadd.f32 %v3917_v46, %v3273_v36  ;;  %v2960_v58 = vadd.f32 %v2925_v11, %v6739_v44 }
 0x2d8   : > { %4513 = vst.msk [vmem:[%s6795_s4 + $0x6c] sm:$0xf] %vm4485_vm7, %v4480_v23  ;;  %v4381_v13 = vadd.f32 %v4343_v0, %v3955_v37  ;;  %v3237_v24 = vpop.f32.mrf.mxu2 }
 0x2d9   : > { %v3274_v59 = vadd.f32 %v3237_v24, %v2959_v61 }
 0x2da   : > { %v4417_v25 = vadd.f32 %v7074_v15, %v4381_v13 }
 0x2dc   : > { %v4449_v26 = vmax.f32 %v4417_v25, 0.0  ;;  %v4345_v51 = vpop.f32.mrf.mxu0 }
 0x2dd   : > { %v3919_v3 = vpop.f32.mrf.mxu3  ;;  %v2927_v21 = vpop.f32.mrf.mxu1 }
 0x2de   : > { %v4481_v40 = vpack.c.bf16 %v4449_v26, %v4449_v26  ;;  %v3956_v47 = vadd.f32 %v3919_v3, %v3274_v59  ;;  %v2961_v1 = vadd.f32 %v2927_v21, %v6760_v49 }
 0x2e0   : > { %4514 = vst.msk [vmem:[%s6795_s4 + $0x70] sm:$0xf] %vm4485_vm7, %v4481_v40  ;;  %v4382_v52 = vadd.f32 %v4345_v51, %v3956_v47  ;;  %v3240_v31 = vpop.f32.mrf.mxu2 }
 0x2e1   : > { %v3275_v41 = vadd.f32 %v3240_v31, %v2960_v58 }
 0x2e2   : > { %v4418_v48 = vadd.f32 %v7074_v15, %v4382_v52 }
 0x2e4   : > { %v4450_v28 = vmax.f32 %v4418_v48, 0.0  ;;  %v4348_v57 = vpop.f32.mrf.mxu0 }
 0x2e5   : > { %v3922_v22 = vpop.f32.mrf.mxu3 }
 0x2e6   : > { %v4482_v6 = vpack.c.bf16 %v4450_v28, %v4450_v28  ;;  %v3957_v56 = vadd.f32 %v3922_v22, %v3275_v41 }
 0x2e8   : > { %4515 = vst.msk [vmem:[%s6795_s4 + $0x74] sm:$0xf] %vm4485_vm7, %v4482_v6  ;;  %v4383_v9 = vadd.f32 %v4348_v57, %v3957_v56  ;;  %v3242_v43 = vpop.f32.mrf.mxu2 }
 0x2e9   : > { %v3276_v38 = vadd.f32 %v3242_v43, %v2961_v1 }
 0x2ea   : > { %v4419_v44 = vadd.f32 %v7074_v15, %v4383_v9 }
 0x2ec   : > { %v4451_v18 = vmax.f32 %v4419_v44, 0.0  ;;  %v4350_v60 = vpop.f32.mrf.mxu0 }
 0x2ed   : > { %v3924_v14 = vpop.f32.mrf.mxu3 }
 0x2ee   : > { %v4483_v33 = vpack.c.bf16 %v4451_v18, %v4451_v18  ;;  %v3958_v54 = vadd.f32 %v3924_v14, %v3276_v38 }
 0x2f0   : > { %4516 = vst.msk [vmem:[%s6795_s4 + $0x78] sm:$0xf] %vm4485_vm7, %v4483_v33  ;;  %v4384_v27 = vadd.f32 %v4350_v60, %v3958_v54 }
 0x2f2   : > { %v4420_v2 = vadd.f32 %v7074_v15, %v4384_v27 }
 0x2f4   : > { %v4452_v62 = vmax.f32 %v4420_v2, 0.0 }
 0x2f6   : > { %v4484_v7 = vpack.c.bf16 %v4452_v62, %v4452_v62 }
 0x2f8   : > { %4517 = vst.msk [vmem:[%s6795_s4 + $0x7c] sm:$0xf] %vm4485_vm7, %v4484_v7 }
 0x2f9 PF: > { %s13_s14 = sadd.s32 1, %s5617_s14   ;;  %s7153_s12 = smov %s5613_s13 }
 0x2fa   : > { %p10_p5 = scmp.ge.s32.totalorder %s13_s14, 4   ;;  %s7154_s13 = smov %s7156_s15 }
 0x2fc   :  { %12 = sbr.rel (!%p10_p5) target bundleno = 2 (0x2), region = 78 }

</bundles_post_ra>
